<compile_context>
chip_gen: v7x
topology: tpu7x:2x2x1
jax: 0.10.0
libtpu: 0.0.40
codegen_flags: <defaults>
</compile_context>

<pallas_src>
import jax
import jax.numpy as jnp
import numpy as np
from jax.experimental import pallas as pl
from jax.experimental.pallas import tpu as pltpu


# ----------------------------------------------------------------------------
# Fused kernel: 2-layer LSTM (unrolled over time) + conv1d(k=1) head.
# ----------------------------------------------------------------------------
def _fused_kernel(x_ref, w0_ref, b0_ref, w1_ref, b1_ref,
                  c1w_ref, c1b_ref, c2w_ref, c2b_ref, o_ref, h1_sc):
    L, B, EP = x_ref.shape            # (8, 2, 128)  (E zero-padded to 128)
    H = o_ref.shape[-1]               # 128
    C1 = c1w_ref.shape[0]             # 64

    # Hoisted bias broadcasts (JAX does not CSE broadcast_in_dim inside loops).
    b0 = jnp.broadcast_to(b0_ref[...], (B, 4 * H))
    b1 = jnp.broadcast_to(b1_ref[...], (B, 4 * H))
    c1b = jnp.broadcast_to(c1b_ref[...], (C1, H))
    c2b = c2b_ref[0, 0]               # f32 scalar from SMEM

    def lstm_cell(xin, h, c, w_ref_, b):
        # xin/h are lane-aligned (B, 128); single fused gate matmul, K = 256.
        z = jnp.concatenate([xin, h], axis=-1)                       # (B, 2H)
        gates = jnp.dot(z, w_ref_[...],
                        preferred_element_type=jnp.float32) + b      # (B, 4H)
        i = jax.nn.sigmoid(gates[:, 0 * H:1 * H])
        f = jax.nn.sigmoid(gates[:, 1 * H:2 * H])
        g = jnp.tanh(gates[:, 2 * H:3 * H])
        o = jax.nn.sigmoid(gates[:, 3 * H:4 * H])
        c_new = f * c + i * g
        h_new = o * jnp.tanh(c_new)
        return h_new, c_new

    zero = jnp.zeros((B, H), jnp.float32)

    # ---- LSTM layer 0: static unroll over L; h/c stay in vregs. ----
    h, c = zero, zero
    h0_seq = []
    for t in range(L):
        h, c = lstm_cell(x_ref[t], h, c, w0_ref, b0)
        h0_seq.append(h)

    # ---- LSTM layer 1 (eval mode: no inter-layer dropout). ----
    h, c = zero, zero
    for t in range(L):
        h, c = lstm_cell(h0_seq[t], h, c, w1_ref, b1)
        h1_sc[:, t, :] = h                              # (B, L, H) VMEM scratch

    # ---- Conv head: k=1 convs mix only the L (channel) axis. ----
    # out[b, w] = relu( w2 @ relu(w1 @ Y_b + b1c) + b2c ),  Y_b = h1_sc[b]: (L, H)
    rows = []
    for b in range(B):
        yb = h1_sc[b]                                                # (L, H)
        z1 = jnp.dot(c1w_ref[...], yb,
                     preferred_element_type=jnp.float32) + c1b       # (C1, H)
        z1 = jnp.maximum(z1, 0.0)
        z2 = jnp.dot(c2w_ref[...], z1,
                     preferred_element_type=jnp.float32) + c2b       # (1, H)
        # relu(conv2) then relu(squeeze) -- relu is idempotent, apply once.
        rows.append(jnp.maximum(z2, 0.0))
    o_ref[...] = jnp.concatenate(rows, axis=0)                       # (B, H)


# ----------------------------------------------------------------------------
# Forward wrapper
# ----------------------------------------------------------------------------
def text_classify_forward(tokens, packed):
    B, L = tokens.shape
    H = packed["w0_cat"].shape[1] // 4
    EP = packed["embedding_pad"].shape[1]
    C1 = packed["conv1_w"].shape[0]
    assert packed["conv1_w"].shape[1] == L, (
        "conv1 in-channels (max_seq_len) must equal the runtime sequence length")

    emb = packed["embedding_pad"][tokens]            # (B, L, EP)  gather (JAX glue)
    x_seq = jnp.transpose(emb, (1, 0, 2))            # (L, B, EP)  time-major

    return pl.pallas_call(
        _fused_kernel,
        out_shape=jax.ShapeDtypeStruct((B, H), jnp.float32),
        grid=(1,),
        in_specs=[
            pl.BlockSpec((L, B, EP), lambda i: (0, 0, 0)),      # x_seq (full block)
            pl.BlockSpec((EP + H, 4 * H), lambda i: (0, 0)),    # layer-0 W (resident)
            pl.BlockSpec((1, 4 * H), lambda i: (0, 0)),         # layer-0 bias
            pl.BlockSpec((2 * H, 4 * H), lambda i: (0, 0)),     # layer-1 W (resident)
            pl.BlockSpec((1, 4 * H), lambda i: (0, 0)),         # layer-1 bias
            pl.BlockSpec((C1, L), lambda i: (0, 0)),            # conv1 weight
            pl.BlockSpec((C1, 1), lambda i: (0, 0)),            # conv1 bias
            pl.BlockSpec((1, C1), lambda i: (0, 0)),            # conv2 weight
            pl.BlockSpec(memory_space=pltpu.MemorySpace.SMEM),  # conv2 bias (1,1) scalar
        ],
        out_specs=pl.BlockSpec((B, H), lambda i: (0, 0)),
        scratch_shapes=[pltpu.VMEM((B, L, H), jnp.float32)],    # layer-1 h_seq (8 KiB)
        compiler_params=pltpu.CompilerParams(
            dimension_semantics=("arbitrary",)),
    )(x_seq, packed["w0_cat"], packed["b0"], packed["w1_cat"], packed["b1"],
      packed["conv1_w"], packed["conv1_b"], packed["conv2_w"], packed["conv2_b"])


# ----------------------------------------------------------------------------
# Pure-JAX reference (correctness check only)
# ----------------------------------------------------------------------------
def _lstm_layer_ref(x_seq, w_ih_t, w_hh_t, b):
    L, B, _ = x_seq.shape
    H = w_hh_t.shape[0]

    def step(carry, x_t):
        h, c = carry
        gates = x_t @ w_ih_t + h @ w_hh_t + b
        i = jax.nn.sigmoid(gates[:, :H])
        f = jax.nn.sigmoid(gates[:, H:2 * H])
        g = jnp.tanh(gates[:, 2 * H:3 * H])
        o = jax.nn.sigmoid(gates[:, 3 * H:])
        c = f * c + i * g
        h = o * jnp.tanh(c)
        return (h, c), h

    _, hs = jax.lax.scan(step, (jnp.zeros((B, H)), jnp.zeros((B, H))), x_seq)
    return hs


def text_classify_ref(tokens, params):
    emb = params["embedding"][tokens]
    x_seq = jnp.transpose(emb, (1, 0, 2))
    h_seq = x_seq
    for layer in range(2):
        p = params["lstm"][layer]
        h_seq = _lstm_layer_ref(h_seq, p["w_ih_t"], p["w_hh_t"], p["b"])
    y = jnp.transpose(h_seq, (1, 0, 2))                                   # (B, L, H)
    z1 = jnp.einsum("ol,blk->bok", params["conv1_w"], y) + params["conv1_b"][None, :, :]
    z1 = jnp.maximum(z1, 0.0)
    z2 = jnp.einsum("po,bok->bpk", params["conv2_w"], z1) + params["conv2_b"][None, :, :]
    z2 = jnp.maximum(z2, 0.0)
    return jnp.maximum(jnp.squeeze(z2, axis=1), 0.0)


# ----------------------------------------------------------------------------
# Parameter construction (deterministic, synthetic) + kernel packing
# ----------------------------------------------------------------------------
def make_params(key, vocab_size, max_seq_len, embedding_size, hidden=128, conv_mid=64):
    ks = jax.random.split(key, 16)
    scale = 0.1
    params = {
        "embedding": scale * jax.random.normal(
            ks[0], (vocab_size, embedding_size), jnp.float32),
        "lstm": [],
        "conv1_w": scale * jax.random.normal(ks[1], (conv_mid, max_seq_len), jnp.float32),
        "conv1_b": scale * jax.random.normal(ks[2], (conv_mid, 1), jnp.float32),
        "conv2_w": scale * jax.random.normal(ks[3], (1, conv_mid), jnp.float32),
        "conv2_b": scale * jax.random.normal(ks[4], (1, 1), jnp.float32),
    }
    in_sizes = [embedding_size, hidden]
    for layer in range(2):
        kw = jax.random.split(ks[5 + layer], 4)
        w_ih = scale * jax.random.normal(kw[0], (4 * hidden, in_sizes[layer]), jnp.float32)
        w_hh = scale * jax.random.normal(kw[1], (4 * hidden, hidden), jnp.float32)
        b_ih = scale * jax.random.normal(kw[2], (4 * hidden,), jnp.float32)
        b_hh = scale * jax.random.normal(kw[3], (4 * hidden,), jnp.float32)
        params["lstm"].append({
            "w_ih_t": w_ih.T,                          # (in, 4H)
            "w_hh_t": w_hh.T,                          # (H, 4H)
            "b": (b_ih + b_hh)[None, :],               # (1, 4H)
        })
    return params


def pack_params(params, hidden=128):
    """Repack natural params for the fused kernel: pad E->128 lanes and
    concatenate W_ih^T / W_hh^T so each time step is one gate matmul."""
    H = hidden
    EP = H                                             # lane-aligned input width
    emb = params["embedding"]
    vocab, E = emb.shape
    assert E <= EP
    emb_pad = jnp.zeros((vocab, EP), jnp.float32).at[:, :E].set(emb)

    p0, p1 = params["lstm"]
    w_ih0_pad = jnp.zeros((EP, 4 * H), jnp.float32).at[:E, :].set(p0["w_ih_t"])
    return {
        "embedding_pad": emb_pad,
        "w0_cat": jnp.concatenate([w_ih0_pad, p0["w_hh_t"]], axis=0),   # (EP+H, 4H)
        "b0": p0["b"],
        "w1_cat": jnp.concatenate([p1["w_ih_t"], p1["w_hh_t"]], axis=0),  # (2H, 4H)
        "b1": p1["b"],
        "conv1_w": params["conv1_w"],
        "conv1_b": params["conv1_b"],
        "conv2_w": params["conv2_w"],
        "conv2_b": params["conv2_b"],
    }


if __name__ == "__main__":
    # Small shapes consistent with the module: TextClassify(vocab, max_seq_len=8,
    # embedding_size=32); LSTM hidden 128 and conv channels 64/1 are fixed by the module.
    B, L, E, H = 2, 8, 32, 128
    VOCAB = 100

    key = jax.random.PRNGKey(0)
    k_tok, k_par = jax.random.split(key)
    tokens = jax.random.randint(k_tok, (B, L), 0, VOCAB, dtype=jnp.int32)
    params = make_params(k_par, VOCAB, L, E, hidden=H)
    packed = pack_params(params, hidden=H)

    out = jax.block_until_ready(text_classify_forward(tokens, packed))
    ref = jax.block_until_ready(text_classify_ref(tokens, params))

    assert out.shape == (B, H), out.shape
    np.testing.assert_allclose(np.asarray(out), np.asarray(ref), atol=1e-4, rtol=1e-4)
    print("KERNEL_OK")
</pallas_src>

<mosaic_0001>
module attributes {stable_mosaic.version = 11 : i64} {
  func.func @_fused_kernel(%arg0: i32, %arg1: memref<8x2x128xf32, #tpu.memory_space<vmem>>, %arg2: memref<256x512xf32, #tpu.memory_space<vmem>>, %arg3: memref<1x512xf32, #tpu.memory_space<vmem>>, %arg4: memref<256x512xf32, #tpu.memory_space<vmem>>, %arg5: memref<1x512xf32, #tpu.memory_space<vmem>>, %arg6: memref<64x8xf32, #tpu.memory_space<vmem>>, %arg7: memref<64x1xf32, #tpu.memory_space<vmem>>, %arg8: memref<1x64xf32, #tpu.memory_space<vmem>>, %arg9: memref<1x1xf32, #tpu.memory_space<smem>>, %arg10: memref<2x128xf32, #tpu.memory_space<vmem>>, %arg11: memref<2x8x128xf32, #tpu.memory_space<vmem>>) attributes {dimension_semantics = [#tpu.dimension_semantics<arbitrary>], iteration_bounds = array<i64: 1>, scalar_prefetch = 0 : i64, scratch_operands = 1 : i64, tpu.core_type = #tpu.core_type<tc>, window_params = [{pipeline_mode = #tpu.pipeline_mode<synchronous>, transform_indices = @transform_0, window_bounds = array<i64: 8, 2, 128>}, {pipeline_mode = #tpu.pipeline_mode<synchronous>, transform_indices = @transform_1, window_bounds = array<i64: 256, 512>}, {pipeline_mode = #tpu.pipeline_mode<synchronous>, transform_indices = @transform_2, window_bounds = array<i64: 1, 512>}, {pipeline_mode = #tpu.pipeline_mode<synchronous>, transform_indices = @transform_3, window_bounds = array<i64: 256, 512>}, {pipeline_mode = #tpu.pipeline_mode<synchronous>, transform_indices = @transform_4, window_bounds = array<i64: 1, 512>}, {pipeline_mode = #tpu.pipeline_mode<synchronous>, transform_indices = @transform_5, window_bounds = array<i64: 64, 8>}, {pipeline_mode = #tpu.pipeline_mode<synchronous>, transform_indices = @transform_6, window_bounds = array<i64: 64, 1>}, {pipeline_mode = #tpu.pipeline_mode<synchronous>, transform_indices = @transform_7, window_bounds = array<i64: 1, 64>}, {transform_indices = @transform_8, window_bounds = array<i64: 1, 1>}, {pipeline_mode = #tpu.pipeline_mode<synchronous>, transform_indices = @transform_9, window_bounds = array<i64: 2, 128>}]} {
    %c0 = arith.constant 0 : index
    %c0_0 = arith.constant 0 : index
    %0 = vector.load %arg3[%c0, %c0_0] : memref<1x512xf32, #tpu.memory_space<vmem>>, vector<1x512xf32>
    %1 = vector.shape_cast %0 : vector<1x512xf32> to vector<1x512xf32>
    %2 = vector.broadcast %1 : vector<1x512xf32> to vector<2x512xf32>
    %c0_1 = arith.constant 0 : index
    %c0_2 = arith.constant 0 : index
    %3 = vector.load %arg5[%c0_1, %c0_2] : memref<1x512xf32, #tpu.memory_space<vmem>>, vector<1x512xf32>
    %4 = vector.shape_cast %3 : vector<1x512xf32> to vector<1x512xf32>
    %5 = vector.broadcast %4 : vector<1x512xf32> to vector<2x512xf32>
    %c0_3 = arith.constant 0 : index
    %c0_4 = arith.constant 0 : index
    %6 = vector.load %arg7[%c0_3, %c0_4] : memref<64x1xf32, #tpu.memory_space<vmem>>, vector<64x1xf32>
    %7 = vector.shape_cast %6 : vector<64x1xf32> to vector<64x1xf32>
    %8 = vector.broadcast %7 : vector<64x1xf32> to vector<64x128xf32>
    %c0_5 = arith.constant 0 : index
    %c0_6 = arith.constant 0 : index
    %9 = memref.load %arg9[%c0_5, %c0_6] : memref<1x1xf32, #tpu.memory_space<smem>>
    %cst = arith.constant 0.000000e+00 : f32
    %10 = vector.broadcast %cst : f32 to vector<2x128xf32>
    %c0_7 = arith.constant 0 : index
    %c0_8 = arith.constant 0 : index
    %c0_9 = arith.constant 0 : index
    %11 = vector.load %arg1[%c0_7, %c0_8, %c0_9] : memref<8x2x128xf32, #tpu.memory_space<vmem>>, vector<1x2x128xf32>
    %12 = vector.shape_cast %11 : vector<1x2x128xf32> to vector<2x128xf32>
    %13 = tpu.concatenate %12, %10 in 1 : vector<2x128xf32>, vector<2x128xf32> -> vector<2x256xf32>
    %c0_10 = arith.constant 0 : index
    %c0_11 = arith.constant 0 : index
    %14 = vector.load %arg2[%c0_10, %c0_11] : memref<256x512xf32, #tpu.memory_space<vmem>>, vector<256x512xf32>
    %cst_12 = arith.constant dense<0.000000e+00> : vector<2x512xf32>
    %15 = tpu.matmul %13, %14, %cst_12 {dimension_numbers = #tpu.dot_dimension_numbers<[1], [0], [0], [1], [0, 0, 1, 1], [], []>} : vector<2x256xf32>, vector<256x512xf32>, vector<2x512xf32> -> vector<2x512xf32>
    %16 = arith.addf %15, %2 : vector<2x512xf32>
    %17 = vector.extract_strided_slice %16 {offsets = [0, 0], sizes = [2, 128], strides = [1, 1]} : vector<2x512xf32> to vector<2x128xf32>
    %18 = arith.negf %17 : vector<2x128xf32>
    %19 = math.exp %18 : vector<2x128xf32>
    %cst_13 = arith.constant 1.000000e+00 : f32
    %20 = vector.broadcast %cst_13 : f32 to vector<2x128xf32>
    %21 = arith.addf %20, %19 : vector<2x128xf32>
    %22 = arith.divf %20, %21 : vector<2x128xf32>
    %23 = vector.extract_strided_slice %16 {offsets = [0, 128], sizes = [2, 128], strides = [1, 1]} : vector<2x512xf32> to vector<2x128xf32>
    %24 = arith.negf %23 : vector<2x128xf32>
    %25 = math.exp %24 : vector<2x128xf32>
    %cst_14 = arith.constant 1.000000e+00 : f32
    %26 = vector.broadcast %cst_14 : f32 to vector<2x128xf32>
    %27 = arith.addf %26, %25 : vector<2x128xf32>
    %28 = arith.divf %26, %27 : vector<2x128xf32>
    %29 = vector.extract_strided_slice %16 {offsets = [0, 256], sizes = [2, 128], strides = [1, 1]} : vector<2x512xf32> to vector<2x128xf32>
    %30 = math.tanh %29 : vector<2x128xf32>
    %31 = vector.extract_strided_slice %16 {offsets = [0, 384], sizes = [2, 128], strides = [1, 1]} : vector<2x512xf32> to vector<2x128xf32>
    %32 = arith.negf %31 : vector<2x128xf32>
    %33 = math.exp %32 : vector<2x128xf32>
    %cst_15 = arith.constant 1.000000e+00 : f32
    %34 = vector.broadcast %cst_15 : f32 to vector<2x128xf32>
    %35 = arith.addf %34, %33 : vector<2x128xf32>
    %36 = arith.divf %34, %35 : vector<2x128xf32>
    %37 = arith.mulf %28, %10 : vector<2x128xf32>
    %38 = arith.mulf %22, %30 : vector<2x128xf32>
    %39 = arith.addf %37, %38 : vector<2x128xf32>
    %40 = math.tanh %39 : vector<2x128xf32>
    %41 = arith.mulf %36, %40 : vector<2x128xf32>
    %c1 = arith.constant 1 : index
    %c0_16 = arith.constant 0 : index
    %c0_17 = arith.constant 0 : index
    %42 = vector.load %arg1[%c1, %c0_16, %c0_17] : memref<8x2x128xf32, #tpu.memory_space<vmem>>, vector<1x2x128xf32>
    %43 = vector.shape_cast %42 : vector<1x2x128xf32> to vector<2x128xf32>
    %44 = tpu.concatenate %43, %41 in 1 : vector<2x128xf32>, vector<2x128xf32> -> vector<2x256xf32>
    %c0_18 = arith.constant 0 : index
    %c0_19 = arith.constant 0 : index
    %45 = vector.load %arg2[%c0_18, %c0_19] : memref<256x512xf32, #tpu.memory_space<vmem>>, vector<256x512xf32>
    %cst_20 = arith.constant dense<0.000000e+00> : vector<2x512xf32>
    %46 = tpu.matmul %44, %45, %cst_20 {dimension_numbers = #tpu.dot_dimension_numbers<[1], [0], [0], [1], [0, 0, 1, 1], [], []>} : vector<2x256xf32>, vector<256x512xf32>, vector<2x512xf32> -> vector<2x512xf32>
    %47 = arith.addf %46, %2 : vector<2x512xf32>
    %48 = vector.extract_strided_slice %47 {offsets = [0, 0], sizes = [2, 128], strides = [1, 1]} : vector<2x512xf32> to vector<2x128xf32>
    %49 = arith.negf %48 : vector<2x128xf32>
    %50 = math.exp %49 : vector<2x128xf32>
    %cst_21 = arith.constant 1.000000e+00 : f32
    %51 = vector.broadcast %cst_21 : f32 to vector<2x128xf32>
    %52 = arith.addf %51, %50 : vector<2x128xf32>
    %53 = arith.divf %51, %52 : vector<2x128xf32>
    %54 = vector.extract_strided_slice %47 {offsets = [0, 128], sizes = [2, 128], strides = [1, 1]} : vector<2x512xf32> to vector<2x128xf32>
    %55 = arith.negf %54 : vector<2x128xf32>
    %56 = math.exp %55 : vector<2x128xf32>
    %cst_22 = arith.constant 1.000000e+00 : f32
    %57 = vector.broadcast %cst_22 : f32 to vector<2x128xf32>
    %58 = arith.addf %57, %56 : vector<2x128xf32>
    %59 = arith.divf %57, %58 : vector<2x128xf32>
    %60 = vector.extract_strided_slice %47 {offsets = [0, 256], sizes = [2, 128], strides = [1, 1]} : vector<2x512xf32> to vector<2x128xf32>
    %61 = math.tanh %60 : vector<2x128xf32>
    %62 = vector.extract_strided_slice %47 {offsets = [0, 384], sizes = [2, 128], strides = [1, 1]} : vector<2x512xf32> to vector<2x128xf32>
    %63 = arith.negf %62 : vector<2x128xf32>
    %64 = math.exp %63 : vector<2x128xf32>
    %cst_23 = arith.constant 1.000000e+00 : f32
    %65 = vector.broadcast %cst_23 : f32 to vector<2x128xf32>
    %66 = arith.addf %65, %64 : vector<2x128xf32>
    %67 = arith.divf %65, %66 : vector<2x128xf32>
    %68 = arith.mulf %59, %39 : vector<2x128xf32>
    %69 = arith.mulf %53, %61 : vector<2x128xf32>
    %70 = arith.addf %68, %69 : vector<2x128xf32>
    %71 = math.tanh %70 : vector<2x128xf32>
    %72 = arith.mulf %67, %71 : vector<2x128xf32>
    %c2 = arith.constant 2 : index
    %c0_24 = arith.constant 0 : index
    %c0_25 = arith.constant 0 : index
    %73 = vector.load %arg1[%c2, %c0_24, %c0_25] : memref<8x2x128xf32, #tpu.memory_space<vmem>>, vector<1x2x128xf32>
    %74 = vector.shape_cast %73 : vector<1x2x128xf32> to vector<2x128xf32>
    %75 = tpu.concatenate %74, %72 in 1 : vector<2x128xf32>, vector<2x128xf32> -> vector<2x256xf32>
    %c0_26 = arith.constant 0 : index
    %c0_27 = arith.constant 0 : index
    %76 = vector.load %arg2[%c0_26, %c0_27] : memref<256x512xf32, #tpu.memory_space<vmem>>, vector<256x512xf32>
    %cst_28 = arith.constant dense<0.000000e+00> : vector<2x512xf32>
    %77 = tpu.matmul %75, %76, %cst_28 {dimension_numbers = #tpu.dot_dimension_numbers<[1], [0], [0], [1], [0, 0, 1, 1], [], []>} : vector<2x256xf32>, vector<256x512xf32>, vector<2x512xf32> -> vector<2x512xf32>
    %78 = arith.addf %77, %2 : vector<2x512xf32>
    %79 = vector.extract_strided_slice %78 {offsets = [0, 0], sizes = [2, 128], strides = [1, 1]} : vector<2x512xf32> to vector<2x128xf32>
    %80 = arith.negf %79 : vector<2x128xf32>
    %81 = math.exp %80 : vector<2x128xf32>
    %cst_29 = arith.constant 1.000000e+00 : f32
    %82 = vector.broadcast %cst_29 : f32 to vector<2x128xf32>
    %83 = arith.addf %82, %81 : vector<2x128xf32>
    %84 = arith.divf %82, %83 : vector<2x128xf32>
    %85 = vector.extract_strided_slice %78 {offsets = [0, 128], sizes = [2, 128], strides = [1, 1]} : vector<2x512xf32> to vector<2x128xf32>
    %86 = arith.negf %85 : vector<2x128xf32>
    %87 = math.exp %86 : vector<2x128xf32>
    %cst_30 = arith.constant 1.000000e+00 : f32
    %88 = vector.broadcast %cst_30 : f32 to vector<2x128xf32>
    %89 = arith.addf %88, %87 : vector<2x128xf32>
    %90 = arith.divf %88, %89 : vector<2x128xf32>
    %91 = vector.extract_strided_slice %78 {offsets = [0, 256], sizes = [2, 128], strides = [1, 1]} : vector<2x512xf32> to vector<2x128xf32>
    %92 = math.tanh %91 : vector<2x128xf32>
    %93 = vector.extract_strided_slice %78 {offsets = [0, 384], sizes = [2, 128], strides = [1, 1]} : vector<2x512xf32> to vector<2x128xf32>
    %94 = arith.negf %93 : vector<2x128xf32>
    %95 = math.exp %94 : vector<2x128xf32>
    %cst_31 = arith.constant 1.000000e+00 : f32
    %96 = vector.broadcast %cst_31 : f32 to vector<2x128xf32>
    %97 = arith.addf %96, %95 : vector<2x128xf32>
    %98 = arith.divf %96, %97 : vector<2x128xf32>
    %99 = arith.mulf %90, %70 : vector<2x128xf32>
    %100 = arith.mulf %84, %92 : vector<2x128xf32>
    %101 = arith.addf %99, %100 : vector<2x128xf32>
    %102 = math.tanh %101 : vector<2x128xf32>
    %103 = arith.mulf %98, %102 : vector<2x128xf32>
    %c3 = arith.constant 3 : index
    %c0_32 = arith.constant 0 : index
    %c0_33 = arith.constant 0 : index
    %104 = vector.load %arg1[%c3, %c0_32, %c0_33] : memref<8x2x128xf32, #tpu.memory_space<vmem>>, vector<1x2x128xf32>
    %105 = vector.shape_cast %104 : vector<1x2x128xf32> to vector<2x128xf32>
    %106 = tpu.concatenate %105, %103 in 1 : vector<2x128xf32>, vector<2x128xf32> -> vector<2x256xf32>
    %c0_34 = arith.constant 0 : index
    %c0_35 = arith.constant 0 : index
    %107 = vector.load %arg2[%c0_34, %c0_35] : memref<256x512xf32, #tpu.memory_space<vmem>>, vector<256x512xf32>
    %cst_36 = arith.constant dense<0.000000e+00> : vector<2x512xf32>
    %108 = tpu.matmul %106, %107, %cst_36 {dimension_numbers = #tpu.dot_dimension_numbers<[1], [0], [0], [1], [0, 0, 1, 1], [], []>} : vector<2x256xf32>, vector<256x512xf32>, vector<2x512xf32> -> vector<2x512xf32>
    %109 = arith.addf %108, %2 : vector<2x512xf32>
    %110 = vector.extract_strided_slice %109 {offsets = [0, 0], sizes = [2, 128], strides = [1, 1]} : vector<2x512xf32> to vector<2x128xf32>
    %111 = arith.negf %110 : vector<2x128xf32>
    %112 = math.exp %111 : vector<2x128xf32>
    %cst_37 = arith.constant 1.000000e+00 : f32
    %113 = vector.broadcast %cst_37 : f32 to vector<2x128xf32>
    %114 = arith.addf %113, %112 : vector<2x128xf32>
    %115 = arith.divf %113, %114 : vector<2x128xf32>
    %116 = vector.extract_strided_slice %109 {offsets = [0, 128], sizes = [2, 128], strides = [1, 1]} : vector<2x512xf32> to vector<2x128xf32>
    %117 = arith.negf %116 : vector<2x128xf32>
    %118 = math.exp %117 : vector<2x128xf32>
    %cst_38 = arith.constant 1.000000e+00 : f32
    %119 = vector.broadcast %cst_38 : f32 to vector<2x128xf32>
    %120 = arith.addf %119, %118 : vector<2x128xf32>
    %121 = arith.divf %119, %120 : vector<2x128xf32>
    %122 = vector.extract_strided_slice %109 {offsets = [0, 256], sizes = [2, 128], strides = [1, 1]} : vector<2x512xf32> to vector<2x128xf32>
    %123 = math.tanh %122 : vector<2x128xf32>
    %124 = vector.extract_strided_slice %109 {offsets = [0, 384], sizes = [2, 128], strides = [1, 1]} : vector<2x512xf32> to vector<2x128xf32>
    %125 = arith.negf %124 : vector<2x128xf32>
    %126 = math.exp %125 : vector<2x128xf32>
    %cst_39 = arith.constant 1.000000e+00 : f32
    %127 = vector.broadcast %cst_39 : f32 to vector<2x128xf32>
    %128 = arith.addf %127, %126 : vector<2x128xf32>
    %129 = arith.divf %127, %128 : vector<2x128xf32>
    %130 = arith.mulf %121, %101 : vector<2x128xf32>
    %131 = arith.mulf %115, %123 : vector<2x128xf32>
    %132 = arith.addf %130, %131 : vector<2x128xf32>
    %133 = math.tanh %132 : vector<2x128xf32>
    %134 = arith.mulf %129, %133 : vector<2x128xf32>
    %c4 = arith.constant 4 : index
    %c0_40 = arith.constant 0 : index
    %c0_41 = arith.constant 0 : index
    %135 = vector.load %arg1[%c4, %c0_40, %c0_41] : memref<8x2x128xf32, #tpu.memory_space<vmem>>, vector<1x2x128xf32>
    %136 = vector.shape_cast %135 : vector<1x2x128xf32> to vector<2x128xf32>
    %137 = tpu.concatenate %136, %134 in 1 : vector<2x128xf32>, vector<2x128xf32> -> vector<2x256xf32>
    %c0_42 = arith.constant 0 : index
    %c0_43 = arith.constant 0 : index
    %138 = vector.load %arg2[%c0_42, %c0_43] : memref<256x512xf32, #tpu.memory_space<vmem>>, vector<256x512xf32>
    %cst_44 = arith.constant dense<0.000000e+00> : vector<2x512xf32>
    %139 = tpu.matmul %137, %138, %cst_44 {dimension_numbers = #tpu.dot_dimension_numbers<[1], [0], [0], [1], [0, 0, 1, 1], [], []>} : vector<2x256xf32>, vector<256x512xf32>, vector<2x512xf32> -> vector<2x512xf32>
    %140 = arith.addf %139, %2 : vector<2x512xf32>
    %141 = vector.extract_strided_slice %140 {offsets = [0, 0], sizes = [2, 128], strides = [1, 1]} : vector<2x512xf32> to vector<2x128xf32>
    %142 = arith.negf %141 : vector<2x128xf32>
    %143 = math.exp %142 : vector<2x128xf32>
    %cst_45 = arith.constant 1.000000e+00 : f32
    %144 = vector.broadcast %cst_45 : f32 to vector<2x128xf32>
    %145 = arith.addf %144, %143 : vector<2x128xf32>
    %146 = arith.divf %144, %145 : vector<2x128xf32>
    %147 = vector.extract_strided_slice %140 {offsets = [0, 128], sizes = [2, 128], strides = [1, 1]} : vector<2x512xf32> to vector<2x128xf32>
    %148 = arith.negf %147 : vector<2x128xf32>
    %149 = math.exp %148 : vector<2x128xf32>
    %cst_46 = arith.constant 1.000000e+00 : f32
    %150 = vector.broadcast %cst_46 : f32 to vector<2x128xf32>
    %151 = arith.addf %150, %149 : vector<2x128xf32>
    %152 = arith.divf %150, %151 : vector<2x128xf32>
    %153 = vector.extract_strided_slice %140 {offsets = [0, 256], sizes = [2, 128], strides = [1, 1]} : vector<2x512xf32> to vector<2x128xf32>
    %154 = math.tanh %153 : vector<2x128xf32>
    %155 = vector.extract_strided_slice %140 {offsets = [0, 384], sizes = [2, 128], strides = [1, 1]} : vector<2x512xf32> to vector<2x128xf32>
    %156 = arith.negf %155 : vector<2x128xf32>
    %157 = math.exp %156 : vector<2x128xf32>
    %cst_47 = arith.constant 1.000000e+00 : f32
    %158 = vector.broadcast %cst_47 : f32 to vector<2x128xf32>
    %159 = arith.addf %158, %157 : vector<2x128xf32>
    %160 = arith.divf %158, %159 : vector<2x128xf32>
    %161 = arith.mulf %152, %132 : vector<2x128xf32>
    %162 = arith.mulf %146, %154 : vector<2x128xf32>
    %163 = arith.addf %161, %162 : vector<2x128xf32>
    %164 = math.tanh %163 : vector<2x128xf32>
    %165 = arith.mulf %160, %164 : vector<2x128xf32>
    %c5 = arith.constant 5 : index
    %c0_48 = arith.constant 0 : index
    %c0_49 = arith.constant 0 : index
    %166 = vector.load %arg1[%c5, %c0_48, %c0_49] : memref<8x2x128xf32, #tpu.memory_space<vmem>>, vector<1x2x128xf32>
    %167 = vector.shape_cast %166 : vector<1x2x128xf32> to vector<2x128xf32>
    %168 = tpu.concatenate %167, %165 in 1 : vector<2x128xf32>, vector<2x128xf32> -> vector<2x256xf32>
    %c0_50 = arith.constant 0 : index
    %c0_51 = arith.constant 0 : index
    %169 = vector.load %arg2[%c0_50, %c0_51] : memref<256x512xf32, #tpu.memory_space<vmem>>, vector<256x512xf32>
    %cst_52 = arith.constant dense<0.000000e+00> : vector<2x512xf32>
    %170 = tpu.matmul %168, %169, %cst_52 {dimension_numbers = #tpu.dot_dimension_numbers<[1], [0], [0], [1], [0, 0, 1, 1], [], []>} : vector<2x256xf32>, vector<256x512xf32>, vector<2x512xf32> -> vector<2x512xf32>
    %171 = arith.addf %170, %2 : vector<2x512xf32>
    %172 = vector.extract_strided_slice %171 {offsets = [0, 0], sizes = [2, 128], strides = [1, 1]} : vector<2x512xf32> to vector<2x128xf32>
    %173 = arith.negf %172 : vector<2x128xf32>
    %174 = math.exp %173 : vector<2x128xf32>
    %cst_53 = arith.constant 1.000000e+00 : f32
    %175 = vector.broadcast %cst_53 : f32 to vector<2x128xf32>
    %176 = arith.addf %175, %174 : vector<2x128xf32>
    %177 = arith.divf %175, %176 : vector<2x128xf32>
    %178 = vector.extract_strided_slice %171 {offsets = [0, 128], sizes = [2, 128], strides = [1, 1]} : vector<2x512xf32> to vector<2x128xf32>
    %179 = arith.negf %178 : vector<2x128xf32>
    %180 = math.exp %179 : vector<2x128xf32>
    %cst_54 = arith.constant 1.000000e+00 : f32
    %181 = vector.broadcast %cst_54 : f32 to vector<2x128xf32>
    %182 = arith.addf %181, %180 : vector<2x128xf32>
    %183 = arith.divf %181, %182 : vector<2x128xf32>
    %184 = vector.extract_strided_slice %171 {offsets = [0, 256], sizes = [2, 128], strides = [1, 1]} : vector<2x512xf32> to vector<2x128xf32>
    %185 = math.tanh %184 : vector<2x128xf32>
    %186 = vector.extract_strided_slice %171 {offsets = [0, 384], sizes = [2, 128], strides = [1, 1]} : vector<2x512xf32> to vector<2x128xf32>
    %187 = arith.negf %186 : vector<2x128xf32>
    %188 = math.exp %187 : vector<2x128xf32>
    %cst_55 = arith.constant 1.000000e+00 : f32
    %189 = vector.broadcast %cst_55 : f32 to vector<2x128xf32>
    %190 = arith.addf %189, %188 : vector<2x128xf32>
    %191 = arith.divf %189, %190 : vector<2x128xf32>
    %192 = arith.mulf %183, %163 : vector<2x128xf32>
    %193 = arith.mulf %177, %185 : vector<2x128xf32>
    %194 = arith.addf %192, %193 : vector<2x128xf32>
    %195 = math.tanh %194 : vector<2x128xf32>
    %196 = arith.mulf %191, %195 : vector<2x128xf32>
    %c6 = arith.constant 6 : index
    %c0_56 = arith.constant 0 : index
    %c0_57 = arith.constant 0 : index
    %197 = vector.load %arg1[%c6, %c0_56, %c0_57] : memref<8x2x128xf32, #tpu.memory_space<vmem>>, vector<1x2x128xf32>
    %198 = vector.shape_cast %197 : vector<1x2x128xf32> to vector<2x128xf32>
    %199 = tpu.concatenate %198, %196 in 1 : vector<2x128xf32>, vector<2x128xf32> -> vector<2x256xf32>
    %c0_58 = arith.constant 0 : index
    %c0_59 = arith.constant 0 : index
    %200 = vector.load %arg2[%c0_58, %c0_59] : memref<256x512xf32, #tpu.memory_space<vmem>>, vector<256x512xf32>
    %cst_60 = arith.constant dense<0.000000e+00> : vector<2x512xf32>
    %201 = tpu.matmul %199, %200, %cst_60 {dimension_numbers = #tpu.dot_dimension_numbers<[1], [0], [0], [1], [0, 0, 1, 1], [], []>} : vector<2x256xf32>, vector<256x512xf32>, vector<2x512xf32> -> vector<2x512xf32>
    %202 = arith.addf %201, %2 : vector<2x512xf32>
    %203 = vector.extract_strided_slice %202 {offsets = [0, 0], sizes = [2, 128], strides = [1, 1]} : vector<2x512xf32> to vector<2x128xf32>
    %204 = arith.negf %203 : vector<2x128xf32>
    %205 = math.exp %204 : vector<2x128xf32>
    %cst_61 = arith.constant 1.000000e+00 : f32
    %206 = vector.broadcast %cst_61 : f32 to vector<2x128xf32>
    %207 = arith.addf %206, %205 : vector<2x128xf32>
    %208 = arith.divf %206, %207 : vector<2x128xf32>
    %209 = vector.extract_strided_slice %202 {offsets = [0, 128], sizes = [2, 128], strides = [1, 1]} : vector<2x512xf32> to vector<2x128xf32>
    %210 = arith.negf %209 : vector<2x128xf32>
    %211 = math.exp %210 : vector<2x128xf32>
    %cst_62 = arith.constant 1.000000e+00 : f32
    %212 = vector.broadcast %cst_62 : f32 to vector<2x128xf32>
    %213 = arith.addf %212, %211 : vector<2x128xf32>
    %214 = arith.divf %212, %213 : vector<2x128xf32>
    %215 = vector.extract_strided_slice %202 {offsets = [0, 256], sizes = [2, 128], strides = [1, 1]} : vector<2x512xf32> to vector<2x128xf32>
    %216 = math.tanh %215 : vector<2x128xf32>
    %217 = vector.extract_strided_slice %202 {offsets = [0, 384], sizes = [2, 128], strides = [1, 1]} : vector<2x512xf32> to vector<2x128xf32>
    %218 = arith.negf %217 : vector<2x128xf32>
    %219 = math.exp %218 : vector<2x128xf32>
    %cst_63 = arith.constant 1.000000e+00 : f32
    %220 = vector.broadcast %cst_63 : f32 to vector<2x128xf32>
    %221 = arith.addf %220, %219 : vector<2x128xf32>
    %222 = arith.divf %220, %221 : vector<2x128xf32>
    %223 = arith.mulf %214, %194 : vector<2x128xf32>
    %224 = arith.mulf %208, %216 : vector<2x128xf32>
    %225 = arith.addf %223, %224 : vector<2x128xf32>
    %226 = math.tanh %225 : vector<2x128xf32>
    %227 = arith.mulf %222, %226 : vector<2x128xf32>
    %c7 = arith.constant 7 : index
    %c0_64 = arith.constant 0 : index
    %c0_65 = arith.constant 0 : index
    %228 = vector.load %arg1[%c7, %c0_64, %c0_65] : memref<8x2x128xf32, #tpu.memory_space<vmem>>, vector<1x2x128xf32>
    %229 = vector.shape_cast %228 : vector<1x2x128xf32> to vector<2x128xf32>
    %230 = tpu.concatenate %229, %227 in 1 : vector<2x128xf32>, vector<2x128xf32> -> vector<2x256xf32>
    %c0_66 = arith.constant 0 : index
    %c0_67 = arith.constant 0 : index
    %231 = vector.load %arg2[%c0_66, %c0_67] : memref<256x512xf32, #tpu.memory_space<vmem>>, vector<256x512xf32>
    %cst_68 = arith.constant dense<0.000000e+00> : vector<2x512xf32>
    %232 = tpu.matmul %230, %231, %cst_68 {dimension_numbers = #tpu.dot_dimension_numbers<[1], [0], [0], [1], [0, 0, 1, 1], [], []>} : vector<2x256xf32>, vector<256x512xf32>, vector<2x512xf32> -> vector<2x512xf32>
    %233 = arith.addf %232, %2 : vector<2x512xf32>
    %234 = vector.extract_strided_slice %233 {offsets = [0, 0], sizes = [2, 128], strides = [1, 1]} : vector<2x512xf32> to vector<2x128xf32>
    %235 = arith.negf %234 : vector<2x128xf32>
    %236 = math.exp %235 : vector<2x128xf32>
    %cst_69 = arith.constant 1.000000e+00 : f32
    %237 = vector.broadcast %cst_69 : f32 to vector<2x128xf32>
    %238 = arith.addf %237, %236 : vector<2x128xf32>
    %239 = arith.divf %237, %238 : vector<2x128xf32>
    %240 = vector.extract_strided_slice %233 {offsets = [0, 128], sizes = [2, 128], strides = [1, 1]} : vector<2x512xf32> to vector<2x128xf32>
    %241 = arith.negf %240 : vector<2x128xf32>
    %242 = math.exp %241 : vector<2x128xf32>
    %cst_70 = arith.constant 1.000000e+00 : f32
    %243 = vector.broadcast %cst_70 : f32 to vector<2x128xf32>
    %244 = arith.addf %243, %242 : vector<2x128xf32>
    %245 = arith.divf %243, %244 : vector<2x128xf32>
    %246 = vector.extract_strided_slice %233 {offsets = [0, 256], sizes = [2, 128], strides = [1, 1]} : vector<2x512xf32> to vector<2x128xf32>
    %247 = math.tanh %246 : vector<2x128xf32>
    %248 = vector.extract_strided_slice %233 {offsets = [0, 384], sizes = [2, 128], strides = [1, 1]} : vector<2x512xf32> to vector<2x128xf32>
    %249 = arith.negf %248 : vector<2x128xf32>
    %250 = math.exp %249 : vector<2x128xf32>
    %cst_71 = arith.constant 1.000000e+00 : f32
    %251 = vector.broadcast %cst_71 : f32 to vector<2x128xf32>
    %252 = arith.addf %251, %250 : vector<2x128xf32>
    %253 = arith.divf %251, %252 : vector<2x128xf32>
    %254 = arith.mulf %245, %225 : vector<2x128xf32>
    %255 = arith.mulf %239, %247 : vector<2x128xf32>
    %256 = arith.addf %254, %255 : vector<2x128xf32>
    %257 = math.tanh %256 : vector<2x128xf32>
    %258 = arith.mulf %253, %257 : vector<2x128xf32>
    %259 = tpu.concatenate %41, %10 in 1 : vector<2x128xf32>, vector<2x128xf32> -> vector<2x256xf32>
    %c0_72 = arith.constant 0 : index
    %c0_73 = arith.constant 0 : index
    %260 = vector.load %arg4[%c0_72, %c0_73] : memref<256x512xf32, #tpu.memory_space<vmem>>, vector<256x512xf32>
    %cst_74 = arith.constant dense<0.000000e+00> : vector<2x512xf32>
    %261 = tpu.matmul %259, %260, %cst_74 {dimension_numbers = #tpu.dot_dimension_numbers<[1], [0], [0], [1], [0, 0, 1, 1], [], []>} : vector<2x256xf32>, vector<256x512xf32>, vector<2x512xf32> -> vector<2x512xf32>
    %262 = arith.addf %261, %5 : vector<2x512xf32>
    %263 = vector.extract_strided_slice %262 {offsets = [0, 0], sizes = [2, 128], strides = [1, 1]} : vector<2x512xf32> to vector<2x128xf32>
    %264 = arith.negf %263 : vector<2x128xf32>
    %265 = math.exp %264 : vector<2x128xf32>
    %cst_75 = arith.constant 1.000000e+00 : f32
    %266 = vector.broadcast %cst_75 : f32 to vector<2x128xf32>
    %267 = arith.addf %266, %265 : vector<2x128xf32>
    %268 = arith.divf %266, %267 : vector<2x128xf32>
    %269 = vector.extract_strided_slice %262 {offsets = [0, 128], sizes = [2, 128], strides = [1, 1]} : vector<2x512xf32> to vector<2x128xf32>
    %270 = arith.negf %269 : vector<2x128xf32>
    %271 = math.exp %270 : vector<2x128xf32>
    %cst_76 = arith.constant 1.000000e+00 : f32
    %272 = vector.broadcast %cst_76 : f32 to vector<2x128xf32>
    %273 = arith.addf %272, %271 : vector<2x128xf32>
    %274 = arith.divf %272, %273 : vector<2x128xf32>
    %275 = vector.extract_strided_slice %262 {offsets = [0, 256], sizes = [2, 128], strides = [1, 1]} : vector<2x512xf32> to vector<2x128xf32>
    %276 = math.tanh %275 : vector<2x128xf32>
    %277 = vector.extract_strided_slice %262 {offsets = [0, 384], sizes = [2, 128], strides = [1, 1]} : vector<2x512xf32> to vector<2x128xf32>
    %278 = arith.negf %277 : vector<2x128xf32>
    %279 = math.exp %278 : vector<2x128xf32>
    %cst_77 = arith.constant 1.000000e+00 : f32
    %280 = vector.broadcast %cst_77 : f32 to vector<2x128xf32>
    %281 = arith.addf %280, %279 : vector<2x128xf32>
    %282 = arith.divf %280, %281 : vector<2x128xf32>
    %283 = arith.mulf %274, %10 : vector<2x128xf32>
    %284 = arith.mulf %268, %276 : vector<2x128xf32>
    %285 = arith.addf %283, %284 : vector<2x128xf32>
    %286 = math.tanh %285 : vector<2x128xf32>
    %287 = arith.mulf %282, %286 : vector<2x128xf32>
    %c0_78 = arith.constant 0 : index
    %c0_79 = arith.constant 0 : index
    %c0_80 = arith.constant 0 : index
    %288 = vector.load %arg11[%c0_78, %c0_79, %c0_80] : memref<2x8x128xf32, #tpu.memory_space<vmem>>, vector<2x1x128xf32>
    %289 = vector.shape_cast %288 : vector<2x1x128xf32> to vector<2x128xf32>
    %290 = vector.shape_cast %287 : vector<2x128xf32> to vector<2x1x128xf32>
    tpu.vector_store %arg11[%c0_78, %c0_79, %c0_80], %290 {strides = array<i32>} : memref<2x8x128xf32, #tpu.memory_space<vmem>>, vector<2x1x128xf32>,
    %291 = tpu.concatenate %72, %287 in 1 : vector<2x128xf32>, vector<2x128xf32> -> vector<2x256xf32>
    %c0_81 = arith.constant 0 : index
    %c0_82 = arith.constant 0 : index
    %292 = vector.load %arg4[%c0_81, %c0_82] : memref<256x512xf32, #tpu.memory_space<vmem>>, vector<256x512xf32>
    %cst_83 = arith.constant dense<0.000000e+00> : vector<2x512xf32>
    %293 = tpu.matmul %291, %292, %cst_83 {dimension_numbers = #tpu.dot_dimension_numbers<[1], [0], [0], [1], [0, 0, 1, 1], [], []>} : vector<2x256xf32>, vector<256x512xf32>, vector<2x512xf32> -> vector<2x512xf32>
    %294 = arith.addf %293, %5 : vector<2x512xf32>
    %295 = vector.extract_strided_slice %294 {offsets = [0, 0], sizes = [2, 128], strides = [1, 1]} : vector<2x512xf32> to vector<2x128xf32>
    %296 = arith.negf %295 : vector<2x128xf32>
    %297 = math.exp %296 : vector<2x128xf32>
    %cst_84 = arith.constant 1.000000e+00 : f32
    %298 = vector.broadcast %cst_84 : f32 to vector<2x128xf32>
    %299 = arith.addf %298, %297 : vector<2x128xf32>
    %300 = arith.divf %298, %299 : vector<2x128xf32>
    %301 = vector.extract_strided_slice %294 {offsets = [0, 128], sizes = [2, 128], strides = [1, 1]} : vector<2x512xf32> to vector<2x128xf32>
    %302 = arith.negf %301 : vector<2x128xf32>
    %303 = math.exp %302 : vector<2x128xf32>
    %cst_85 = arith.constant 1.000000e+00 : f32
    %304 = vector.broadcast %cst_85 : f32 to vector<2x128xf32>
    %305 = arith.addf %304, %303 : vector<2x128xf32>
    %306 = arith.divf %304, %305 : vector<2x128xf32>
    %307 = vector.extract_strided_slice %294 {offsets = [0, 256], sizes = [2, 128], strides = [1, 1]} : vector<2x512xf32> to vector<2x128xf32>
    %308 = math.tanh %307 : vector<2x128xf32>
    %309 = vector.extract_strided_slice %294 {offsets = [0, 384], sizes = [2, 128], strides = [1, 1]} : vector<2x512xf32> to vector<2x128xf32>
    %310 = arith.negf %309 : vector<2x128xf32>
    %311 = math.exp %310 : vector<2x128xf32>
    %cst_86 = arith.constant 1.000000e+00 : f32
    %312 = vector.broadcast %cst_86 : f32 to vector<2x128xf32>
    %313 = arith.addf %312, %311 : vector<2x128xf32>
    %314 = arith.divf %312, %313 : vector<2x128xf32>
    %315 = arith.mulf %306, %285 : vector<2x128xf32>
    %316 = arith.mulf %300, %308 : vector<2x128xf32>
    %317 = arith.addf %315, %316 : vector<2x128xf32>
    %318 = math.tanh %317 : vector<2x128xf32>
    %319 = arith.mulf %314, %318 : vector<2x128xf32>
    %c0_87 = arith.constant 0 : index
    %c1_88 = arith.constant 1 : index
    %c0_89 = arith.constant 0 : index
    %320 = vector.load %arg11[%c0_87, %c1_88, %c0_89] : memref<2x8x128xf32, #tpu.memory_space<vmem>>, vector<2x1x128xf32>
    %321 = vector.shape_cast %320 : vector<2x1x128xf32> to vector<2x128xf32>
    %322 = vector.shape_cast %319 : vector<2x128xf32> to vector<2x1x128xf32>
    tpu.vector_store %arg11[%c0_87, %c1_88, %c0_89], %322 {strides = array<i32>} : memref<2x8x128xf32, #tpu.memory_space<vmem>>, vector<2x1x128xf32>,
    %323 = tpu.concatenate %103, %319 in 1 : vector<2x128xf32>, vector<2x128xf32> -> vector<2x256xf32>
    %c0_90 = arith.constant 0 : index
    %c0_91 = arith.constant 0 : index
    %324 = vector.load %arg4[%c0_90, %c0_91] : memref<256x512xf32, #tpu.memory_space<vmem>>, vector<256x512xf32>
    %cst_92 = arith.constant dense<0.000000e+00> : vector<2x512xf32>
    %325 = tpu.matmul %323, %324, %cst_92 {dimension_numbers = #tpu.dot_dimension_numbers<[1], [0], [0], [1], [0, 0, 1, 1], [], []>} : vector<2x256xf32>, vector<256x512xf32>, vector<2x512xf32> -> vector<2x512xf32>
    %326 = arith.addf %325, %5 : vector<2x512xf32>
    %327 = vector.extract_strided_slice %326 {offsets = [0, 0], sizes = [2, 128], strides = [1, 1]} : vector<2x512xf32> to vector<2x128xf32>
    %328 = arith.negf %327 : vector<2x128xf32>
    %329 = math.exp %328 : vector<2x128xf32>
    %cst_93 = arith.constant 1.000000e+00 : f32
    %330 = vector.broadcast %cst_93 : f32 to vector<2x128xf32>
    %331 = arith.addf %330, %329 : vector<2x128xf32>
    %332 = arith.divf %330, %331 : vector<2x128xf32>
    %333 = vector.extract_strided_slice %326 {offsets = [0, 128], sizes = [2, 128], strides = [1, 1]} : vector<2x512xf32> to vector<2x128xf32>
    %334 = arith.negf %333 : vector<2x128xf32>
    %335 = math.exp %334 : vector<2x128xf32>
    %cst_94 = arith.constant 1.000000e+00 : f32
    %336 = vector.broadcast %cst_94 : f32 to vector<2x128xf32>
    %337 = arith.addf %336, %335 : vector<2x128xf32>
    %338 = arith.divf %336, %337 : vector<2x128xf32>
    %339 = vector.extract_strided_slice %326 {offsets = [0, 256], sizes = [2, 128], strides = [1, 1]} : vector<2x512xf32> to vector<2x128xf32>
    %340 = math.tanh %339 : vector<2x128xf32>
    %341 = vector.extract_strided_slice %326 {offsets = [0, 384], sizes = [2, 128], strides = [1, 1]} : vector<2x512xf32> to vector<2x128xf32>
    %342 = arith.negf %341 : vector<2x128xf32>
    %343 = math.exp %342 : vector<2x128xf32>
    %cst_95 = arith.constant 1.000000e+00 : f32
    %344 = vector.broadcast %cst_95 : f32 to vector<2x128xf32>
    %345 = arith.addf %344, %343 : vector<2x128xf32>
    %346 = arith.divf %344, %345 : vector<2x128xf32>
    %347 = arith.mulf %338, %317 : vector<2x128xf32>
    %348 = arith.mulf %332, %340 : vector<2x128xf32>
    %349 = arith.addf %347, %348 : vector<2x128xf32>
    %350 = math.tanh %349 : vector<2x128xf32>
    %351 = arith.mulf %346, %350 : vector<2x128xf32>
    %c0_96 = arith.constant 0 : index
    %c2_97 = arith.constant 2 : index
    %c0_98 = arith.constant 0 : index
    %352 = vector.load %arg11[%c0_96, %c2_97, %c0_98] : memref<2x8x128xf32, #tpu.memory_space<vmem>>, vector<2x1x128xf32>
    %353 = vector.shape_cast %352 : vector<2x1x128xf32> to vector<2x128xf32>
    %354 = vector.shape_cast %351 : vector<2x128xf32> to vector<2x1x128xf32>
    tpu.vector_store %arg11[%c0_96, %c2_97, %c0_98], %354 {strides = array<i32>} : memref<2x8x128xf32, #tpu.memory_space<vmem>>, vector<2x1x128xf32>,
    %355 = tpu.concatenate %134, %351 in 1 : vector<2x128xf32>, vector<2x128xf32> -> vector<2x256xf32>
    %c0_99 = arith.constant 0 : index
    %c0_100 = arith.constant 0 : index
    %356 = vector.load %arg4[%c0_99, %c0_100] : memref<256x512xf32, #tpu.memory_space<vmem>>, vector<256x512xf32>
    %cst_101 = arith.constant dense<0.000000e+00> : vector<2x512xf32>
    %357 = tpu.matmul %355, %356, %cst_101 {dimension_numbers = #tpu.dot_dimension_numbers<[1], [0], [0], [1], [0, 0, 1, 1], [], []>} : vector<2x256xf32>, vector<256x512xf32>, vector<2x512xf32> -> vector<2x512xf32>
    %358 = arith.addf %357, %5 : vector<2x512xf32>
    %359 = vector.extract_strided_slice %358 {offsets = [0, 0], sizes = [2, 128], strides = [1, 1]} : vector<2x512xf32> to vector<2x128xf32>
    %360 = arith.negf %359 : vector<2x128xf32>
    %361 = math.exp %360 : vector<2x128xf32>
    %cst_102 = arith.constant 1.000000e+00 : f32
    %362 = vector.broadcast %cst_102 : f32 to vector<2x128xf32>
    %363 = arith.addf %362, %361 : vector<2x128xf32>
    %364 = arith.divf %362, %363 : vector<2x128xf32>
    %365 = vector.extract_strided_slice %358 {offsets = [0, 128], sizes = [2, 128], strides = [1, 1]} : vector<2x512xf32> to vector<2x128xf32>
    %366 = arith.negf %365 : vector<2x128xf32>
    %367 = math.exp %366 : vector<2x128xf32>
    %cst_103 = arith.constant 1.000000e+00 : f32
    %368 = vector.broadcast %cst_103 : f32 to vector<2x128xf32>
    %369 = arith.addf %368, %367 : vector<2x128xf32>
    %370 = arith.divf %368, %369 : vector<2x128xf32>
    %371 = vector.extract_strided_slice %358 {offsets = [0, 256], sizes = [2, 128], strides = [1, 1]} : vector<2x512xf32> to vector<2x128xf32>
    %372 = math.tanh %371 : vector<2x128xf32>
    %373 = vector.extract_strided_slice %358 {offsets = [0, 384], sizes = [2, 128], strides = [1, 1]} : vector<2x512xf32> to vector<2x128xf32>
    %374 = arith.negf %373 : vector<2x128xf32>
    %375 = math.exp %374 : vector<2x128xf32>
    %cst_104 = arith.constant 1.000000e+00 : f32
    %376 = vector.broadcast %cst_104 : f32 to vector<2x128xf32>
    %377 = arith.addf %376, %375 : vector<2x128xf32>
    %378 = arith.divf %376, %377 : vector<2x128xf32>
    %379 = arith.mulf %370, %349 : vector<2x128xf32>
    %380 = arith.mulf %364, %372 : vector<2x128xf32>
    %381 = arith.addf %379, %380 : vector<2x128xf32>
    %382 = math.tanh %381 : vector<2x128xf32>
    %383 = arith.mulf %378, %382 : vector<2x128xf32>
    %c0_105 = arith.constant 0 : index
    %c3_106 = arith.constant 3 : index
    %c0_107 = arith.constant 0 : index
    %384 = vector.load %arg11[%c0_105, %c3_106, %c0_107] : memref<2x8x128xf32, #tpu.memory_space<vmem>>, vector<2x1x128xf32>
    %385 = vector.shape_cast %384 : vector<2x1x128xf32> to vector<2x128xf32>
    %386 = vector.shape_cast %383 : vector<2x128xf32> to vector<2x1x128xf32>
    tpu.vector_store %arg11[%c0_105, %c3_106, %c0_107], %386 {strides = array<i32>} : memref<2x8x128xf32, #tpu.memory_space<vmem>>, vector<2x1x128xf32>,
    %387 = tpu.concatenate %165, %383 in 1 : vector<2x128xf32>, vector<2x128xf32> -> vector<2x256xf32>
    %c0_108 = arith.constant 0 : index
    %c0_109 = arith.constant 0 : index
    %388 = vector.load %arg4[%c0_108, %c0_109] : memref<256x512xf32, #tpu.memory_space<vmem>>, vector<256x512xf32>
    %cst_110 = arith.constant dense<0.000000e+00> : vector<2x512xf32>
    %389 = tpu.matmul %387, %388, %cst_110 {dimension_numbers = #tpu.dot_dimension_numbers<[1], [0], [0], [1], [0, 0, 1, 1], [], []>} : vector<2x256xf32>, vector<256x512xf32>, vector<2x512xf32> -> vector<2x512xf32>
    %390 = arith.addf %389, %5 : vector<2x512xf32>
    %391 = vector.extract_strided_slice %390 {offsets = [0, 0], sizes = [2, 128], strides = [1, 1]} : vector<2x512xf32> to vector<2x128xf32>
    %392 = arith.negf %391 : vector<2x128xf32>
    %393 = math.exp %392 : vector<2x128xf32>
    %cst_111 = arith.constant 1.000000e+00 : f32
    %394 = vector.broadcast %cst_111 : f32 to vector<2x128xf32>
    %395 = arith.addf %394, %393 : vector<2x128xf32>
    %396 = arith.divf %394, %395 : vector<2x128xf32>
    %397 = vector.extract_strided_slice %390 {offsets = [0, 128], sizes = [2, 128], strides = [1, 1]} : vector<2x512xf32> to vector<2x128xf32>
    %398 = arith.negf %397 : vector<2x128xf32>
    %399 = math.exp %398 : vector<2x128xf32>
    %cst_112 = arith.constant 1.000000e+00 : f32
    %400 = vector.broadcast %cst_112 : f32 to vector<2x128xf32>
    %401 = arith.addf %400, %399 : vector<2x128xf32>
    %402 = arith.divf %400, %401 : vector<2x128xf32>
    %403 = vector.extract_strided_slice %390 {offsets = [0, 256], sizes = [2, 128], strides = [1, 1]} : vector<2x512xf32> to vector<2x128xf32>
    %404 = math.tanh %403 : vector<2x128xf32>
    %405 = vector.extract_strided_slice %390 {offsets = [0, 384], sizes = [2, 128], strides = [1, 1]} : vector<2x512xf32> to vector<2x128xf32>
    %406 = arith.negf %405 : vector<2x128xf32>
    %407 = math.exp %406 : vector<2x128xf32>
    %cst_113 = arith.constant 1.000000e+00 : f32
    %408 = vector.broadcast %cst_113 : f32 to vector<2x128xf32>
    %409 = arith.addf %408, %407 : vector<2x128xf32>
    %410 = arith.divf %408, %409 : vector<2x128xf32>
    %411 = arith.mulf %402, %381 : vector<2x128xf32>
    %412 = arith.mulf %396, %404 : vector<2x128xf32>
    %413 = arith.addf %411, %412 : vector<2x128xf32>
    %414 = math.tanh %413 : vector<2x128xf32>
    %415 = arith.mulf %410, %414 : vector<2x128xf32>
    %c0_114 = arith.constant 0 : index
    %c4_115 = arith.constant 4 : index
    %c0_116 = arith.constant 0 : index
    %416 = vector.load %arg11[%c0_114, %c4_115, %c0_116] : memref<2x8x128xf32, #tpu.memory_space<vmem>>, vector<2x1x128xf32>
    %417 = vector.shape_cast %416 : vector<2x1x128xf32> to vector<2x128xf32>
    %418 = vector.shape_cast %415 : vector<2x128xf32> to vector<2x1x128xf32>
    tpu.vector_store %arg11[%c0_114, %c4_115, %c0_116], %418 {strides = array<i32>} : memref<2x8x128xf32, #tpu.memory_space<vmem>>, vector<2x1x128xf32>,
    %419 = tpu.concatenate %196, %415 in 1 : vector<2x128xf32>, vector<2x128xf32> -> vector<2x256xf32>
    %c0_117 = arith.constant 0 : index
    %c0_118 = arith.constant 0 : index
    %420 = vector.load %arg4[%c0_117, %c0_118] : memref<256x512xf32, #tpu.memory_space<vmem>>, vector<256x512xf32>
    %cst_119 = arith.constant dense<0.000000e+00> : vector<2x512xf32>
    %421 = tpu.matmul %419, %420, %cst_119 {dimension_numbers = #tpu.dot_dimension_numbers<[1], [0], [0], [1], [0, 0, 1, 1], [], []>} : vector<2x256xf32>, vector<256x512xf32>, vector<2x512xf32> -> vector<2x512xf32>
    %422 = arith.addf %421, %5 : vector<2x512xf32>
    %423 = vector.extract_strided_slice %422 {offsets = [0, 0], sizes = [2, 128], strides = [1, 1]} : vector<2x512xf32> to vector<2x128xf32>
    %424 = arith.negf %423 : vector<2x128xf32>
    %425 = math.exp %424 : vector<2x128xf32>
    %cst_120 = arith.constant 1.000000e+00 : f32
    %426 = vector.broadcast %cst_120 : f32 to vector<2x128xf32>
    %427 = arith.addf %426, %425 : vector<2x128xf32>
    %428 = arith.divf %426, %427 : vector<2x128xf32>
    %429 = vector.extract_strided_slice %422 {offsets = [0, 128], sizes = [2, 128], strides = [1, 1]} : vector<2x512xf32> to vector<2x128xf32>
    %430 = arith.negf %429 : vector<2x128xf32>
    %431 = math.exp %430 : vector<2x128xf32>
    %cst_121 = arith.constant 1.000000e+00 : f32
    %432 = vector.broadcast %cst_121 : f32 to vector<2x128xf32>
    %433 = arith.addf %432, %431 : vector<2x128xf32>
    %434 = arith.divf %432, %433 : vector<2x128xf32>
    %435 = vector.extract_strided_slice %422 {offsets = [0, 256], sizes = [2, 128], strides = [1, 1]} : vector<2x512xf32> to vector<2x128xf32>
    %436 = math.tanh %435 : vector<2x128xf32>
    %437 = vector.extract_strided_slice %422 {offsets = [0, 384], sizes = [2, 128], strides = [1, 1]} : vector<2x512xf32> to vector<2x128xf32>
    %438 = arith.negf %437 : vector<2x128xf32>
    %439 = math.exp %438 : vector<2x128xf32>
    %cst_122 = arith.constant 1.000000e+00 : f32
    %440 = vector.broadcast %cst_122 : f32 to vector<2x128xf32>
    %441 = arith.addf %440, %439 : vector<2x128xf32>
    %442 = arith.divf %440, %441 : vector<2x128xf32>
    %443 = arith.mulf %434, %413 : vector<2x128xf32>
    %444 = arith.mulf %428, %436 : vector<2x128xf32>
    %445 = arith.addf %443, %444 : vector<2x128xf32>
    %446 = math.tanh %445 : vector<2x128xf32>
    %447 = arith.mulf %442, %446 : vector<2x128xf32>
    %c0_123 = arith.constant 0 : index
    %c5_124 = arith.constant 5 : index
    %c0_125 = arith.constant 0 : index
    %448 = vector.load %arg11[%c0_123, %c5_124, %c0_125] : memref<2x8x128xf32, #tpu.memory_space<vmem>>, vector<2x1x128xf32>
    %449 = vector.shape_cast %448 : vector<2x1x128xf32> to vector<2x128xf32>
    %450 = vector.shape_cast %447 : vector<2x128xf32> to vector<2x1x128xf32>
    tpu.vector_store %arg11[%c0_123, %c5_124, %c0_125], %450 {strides = array<i32>} : memref<2x8x128xf32, #tpu.memory_space<vmem>>, vector<2x1x128xf32>,
    %451 = tpu.concatenate %227, %447 in 1 : vector<2x128xf32>, vector<2x128xf32> -> vector<2x256xf32>
    %c0_126 = arith.constant 0 : index
    %c0_127 = arith.constant 0 : index
    %452 = vector.load %arg4[%c0_126, %c0_127] : memref<256x512xf32, #tpu.memory_space<vmem>>, vector<256x512xf32>
    %cst_128 = arith.constant dense<0.000000e+00> : vector<2x512xf32>
    %453 = tpu.matmul %451, %452, %cst_128 {dimension_numbers = #tpu.dot_dimension_numbers<[1], [0], [0], [1], [0, 0, 1, 1], [], []>} : vector<2x256xf32>, vector<256x512xf32>, vector<2x512xf32> -> vector<2x512xf32>
    %454 = arith.addf %453, %5 : vector<2x512xf32>
    %455 = vector.extract_strided_slice %454 {offsets = [0, 0], sizes = [2, 128], strides = [1, 1]} : vector<2x512xf32> to vector<2x128xf32>
    %456 = arith.negf %455 : vector<2x128xf32>
    %457 = math.exp %456 : vector<2x128xf32>
    %cst_129 = arith.constant 1.000000e+00 : f32
    %458 = vector.broadcast %cst_129 : f32 to vector<2x128xf32>
    %459 = arith.addf %458, %457 : vector<2x128xf32>
    %460 = arith.divf %458, %459 : vector<2x128xf32>
    %461 = vector.extract_strided_slice %454 {offsets = [0, 128], sizes = [2, 128], strides = [1, 1]} : vector<2x512xf32> to vector<2x128xf32>
    %462 = arith.negf %461 : vector<2x128xf32>
    %463 = math.exp %462 : vector<2x128xf32>
    %cst_130 = arith.constant 1.000000e+00 : f32
    %464 = vector.broadcast %cst_130 : f32 to vector<2x128xf32>
    %465 = arith.addf %464, %463 : vector<2x128xf32>
    %466 = arith.divf %464, %465 : vector<2x128xf32>
    %467 = vector.extract_strided_slice %454 {offsets = [0, 256], sizes = [2, 128], strides = [1, 1]} : vector<2x512xf32> to vector<2x128xf32>
    %468 = math.tanh %467 : vector<2x128xf32>
    %469 = vector.extract_strided_slice %454 {offsets = [0, 384], sizes = [2, 128], strides = [1, 1]} : vector<2x512xf32> to vector<2x128xf32>
    %470 = arith.negf %469 : vector<2x128xf32>
    %471 = math.exp %470 : vector<2x128xf32>
    %cst_131 = arith.constant 1.000000e+00 : f32
    %472 = vector.broadcast %cst_131 : f32 to vector<2x128xf32>
    %473 = arith.addf %472, %471 : vector<2x128xf32>
    %474 = arith.divf %472, %473 : vector<2x128xf32>
    %475 = arith.mulf %466, %445 : vector<2x128xf32>
    %476 = arith.mulf %460, %468 : vector<2x128xf32>
    %477 = arith.addf %475, %476 : vector<2x128xf32>
    %478 = math.tanh %477 : vector<2x128xf32>
    %479 = arith.mulf %474, %478 : vector<2x128xf32>
    %c0_132 = arith.constant 0 : index
    %c6_133 = arith.constant 6 : index
    %c0_134 = arith.constant 0 : index
    %480 = vector.load %arg11[%c0_132, %c6_133, %c0_134] : memref<2x8x128xf32, #tpu.memory_space<vmem>>, vector<2x1x128xf32>
    %481 = vector.shape_cast %480 : vector<2x1x128xf32> to vector<2x128xf32>
    %482 = vector.shape_cast %479 : vector<2x128xf32> to vector<2x1x128xf32>
    tpu.vector_store %arg11[%c0_132, %c6_133, %c0_134], %482 {strides = array<i32>} : memref<2x8x128xf32, #tpu.memory_space<vmem>>, vector<2x1x128xf32>,
    %483 = tpu.concatenate %258, %479 in 1 : vector<2x128xf32>, vector<2x128xf32> -> vector<2x256xf32>
    %c0_135 = arith.constant 0 : index
    %c0_136 = arith.constant 0 : index
    %484 = vector.load %arg4[%c0_135, %c0_136] : memref<256x512xf32, #tpu.memory_space<vmem>>, vector<256x512xf32>
    %cst_137 = arith.constant dense<0.000000e+00> : vector<2x512xf32>
    %485 = tpu.matmul %483, %484, %cst_137 {dimension_numbers = #tpu.dot_dimension_numbers<[1], [0], [0], [1], [0, 0, 1, 1], [], []>} : vector<2x256xf32>, vector<256x512xf32>, vector<2x512xf32> -> vector<2x512xf32>
    %486 = arith.addf %485, %5 : vector<2x512xf32>
    %487 = vector.extract_strided_slice %486 {offsets = [0, 0], sizes = [2, 128], strides = [1, 1]} : vector<2x512xf32> to vector<2x128xf32>
    %488 = arith.negf %487 : vector<2x128xf32>
    %489 = math.exp %488 : vector<2x128xf32>
    %cst_138 = arith.constant 1.000000e+00 : f32
    %490 = vector.broadcast %cst_138 : f32 to vector<2x128xf32>
    %491 = arith.addf %490, %489 : vector<2x128xf32>
    %492 = arith.divf %490, %491 : vector<2x128xf32>
    %493 = vector.extract_strided_slice %486 {offsets = [0, 128], sizes = [2, 128], strides = [1, 1]} : vector<2x512xf32> to vector<2x128xf32>
    %494 = arith.negf %493 : vector<2x128xf32>
    %495 = math.exp %494 : vector<2x128xf32>
    %cst_139 = arith.constant 1.000000e+00 : f32
    %496 = vector.broadcast %cst_139 : f32 to vector<2x128xf32>
    %497 = arith.addf %496, %495 : vector<2x128xf32>
    %498 = arith.divf %496, %497 : vector<2x128xf32>
    %499 = vector.extract_strided_slice %486 {offsets = [0, 256], sizes = [2, 128], strides = [1, 1]} : vector<2x512xf32> to vector<2x128xf32>
    %500 = math.tanh %499 : vector<2x128xf32>
    %501 = vector.extract_strided_slice %486 {offsets = [0, 384], sizes = [2, 128], strides = [1, 1]} : vector<2x512xf32> to vector<2x128xf32>
    %502 = arith.negf %501 : vector<2x128xf32>
    %503 = math.exp %502 : vector<2x128xf32>
    %cst_140 = arith.constant 1.000000e+00 : f32
    %504 = vector.broadcast %cst_140 : f32 to vector<2x128xf32>
    %505 = arith.addf %504, %503 : vector<2x128xf32>
    %506 = arith.divf %504, %505 : vector<2x128xf32>
    %507 = arith.mulf %498, %477 : vector<2x128xf32>
    %508 = arith.mulf %492, %500 : vector<2x128xf32>
    %509 = arith.addf %507, %508 : vector<2x128xf32>
    %510 = math.tanh %509 : vector<2x128xf32>
    %511 = arith.mulf %506, %510 : vector<2x128xf32>
    %c0_141 = arith.constant 0 : index
    %c7_142 = arith.constant 7 : index
    %c0_143 = arith.constant 0 : index
    %512 = vector.load %arg11[%c0_141, %c7_142, %c0_143] : memref<2x8x128xf32, #tpu.memory_space<vmem>>, vector<2x1x128xf32>
    %513 = vector.shape_cast %512 : vector<2x1x128xf32> to vector<2x128xf32>
    %514 = vector.shape_cast %511 : vector<2x128xf32> to vector<2x1x128xf32>
    tpu.vector_store %arg11[%c0_141, %c7_142, %c0_143], %514 {strides = array<i32>} : memref<2x8x128xf32, #tpu.memory_space<vmem>>, vector<2x1x128xf32>,
    %c0_144 = arith.constant 0 : index
    %c0_145 = arith.constant 0 : index
    %c0_146 = arith.constant 0 : index
    %515 = vector.load %arg11[%c0_144, %c0_145, %c0_146] : memref<2x8x128xf32, #tpu.memory_space<vmem>>, vector<1x8x128xf32>
    %516 = vector.shape_cast %515 : vector<1x8x128xf32> to vector<8x128xf32>
    %c0_147 = arith.constant 0 : index
    %c0_148 = arith.constant 0 : index
    %517 = vector.load %arg6[%c0_147, %c0_148] : memref<64x8xf32, #tpu.memory_space<vmem>>, vector<64x8xf32>
    %cst_149 = arith.constant dense<0.000000e+00> : vector<64x128xf32>
    %518 = tpu.matmul %517, %516, %cst_149 {dimension_numbers = #tpu.dot_dimension_numbers<[1], [0], [0], [1], [0, 0, 1, 1], [], []>} : vector<64x8xf32>, vector<8x128xf32>, vector<64x128xf32> -> vector<64x128xf32>
    %519 = arith.addf %518, %8 : vector<64x128xf32>
    %cst_150 = arith.constant 0.000000e+00 : f32
    %520 = vector.broadcast %cst_150 : f32 to vector<64x128xf32>
    %521 = arith.maximumf %519, %520 : vector<64x128xf32>
    %c0_151 = arith.constant 0 : index
    %c0_152 = arith.constant 0 : index
    %522 = vector.load %arg8[%c0_151, %c0_152] : memref<1x64xf32, #tpu.memory_space<vmem>>, vector<1x64xf32>
    %cst_153 = arith.constant dense<0.000000e+00> : vector<1x128xf32>
    %523 = tpu.matmul %522, %521, %cst_153 {dimension_numbers = #tpu.dot_dimension_numbers<[1], [0], [0], [1], [0, 0, 1, 1], [], []>} : vector<1x64xf32>, vector<64x128xf32>, vector<1x128xf32> -> vector<1x128xf32>
    %524 = vector.broadcast %9 : f32 to vector<1x128xf32>
    %525 = arith.addf %523, %524 : vector<1x128xf32>
    %cst_154 = arith.constant 0.000000e+00 : f32
    %526 = vector.broadcast %cst_154 : f32 to vector<1x128xf32>
    %527 = arith.maximumf %525, %526 : vector<1x128xf32>
    %c1_155 = arith.constant 1 : index
    %c0_156 = arith.constant 0 : index
    %c0_157 = arith.constant 0 : index
    %528 = vector.load %arg11[%c1_155, %c0_156, %c0_157] : memref<2x8x128xf32, #tpu.memory_space<vmem>>, vector<1x8x128xf32>
    %529 = vector.shape_cast %528 : vector<1x8x128xf32> to vector<8x128xf32>
    %c0_158 = arith.constant 0 : index
    %c0_159 = arith.constant 0 : index
    %530 = vector.load %arg6[%c0_158, %c0_159] : memref<64x8xf32, #tpu.memory_space<vmem>>, vector<64x8xf32>
    %cst_160 = arith.constant dense<0.000000e+00> : vector<64x128xf32>
    %531 = tpu.matmul %530, %529, %cst_160 {dimension_numbers = #tpu.dot_dimension_numbers<[1], [0], [0], [1], [0, 0, 1, 1], [], []>} : vector<64x8xf32>, vector<8x128xf32>, vector<64x128xf32> -> vector<64x128xf32>
    %532 = arith.addf %531, %8 : vector<64x128xf32>
    %cst_161 = arith.constant 0.000000e+00 : f32
    %533 = vector.broadcast %cst_161 : f32 to vector<64x128xf32>
    %534 = arith.maximumf %532, %533 : vector<64x128xf32>
    %c0_162 = arith.constant 0 : index
    %c0_163 = arith.constant 0 : index
    %535 = vector.load %arg8[%c0_162, %c0_163] : memref<1x64xf32, #tpu.memory_space<vmem>>, vector<1x64xf32>
    %cst_164 = arith.constant dense<0.000000e+00> : vector<1x128xf32>
    %536 = tpu.matmul %535, %534, %cst_164 {dimension_numbers = #tpu.dot_dimension_numbers<[1], [0], [0], [1], [0, 0, 1, 1], [], []>} : vector<1x64xf32>, vector<64x128xf32>, vector<1x128xf32> -> vector<1x128xf32>
    %537 = vector.broadcast %9 : f32 to vector<1x128xf32>
    %538 = arith.addf %536, %537 : vector<1x128xf32>
    %cst_165 = arith.constant 0.000000e+00 : f32
    %539 = vector.broadcast %cst_165 : f32 to vector<1x128xf32>
    %540 = arith.maximumf %538, %539 : vector<1x128xf32>
    %541 = tpu.concatenate %527, %540 in 0 : vector<1x128xf32>, vector<1x128xf32> -> vector<2x128xf32>
    %c0_166 = arith.constant 0 : index
    %c0_167 = arith.constant 0 : index
    %542 = vector.load %arg10[%c0_166, %c0_167] : memref<2x128xf32, #tpu.memory_space<vmem>>, vector<2x128xf32>
    tpu.vector_store %arg10[%c0_166, %c0_167], %541 {strides = array<i32>} : memref<2x128xf32, #tpu.memory_space<vmem>>, vector<2x128xf32>,
    return
  }
  func.func @transform_0(%arg0: i32) -> (i32, i32, i32) {
    %c0_i32 = arith.constant 0 : i32
    %c0_i32_0 = arith.constant 0 : i32
    %c0_i32_1 = arith.constant 0 : i32
    %c0_i32_2 = arith.constant 0 : i32
    return %c0_i32, %c0_i32_0, %c0_i32_1 : i32, i32, i32
  }
  func.func @transform_1(%arg0: i32) -> (i32, i32) {
    %c0_i32 = arith.constant 0 : i32
    %c0_i32_0 = arith.constant 0 : i32
    %c0_i32_1 = arith.constant 0 : i32
    return %c0_i32, %c0_i32_0 : i32, i32
  }
  func.func @transform_2(%arg0: i32) -> (i32, i32) {
    %c0_i32 = arith.constant 0 : i32
    %c0_i32_0 = arith.constant 0 : i32
    %c0_i32_1 = arith.constant 0 : i32
    return %c0_i32, %c0_i32_0 : i32, i32
  }
  func.func @transform_3(%arg0: i32) -> (i32, i32) {
    %c0_i32 = arith.constant 0 : i32
    %c0_i32_0 = arith.constant 0 : i32
    %c0_i32_1 = arith.constant 0 : i32
    return %c0_i32, %c0_i32_0 : i32, i32
  }
  func.func @transform_4(%arg0: i32) -> (i32, i32) {
    %c0_i32 = arith.constant 0 : i32
    %c0_i32_0 = arith.constant 0 : i32
    %c0_i32_1 = arith.constant 0 : i32
    return %c0_i32, %c0_i32_0 : i32, i32
  }
  func.func @transform_5(%arg0: i32) -> (i32, i32) {
    %c0_i32 = arith.constant 0 : i32
    %c0_i32_0 = arith.constant 0 : i32
    %c0_i32_1 = arith.constant 0 : i32
    return %c0_i32, %c0_i32_0 : i32, i32
  }
  func.func @transform_6(%arg0: i32) -> (i32, i32) {
    %c0_i32 = arith.constant 0 : i32
    %c0_i32_0 = arith.constant 0 : i32
    %c0_i32_1 = arith.constant 0 : i32
    return %c0_i32, %c0_i32_0 : i32, i32
  }
  func.func @transform_7(%arg0: i32) -> (i32, i32) {
    %c0_i32 = arith.constant 0 : i32
    %c0_i32_0 = arith.constant 0 : i32
    %c0_i32_1 = arith.constant 0 : i32
    return %c0_i32, %c0_i32_0 : i32, i32
  }
  func.func @transform_8(%arg0: i32) -> (i32, i32) {
    %c0_i32 = arith.constant 0 : i32
    %c0_i32_0 = arith.constant 0 : i32
    %c0_i32_1 = arith.constant 0 : i32
    return %c0_i32, %c0_i32_0 : i32, i32
  }
  func.func @transform_9(%arg0: i32) -> (i32, i32) {
    %c0_i32 = arith.constant 0 : i32
    %c0_i32_0 = arith.constant 0 : i32
    %c0_i32_1 = arith.constant 0 : i32
    return %c0_i32, %c0_i32_0 : i32, i32
  }
}

</mosaic_0001>

<bundles_post_ra>
// kernel: tpu_custom_call.1
= control target key start
LH: loop header
LB: loop body
LE: loop exit
PB: predicated region body
PF: predicated region fallthrough
CT: control target
= control target key end

     0   :  { %15 = vsyncpa [#allocation5], 0  ;;  %s9326_s0 = inlined_call_operand.vmem [shape: f32[8,2,128], index: 0, kind: input, shape index: {}]   ;;  %s9327_s1 = inlined_call_operand.hbm [shape: f32[256,512], index: 1, kind: input, shape index: {}]   ;;  %s9328_s2 = inlined_call_operand.vmem [shape: f32[1,512], index: 2, kind: input, shape index: {}]   ;;  %s9329_s3 = inlined_call_operand.hbm [shape: f32[256,512], index: 3, kind: input, shape index: {}]   ;;  %s9330_s4 = inlined_call_operand.vmem [shape: f32[1,512], index: 4, kind: input, shape index: {}]   ;;  %s9331_s5 = inlined_call_operand.vmem [shape: f32[64,8], index: 5, kind: input, shape index: {}]   ;;  %s9332_s6 = inlined_call_operand.vmem [shape: f32[64,1], index: 6, kind: input, shape index: {}]   ;;  %s9333_s7 = inlined_call_operand.vmem [shape: f32[1,64], index: 7, kind: input, shape index: {}]   ;;  %s9334_s8 = inlined_call_operand.<no memory space> [shape: f32[1,1], index: 8, kind: input, shape index: {}]   ;;  %s9335_s9 = inlined_call_operand.hbm [shape: f32[2,128], index: 9, kind: output, shape index: {}]  }
   0x1   :  { %16 = vsyncpa [#allocation8], 0 }
   0x2   :  { %17 = vsyncpa [#allocation6], 0  ;;  %s7229_s30 = smov [#allocation4]   ;;  %s7157_s13 = scalar_lea.hbm %s9327_s1, 16384 }
   0x3   :  { %s25_s10 = sshll.u32 %s7229_s30, 4  ;;  %p7158_p0 = scmp.ne.s32.totalorder %s9327_s1, %s7157_s13  ;;  %s26_s10 = int_to_ptr.vmem [resolvable:$true] %s25_s10 }
   0x4   :  { %p7161_p1 = scmp.lt.u32.totalorder %s7157_s13, %s9327_s1 }
   0x6   :  { %p7163_p2 = pnand %p7161_p1, %p7158_p0 }
   0x8   :  { %7166 = shalt.err (!%p7163_p2)
}
   0x9   :  { %s7167_s18 = scalar_lea.vmem %s26_s10, 16384  ;;  %p7172_p4 = scmp.lt.s32.totalorder %s26_s10, %s26_s10 }
   0xa   :  { %p7168_p3 = scmp.ne.s32.totalorder %s26_s10, %s7167_s18  ;;  %p7173_p5 = scmp.lt.s32.totalorder %s7167_s18, %s7167_s18 }
   0xc   :  { %p7174_p6 = por %p7173_p5, %p7172_p4 }
   0xe   :  { %p7175_p7 = pnand %p7174_p6, %p7168_p3 }
  0x10   :  { %7178 = shalt.err (!%p7175_p7)
}
  0x11   :  { %s7230_s19 = smov 512   ;;  %s7231_s20 = smov 32  }
  0x12   :  { %31 = dma.hbm_to_vmem [thread:$0]  %s9327_s1, 16384, %s26_s10, [#allocation5], %s7230_s19, %s7230_s19, %s7231_s20  }
  0x13   :  { %s7232_s23 = smov [#allocation7]   ;;  %s7179_s27 = scalar_lea.hbm %s9329_s3, 16384 }
  0x14   :  { %s39_s24 = sshll.u32 %s7232_s23, 4  ;;  %p7180_p8 = scmp.ne.s32.totalorder %s9329_s3, %s7179_s27  ;;  %s40_s24 = int_to_ptr.vmem [resolvable:$true] %s39_s24 }
  0x15   :  { %p7183_p9 = scmp.lt.u32.totalorder %s7179_s27, %s9329_s3 }
  0x17   :  { %p7185_p10 = pnand %p7183_p9, %p7180_p8 }
  0x19   :  { %7188 = shalt.err (!%p7185_p10)
}
  0x1a   :  { %s7189_s12 = scalar_lea.vmem %s40_s24, 16384  ;;  %p7194_p12 = scmp.lt.s32.totalorder %s40_s24, %s40_s24 }
  0x1b   :  { %p7190_p11 = scmp.ne.s32.totalorder %s40_s24, %s7189_s12  ;;  %p7195_p13 = scmp.lt.s32.totalorder %s7189_s12, %s7189_s12 }
  0x1d   :  { %p7196_p0 = por %p7195_p13, %p7194_p12 }
  0x1f   :  { %p7197_p1 = pnand %p7196_p0, %p7190_p11 }
  0x21   :  { %7200 = shalt.err (!%p7197_p1)
}
  0x22   :  { %45 = dma.hbm_to_vmem [thread:$0]  %s9329_s3, 16384, %s40_s24, [#allocation8], %s7230_s19, %s7230_s19, %s7231_s20  }
  0x23   :  { %7223 = dma.done.wait [#allocation5], 16384  }
  0x24   :  { %7224 = vsyncadd [#allocation5], 4294950912 }
  0x25   :  { %7225 = dma.done.wait [#allocation8], 16384  }
  0x26   :  { %7226 = vsyncadd [#allocation8], 4294950912  ;;  %v9336_v0 = vmov 0.0   ;;  %v157_v1 = vld [vmem:[#allocation4 + $0x8] sm:$0xff]  ;;  %v156_v3 = vld [vmem:[#allocation4] sm:$0xff]  ;;  %vm4203_vm0 = vcmask 64512  }
  0x27   :  { %348 = vmatprep.mubr.f32.mxu0 %v9336_v0  ;;  %419 = vmatprep.mubr.f32.mxu1 %v9336_v0  ;;  %v161_v2 = vld [vmem:[#allocation4 + $0x28] sm:$0xff]  ;;  %v160_v5 = vld [vmem:[#allocation4 + $0x20] sm:$0xff]  ;;  %v159_v19 = vld [vmem:[#allocation4 + $0x18] sm:$0xff]  ;;  %vm7237_vm1 = vmmov 0   ;;  %vm4343_vm2 = vcmask 523264   ;;  %s7238_s13 = smov [#allocation9]  }
  0x28   :  { %v7315_v4 = vpack.c.bf16 %v161_v2, %v157_v1  ;;  %v165_v6 = vld [vmem:[#allocation4 + $0x48] sm:$0xff]  ;;  %v7317_v8 = vpack.c.bf16 %v160_v5, %v156_v3  ;;  %v164_v10 = vld [vmem:[#allocation4 + $0x40] sm:$0xff]  ;;  %v163_v20 = vld [vmem:[#allocation4 + $0x38] sm:$0xff]  ;;  %s4616_s14 = sshll.u32 %s7238_s13, 4  ;;  %vm4607_vm3 = vcmask 1040384   ;;  %s4617_s14 = int_to_ptr.vmem [resolvable:$true] %s4616_s14 }
  0x29   :  { %v169_v7 = vld [vmem:[#allocation4 + $0x68] sm:$0xff]  ;;  %v168_v11 = vld [vmem:[#allocation4 + $0x60] sm:$0xff]  ;;  %v7328_v22 = vpack.c.bf16 %v163_v20, %v159_v19  ;;  %v158_v23 = vld [vmem:[#allocation4 + $0x10] sm:$0xff]  ;;  %s7201_s15 = scalar_lea.vmem %s4617_s14, 32  ;;  %p7206_p3 = scmp.lt.s32.totalorder %s4617_s14, %s4617_s14 }
  0x2a   :  { %9489 = vst [vmem:[#allocation13_spill] sm:$0xff] %v7315_v4  ;;  %v7319_v9 = vpack.c.bf16 %v169_v7, %v165_v6  ;;  %v173_v12 = vld [vmem:[#allocation4 + $0x88] sm:$0xff]  ;;  %4818 = vmatprep.subr.bf16.mxu0 %v7315_v4  ;;  %v7323_v14 = vpack.c.bf16 %v168_v11, %v164_v10  ;;  %v172_v15 = vld [vmem:[#allocation4 + $0x80] sm:$0xff]  ;;  %v162_v24 = vld [vmem:[#allocation4 + $0x30] sm:$0xff]  ;;  %p7202_p2 = scmp.ne.s32.totalorder %s4617_s14, %s7201_s15  ;;  %p7207_p4 = scmp.lt.s32.totalorder %s7201_s15, %s7201_s15 }
  0x2b   :  { %v177_v13 = vld [vmem:[#allocation4 + $0xa8] sm:$0xff]  ;;  %4820 = vmatpush1.bf16.msra.mxu0 %v7317_v8  ;;  %v176_v16 = vld [vmem:[#allocation4 + $0xa0] sm:$0xff]  ;;  %9490 = vst [vmem:[#allocation14_spill] sm:$0xff] %v7328_v22  ;;  %v7330_v25 = vpack.c.bf16 %v162_v24, %v158_v23  ;;  %4882 = vmatprep.subr.bf16.mxu1 %v7328_v22  ;;  %v167_v27 = vld [vmem:[#allocation4 + $0x58] sm:$0xff] }
  0x2c   :  { %4822 = vmatprep.subr.bf16.mxu0 %v7319_v9  ;;  %v7326_v17 = vpack.c.bf16 %v177_v13, %v173_v12  ;;  %v181_v18 = vld [vmem:[#allocation4 + $0xc8] sm:$0xff]  ;;  %v7333_v26 = vpack.c.bf16 %v176_v16, %v172_v15  ;;  %v171_v28 = vld [vmem:[#allocation4 + $0x78] sm:$0xff]  ;;  %v166_v29 = vld [vmem:[#allocation4 + $0x50] sm:$0xff]  ;;  %p7208_p5 = por %p7207_p4, %p7206_p3 }
  0x2d   :  { %v185_v21 = vld [vmem:[#allocation4 + $0xe8] sm:$0xff]  ;;  %v180_v31 = vld [vmem:[#allocation4 + $0xc0] sm:$0xff]  ;;  %4884 = vmatpush1.bf16.msra.mxu1 %v7330_v25  ;;  %v7340_v33 = vpack.c.bf16 %v171_v28, %v167_v27  ;;  %v170_v34 = vld [vmem:[#allocation4 + $0x70] sm:$0xff] }
  0x2e   :  { %v7337_v30 = vpack.c.bf16 %v185_v21, %v181_v18  ;;  %v184_v32 = vld [vmem:[#allocation4 + $0xe0] sm:$0xff]  ;;  %v189_v35 = vld [vmem:[#allocation4 + $0x108] sm:$0xff]  ;;  %v7342_v37 = vpack.c.bf16 %v170_v34, %v166_v29  ;;  %v175_v38 = vld [vmem:[#allocation4 + $0x98] sm:$0xff]  ;;  %p7209_p6 = pnand %p7208_p5, %p7202_p2 }
  0x2f   :  { %4824 = vmatpush1.bf16.msra.mxu0 %v7323_v14  ;;  %v193_v36 = vld [vmem:[#allocation4 + $0x128] sm:$0xff]  ;;  %4886 = vmatprep.subr.bf16.mxu1 %v7340_v33  ;;  %v179_v39 = vld [vmem:[#allocation4 + $0xb8] sm:$0xff]  ;;  %v174_v40 = vld [vmem:[#allocation4 + $0x90] sm:$0xff]  ;;  %v7346_v42 = vpack.c.bf16 %v184_v32, %v180_v31 }
  0x30   :  { %4826 = vmatprep.subr.bf16.mxu0 %v7326_v17  ;;  %v178_v41 = vld [vmem:[#allocation4 + $0xb0] sm:$0xff]  ;;  %v188_v43 = vld [vmem:[#allocation4 + $0x100] sm:$0xff]  ;;  %v7348_v45 = vpack.c.bf16 %v179_v39, %v175_v38  ;;  %v7351_v46 = vpack.c.bf16 %v193_v36, %v189_v35  ;;  %v197_v47 = vld [vmem:[#allocation4 + $0x148] sm:$0xff] }
  0x31   :  { %v192_v44 = vld [vmem:[#allocation4 + $0x120] sm:$0xff]  ;;  %4888 = vmatpush1.bf16.msra.mxu1 %v7342_v37  ;;  %v7354_v48 = vpack.c.bf16 %v178_v41, %v174_v40  ;;  %v183_v49 = vld [vmem:[#allocation4 + $0xd8] sm:$0xff]  ;;  %v201_v51 = vld [vmem:[#allocation4 + $0x168] sm:$0xff] }
  0x32   :  { %v187_v50 = vld [vmem:[#allocation4 + $0xf8] sm:$0xff]  ;;  %4890 = vmatprep.subr.bf16.mxu1 %v7348_v45  ;;  %v182_v53 = vld [vmem:[#allocation4 + $0xd0] sm:$0xff]  ;;  %v7360_v55 = vpack.c.bf16 %v192_v44, %v188_v43  ;;  %v7363_v58 = vpack.c.bf16 %v201_v51, %v197_v47  ;;  %v196_v59 = vld [vmem:[#allocation4 + $0x140] sm:$0xff] }
  0x33   :  { %4828 = vmatpush1.bf16.msra.mxu0 %v7333_v26  ;;  %v7357_v52 = vpack.c.bf16 %v187_v50, %v183_v49  ;;  %v186_v54 = vld [vmem:[#allocation4 + $0xf0] sm:$0xff]  ;;  %v191_v56 = vld [vmem:[#allocation4 + $0x118] sm:$0xff]  ;;  %v200_v60 = vld [vmem:[#allocation4 + $0x160] sm:$0xff] }
  0x34   :  { %4830 = vmatprep.subr.bf16.mxu0 %v7337_v30  ;;  %v195_v57 = vld [vmem:[#allocation4 + $0x138] sm:$0xff]  ;;  %v205_v61 = vld [vmem:[#allocation4 + $0x188] sm:$0xff]  ;;  %v7366_v62 = vpack.c.bf16 %v186_v54, %v182_v53  ;;  %v190_v2 = vld [vmem:[#allocation4 + $0x110] sm:$0xff]  ;;  %v7372_v7 = vpack.c.bf16 %v200_v60, %v196_v59 }
  0x35   :  { %4892 = vmatpush1.bf16.msra.mxu1 %v7354_v48  ;;  %v209_v63 = vld [vmem:[#allocation4 + $0x1a8] sm:$0xff]  ;;  %v7369_v1 = vpack.c.bf16 %v195_v57, %v191_v56  ;;  %v194_v3 = vld [vmem:[#allocation4 + $0x130] sm:$0xff]  ;;  %v199_v5 = vld [vmem:[#allocation4 + $0x158] sm:$0xff] }
  0x36   :  { %4894 = vmatprep.subr.bf16.mxu1 %v7357_v52  ;;  %v203_v6 = vld [vmem:[#allocation4 + $0x178] sm:$0xff]  ;;  %v7375_v10 = vpack.c.bf16 %v209_v63, %v205_v61  ;;  %v204_v11 = vld [vmem:[#allocation4 + $0x180] sm:$0xff]  ;;  %v213_v13 = vld [vmem:[#allocation4 + $0x1c8] sm:$0xff]  ;;  %v7378_v15 = vpack.c.bf16 %v194_v3, %v190_v2 }
  0x37   :  { %4832 = vmatpush1.bf16.msra.mxu0 %v7346_v42  ;;  %v208_v12 = vld [vmem:[#allocation4 + $0x1a0] sm:$0xff]  ;;  %v217_v16 = vld [vmem:[#allocation4 + $0x1e8] sm:$0xff]  ;;  %v7381_v18 = vpack.c.bf16 %v203_v6, %v199_v5  ;;  %v198_v19 = vld [vmem:[#allocation4 + $0x150] sm:$0xff] }
  0x38   :  { %4834 = vmatprep.subr.bf16.mxu0 %v7351_v46  ;;  %v202_v20 = vld [vmem:[#allocation4 + $0x170] sm:$0xff]  ;;  %v207_v21 = vld [vmem:[#allocation4 + $0x198] sm:$0xff]  ;;  %v7384_v24 = vpack.c.bf16 %v208_v12, %v204_v11  ;;  %v7387_v27 = vpack.c.bf16 %v217_v16, %v213_v13  ;;  %v212_v28 = vld [vmem:[#allocation4 + $0x1c0] sm:$0xff] }
  0x39   :  { %4896 = vmatpush1.bf16.msra.mxu1 %v7366_v62  ;;  %v211_v23 = vld [vmem:[#allocation4 + $0x1b8] sm:$0xff]  ;;  %v216_v29 = vld [vmem:[#allocation4 + $0x1e0] sm:$0xff]  ;;  %v221_v31 = vld [vmem:[#allocation4 + $0x208] sm:$0xff]  ;;  %v7390_v32 = vpack.c.bf16 %v202_v20, %v198_v19 }
  0x3a   :  { %4898 = vmatprep.subr.bf16.mxu1 %v7369_v1  ;;  %v225_v34 = vld [vmem:[#allocation4 + $0x228] sm:$0xff]  ;;  %v7393_v35 = vpack.c.bf16 %v211_v23, %v207_v21  ;;  %v206_v36 = vld [vmem:[#allocation4 + $0x190] sm:$0xff]  ;;  %v215_v39 = vld [vmem:[#allocation4 + $0x1d8] sm:$0xff]  ;;  %v7396_v41 = vpack.c.bf16 %v216_v29, %v212_v28 }
  0x3b   :  { %4836 = vmatpush1.bf16.msra.mxu0 %v7360_v55  ;;  %v210_v38 = vld [vmem:[#allocation4 + $0x1b0] sm:$0xff]  ;;  %v219_v40 = vld [vmem:[#allocation4 + $0x1f8] sm:$0xff]  ;;  %v7399_v43 = vpack.c.bf16 %v225_v34, %v221_v31  ;;  %v220_v44 = vld [vmem:[#allocation4 + $0x200] sm:$0xff] }
  0x3c   :  { %4838 = vmatprep.subr.bf16.mxu0 %v7363_v58  ;;  %v224_v47 = vld [vmem:[#allocation4 + $0x220] sm:$0xff]  ;;  %v229_v49 = vld [vmem:[#allocation4 + $0x248] sm:$0xff]  ;;  %v7402_v50 = vpack.c.bf16 %v210_v38, %v206_v36  ;;  %v7405_v53 = vpack.c.bf16 %v219_v40, %v215_v39  ;;  %v214_v54 = vld [vmem:[#allocation4 + $0x1d0] sm:$0xff] }
  0x3d   :  { %4900 = vmatpush1.bf16.msra.mxu1 %v7378_v15  ;;  %v233_v51 = vld [vmem:[#allocation4 + $0x268] sm:$0xff]  ;;  %v218_v56 = vld [vmem:[#allocation4 + $0x1f0] sm:$0xff]  ;;  %v223_v57 = vld [vmem:[#allocation4 + $0x218] sm:$0xff]  ;;  %v7408_v60 = vpack.c.bf16 %v224_v47, %v220_v44 }
  0x3e   :  { %4902 = vmatprep.subr.bf16.mxu1 %v7381_v18  ;;  %v227_v59 = vld [vmem:[#allocation4 + $0x238] sm:$0xff]  ;;  %v7411_v61 = vpack.c.bf16 %v233_v51, %v229_v49  ;;  %v228_v63 = vld [vmem:[#allocation4 + $0x240] sm:$0xff]  ;;  %v237_v3 = vld [vmem:[#allocation4 + $0x288] sm:$0xff]  ;;  %v7414_v5 = vpack.c.bf16 %v218_v56, %v214_v54 }
  0x3f   :  { %4840 = vmatpush1.bf16.msra.mxu0 %v7372_v7  ;;  %v232_v2 = vld [vmem:[#allocation4 + $0x260] sm:$0xff]  ;;  %v241_v6 = vld [vmem:[#allocation4 + $0x2a8] sm:$0xff]  ;;  %v7417_v11 = vpack.c.bf16 %v227_v59, %v223_v57  ;;  %v222_v12 = vld [vmem:[#allocation4 + $0x210] sm:$0xff] }
  0x40   :  { %4842 = vmatprep.subr.bf16.mxu0 %v7375_v10  ;;  %v226_v13 = vld [vmem:[#allocation4 + $0x230] sm:$0xff]  ;;  %v231_v16 = vld [vmem:[#allocation4 + $0x258] sm:$0xff]  ;;  %v7420_v20 = vpack.c.bf16 %v232_v2, %v228_v63  ;;  %v7423_v21 = vpack.c.bf16 %v241_v6, %v237_v3  ;;  %v236_v23 = vld [vmem:[#allocation4 + $0x280] sm:$0xff] }
  0x41   :  { %4904 = vmatpush1.bf16.msra.mxu1 %v7390_v32  ;;  %v235_v19 = vld [vmem:[#allocation4 + $0x278] sm:$0xff]  ;;  %v240_v28 = vld [vmem:[#allocation4 + $0x2a0] sm:$0xff]  ;;  %v245_v29 = vld [vmem:[#allocation4 + $0x2c8] sm:$0xff]  ;;  %v7426_v31 = vpack.c.bf16 %v226_v13, %v222_v12 }
  0x42   :  { %4906 = vmatprep.subr.bf16.mxu1 %v7393_v35  ;;  %v249_v34 = vld [vmem:[#allocation4 + $0x2e8] sm:$0xff]  ;;  %v7429_v36 = vpack.c.bf16 %v235_v19, %v231_v16  ;;  %v230_v38 = vld [vmem:[#allocation4 + $0x250] sm:$0xff]  ;;  %v239_v40 = vld [vmem:[#allocation4 + $0x298] sm:$0xff]  ;;  %v7432_v47 = vpack.c.bf16 %v240_v28, %v236_v23 }
  0x43   :  { %4844 = vmatpush1.bf16.msra.mxu0 %v7384_v24  ;;  %v234_v39 = vld [vmem:[#allocation4 + $0x270] sm:$0xff]  ;;  %v243_v44 = vld [vmem:[#allocation4 + $0x2b8] sm:$0xff]  ;;  %v7435_v49 = vpack.c.bf16 %v249_v34, %v245_v29  ;;  %v244_v51 = vld [vmem:[#allocation4 + $0x2c0] sm:$0xff] }
  0x44   :  { %4846 = vmatprep.subr.bf16.mxu0 %v7387_v27  ;;  %v248_v54 = vld [vmem:[#allocation4 + $0x2e0] sm:$0xff]  ;;  %v253_v56 = vld [vmem:[#allocation4 + $0x308] sm:$0xff]  ;;  %v7438_v57 = vpack.c.bf16 %v234_v39, %v230_v38  ;;  %v7441_v63 = vpack.c.bf16 %v243_v44, %v239_v40  ;;  %v238_v2 = vld [vmem:[#allocation4 + $0x290] sm:$0xff] }
  0x45   :  { %4908 = vmatpush1.bf16.msra.mxu1 %v7402_v50  ;;  %v257_v59 = vld [vmem:[#allocation4 + $0x328] sm:$0xff]  ;;  %v242_v3 = vld [vmem:[#allocation4 + $0x2b0] sm:$0xff]  ;;  %v247_v6 = vld [vmem:[#allocation4 + $0x2d8] sm:$0xff]  ;;  %v7444_v13 = vpack.c.bf16 %v248_v54, %v244_v51 }
  0x46   :  { %4910 = vmatprep.subr.bf16.mxu1 %v7405_v53  ;;  %9491 = vst [vmem:[#allocation15_spill] sm:$0xff] %v7441_v63  ;;  %v251_v12 = vld [vmem:[#allocation4 + $0x2f8] sm:$0xff]  ;;  %v7447_v16 = vpack.c.bf16 %v257_v59, %v253_v56  ;;  %v252_v19 = vld [vmem:[#allocation4 + $0x300] sm:$0xff]  ;;  %v261_v28 = vld [vmem:[#allocation4 + $0x348] sm:$0xff]  ;;  %v7450_v29 = vpack.c.bf16 %v242_v3, %v238_v2 }
  0x47   :  { %4848 = vmatpush1.bf16.msra.mxu0 %v7396_v41  ;;  %9492 = vst [vmem:[#allocation16_spill] sm:$0xff] %v7444_v13  ;;  %v256_v23 = vld [vmem:[#allocation4 + $0x320] sm:$0xff]  ;;  %v265_v34 = vld [vmem:[#allocation4 + $0x368] sm:$0xff]  ;;  %v7453_v38 = vpack.c.bf16 %v251_v12, %v247_v6  ;;  %v246_v39 = vld [vmem:[#allocation4 + $0x2d0] sm:$0xff] }
  0x48   :  { %4850 = vmatprep.subr.bf16.mxu0 %v7399_v43  ;;  %9493 = vst [vmem:[#allocation17_spill] sm:$0xff] %v7447_v16  ;;  %9494 = vst [vmem:[#allocation18_spill] sm:$0xff] %v7450_v29  ;;  %v250_v40 = vld [vmem:[#allocation4 + $0x2f0] sm:$0xff]  ;;  %v255_v44 = vld [vmem:[#allocation4 + $0x318] sm:$0xff]  ;;  %v7456_v54 = vpack.c.bf16 %v256_v23, %v252_v19  ;;  %v7459_v56 = vpack.c.bf16 %v265_v34, %v261_v28 }
  0x49   :  { %4912 = vmatpush1.bf16.msra.mxu1 %v7414_v5  ;;  %9495 = vst [vmem:[#allocation19_spill] sm:$0xff] %v7453_v38  ;;  %v259_v51 = vld [vmem:[#allocation4 + $0x338] sm:$0xff]  ;;  %v260_v59 = vld [vmem:[#allocation4 + $0x340] sm:$0xff]  ;;  %v269_v3 = vld [vmem:[#allocation4 + $0x388] sm:$0xff]  ;;  %v7462_v0 = vpack.c.bf16 %v250_v40, %v246_v39 }
  0x4a   :  { %4914 = vmatprep.subr.bf16.mxu1 %v7417_v11  ;;  %9496 = vst [vmem:[#allocation20_spill] sm:$0xff] %v7456_v54  ;;  %9497 = vst [vmem:[#allocation21_spill] sm:$0xff] %v7459_v56  ;;  %v264_v2 = vld [vmem:[#allocation4 + $0x360] sm:$0xff]  ;;  %v273_v6 = vld [vmem:[#allocation4 + $0x3a8] sm:$0xff]  ;;  %v7465_v12 = vpack.c.bf16 %v259_v51, %v255_v44 }
  0x4b   :  { %4852 = vmatpush1.bf16.msra.mxu0 %v7408_v60  ;;  %9498 = vst [vmem:[#allocation22_spill] sm:$0xff] %v7462_v0  ;;  %v263_v19 = vld [vmem:[#allocation4 + $0x358] sm:$0xff]  ;;  %v7468_v28 = vpack.c.bf16 %v264_v2, %v260_v59  ;;  %v7471_v34 = vpack.c.bf16 %v273_v6, %v269_v3  ;;  %v272_v39 = vld [vmem:[#allocation4 + $0x3a0] sm:$0xff]  ;;  %v277_v40 = vld [vmem:[#allocation4 + $0x3c8] sm:$0xff] }
  0x4c   :  { %4854 = vmatprep.subr.bf16.mxu0 %v7411_v61  ;;  %9499 = vst [vmem:[#allocation23_spill] sm:$0xff] %v7465_v12  ;;  %v267_v23 = vld [vmem:[#allocation4 + $0x378] sm:$0xff]  ;;  %v281_v44 = vld [vmem:[#allocation4 + $0x3e8] sm:$0xff] }
  0x4d   :  { %4916 = vmatpush1.bf16.msra.mxu1 %v7426_v31  ;;  %9500 = vst [vmem:[#allocation24_spill] sm:$0xff] %v7468_v28  ;;  %9501 = vst [vmem:[#allocation25_spill] sm:$0xff] %v7471_v34  ;;  %v7477_v51 = vpack.c.bf16 %v267_v23, %v263_v19  ;;  %v271_v59 = vld [vmem:[#allocation4 + $0x398] sm:$0xff]  ;;  %v7483_v6 = vpack.c.bf16 %v281_v44, %v277_v40  ;;  %v270_v23 = vld [vmem:[#allocation4 + $0x390] sm:$0xff] }
  0x4e   :  { %4918 = vmatprep.subr.bf16.mxu1 %v7429_v36  ;;  %v275_v2 = vld [vmem:[#allocation4 + $0x3b8] sm:$0xff]  ;;  %v282_v40 = vld [vmem:[#allocation4 + $0x3f0] sm:$0xff] }
  0x4f   :  { %4856 = vmatpush1.bf16.msra.mxu0 %v7420_v20  ;;  %9503 = vst [vmem:[#allocation27_spill] sm:$0xff] %v7477_v51  ;;  %9505 = vst [vmem:[#allocation29_spill] sm:$0xff] %v7483_v6  ;;  %v7489_v19 = vpack.c.bf16 %v275_v2, %v271_v59  ;;  %v155_v44 = vld [vmem:[%s9326_s0] sm:$0x3] }
  0x50   :  { %4858 = vmatprep.subr.bf16.mxu0 %v7423_v21  ;;  %v9515_v59 = vld [vmem:[#allocation18_spill] sm:$0xff]  ;;  %v9516_v2 = vld [vmem:[#allocation19_spill] sm:$0xff] }
  0x51   :  { %4920 = vmatpush1.bf16.msra.mxu1 %v7438_v57  ;;  %9507 = vst [vmem:[#allocation31_spill] sm:$0xff] %v7489_v19 }
  0x52   :  { %4922 = vmatprep.subr.bf16.mxu1 %v7441_v63  ;;  %v254_v63 = vld [vmem:[#allocation4 + $0x310] sm:$0xff] }
  0x53   :  { %4860 = vmatpush1.bf16.msra.mxu0 %v7432_v47 }
  0x54   :  { %4862 = vmatprep.subr.bf16.mxu0 %v7435_v49 }
  0x55   :  { %4924 = vmatpush1.bf16.msra.mxu1 %v7450_v29  ;;  %v268_v29 = vld [vmem:[#allocation4 + $0x380] sm:$0xff] }
  0x56   :  { %4926 = vmatprep.subr.bf16.mxu1 %v7453_v38  ;;  %v7480_v3 = vpack.c.bf16 %v272_v39, %v268_v29 }
  0x57   :  { %4864 = vmatpush1.bf16.msra.mxu0 %v7444_v13  ;;  %v258_v13 = vld [vmem:[#allocation4 + $0x330] sm:$0xff] }
  0x58   :  { %4866 = vmatprep.subr.bf16.mxu0 %v7447_v16  ;;  %v7474_v38 = vpack.c.bf16 %v258_v13, %v254_v63  ;;  %v262_v16 = vld [vmem:[#allocation4 + $0x350] sm:$0xff]  ;;  %9504 = vst [vmem:[#allocation28_spill] sm:$0xff] %v7480_v3  ;;  %v280_v63 = vld [vmem:[#allocation4 + $0x3e0] sm:$0xff] }
  0x59   :  { %4928 = vmatpush1.bf16.msra.mxu1 %v7462_v0  ;;  %v276_v0 = vld [vmem:[#allocation4 + $0x3c0] sm:$0xff] }
  0x5a   :  { %9502 = vst [vmem:[#allocation26_spill] sm:$0xff] %v7474_v38  ;;  %4930 = vmatprep.subr.bf16.mxu1 %v7465_v12  ;;  %v274_v12 = vld [vmem:[#allocation4 + $0x3b0] sm:$0xff]  ;;  %v7492_v29 = vpack.c.bf16 %v280_v63, %v276_v0  ;;  %v9517_v63 = vld [vmem:[#allocation20_spill] sm:$0xff] }
  0x5b   :  { %4868 = vmatpush1.bf16.msra.mxu0 %v7456_v54  ;;  %v266_v54 = vld [vmem:[#allocation4 + $0x370] sm:$0xff]  ;;  %v7496_v39 = vpack.c.bf16 %v274_v12, %v270_v23  ;;  %v9513_v12 = vld [vmem:[#allocation16_spill] sm:$0xff]  ;;  %v9518_v23 = vld [vmem:[#allocation21_spill] sm:$0xff] }
  0x5c   :  { %4870 = vmatprep.subr.bf16.mxu0 %v7459_v56  ;;  %v7486_v13 = vpack.c.bf16 %v266_v54, %v262_v16  ;;  %v279_v56 = vld [vmem:[#allocation4 + $0x3d8] sm:$0xff]  ;;  %9508 = vst [vmem:[#allocation32_spill] sm:$0xff] %v7492_v29  ;;  %v278_v54 = vld [vmem:[#allocation4 + $0x3d0] sm:$0xff] }
  0x5d   :  { %4932 = vmatpush1.bf16.msra.mxu1 %v7474_v38  ;;  %9509 = vst [vmem:[#allocation33_spill] sm:$0xff] %v7496_v39  ;;  %v7506_v0 = vpack.c.bf16 %v282_v40, %v278_v54  ;;  %v9519_v54 = vld [vmem:[#allocation22_spill] sm:$0xff]  ;;  %v9520_v40 = vld [vmem:[#allocation23_spill] sm:$0xff] }
  0x5e   :  { %9506 = vst [vmem:[#allocation30_spill] sm:$0xff] %v7486_v13  ;;  %4934 = vmatprep.subr.bf16.mxu1 %v7477_v51 }
  0x5f   :  { %4872 = vmatpush1.bf16.msra.mxu0 %v7468_v28  ;;  %v283_v28 = vld [vmem:[#allocation4 + $0x3f8] sm:$0xff]  ;;  %9511 = vst [vmem:[#allocation35_spill] sm:$0xff] %v7506_v0 }
  0x60   :  { %4874 = vmatprep.subr.bf16.mxu0 %v7471_v34  ;;  %v7499_v16 = vpack.c.bf16 %v283_v28, %v279_v56  ;;  %v9512_v56 = vld [vmem:[#allocation15_spill] sm:$0xff]  ;;  %v9514_v28 = vld [vmem:[#allocation17_spill] sm:$0xff] }
  0x61   :  { %4936 = vmatpush1.bf16.msra.mxu1 %v7486_v13 }
  0x62   :  { %4938 = vmatprep.subr.bf16.mxu1 %v7489_v19  ;;  %9510 = vst [vmem:[#allocation34_spill] sm:$0xff] %v7499_v16 }
  0x63   :  { %4876 = vmatpush1.bf16.msra.mxu0 %v7480_v3 }
  0x64   :  { %4878 = vmatprep.subr.bf16.mxu0 %v7483_v6 }
  0x65   :  { %4940 = vmatpush1.bf16.msra.mxu1 %v7496_v39 }
  0x66   :  { %4942 = vmatprep.subr.bf16.mxu1 %v7499_v16 }
  0x67   :  { %4880 = vmatpush1.bf16.msra.mxu0 %v7492_v29 }
  0x68   :  { %4946 = vmatprep.subr.bf16.mxu0 %v7315_v4 }
  0x69   :  { %4944 = vmatpush1.bf16.msra.mxu1 %v7506_v0 }
  0x6a   :  { %349 = vmatmul.mubr.f32.vlgmr.msra.gmra.mrb[0].mxu0 %v155_v44  ;;  %5010 = vmatprep.subr.bf16.mxu1 %v7328_v22 }
  0x6b   :  { %4948 = vmatpush1.bf16.msra.mxu0 %v7317_v8 }
  0x6c   :  { %4950 = vmatprep.subr.bf16.mxu0 %v7319_v9  ;;  %420 = vmatmul.mubr.f32.vlgmr.msra.gmra.mrb[0].mxu1 %v155_v44  ;;  %v9521_v44 = vld [vmem:[#allocation24_spill] sm:$0xff] }
  0x6d   :  { %5012 = vmatpush1.bf16.msra.mxu1 %v7330_v25 }
  0x6e   :  { %5014 = vmatprep.subr.bf16.mxu1 %v7340_v33 }
  0x6f   :  { %4952 = vmatpush1.bf16.msra.mxu0 %v7323_v14 }
  0x70   :  { %4954 = vmatprep.subr.bf16.mxu0 %v7326_v17 }
  0x71   :  { %5016 = vmatpush1.bf16.msra.mxu1 %v7342_v37 }
  0x72   :  { %5018 = vmatprep.subr.bf16.mxu1 %v7348_v45 }
  0x73   :  { %4956 = vmatpush1.bf16.msra.mxu0 %v7333_v26 }
  0x74   :  { %4958 = vmatprep.subr.bf16.mxu0 %v7337_v30 }
  0x75   :  { %5020 = vmatpush1.bf16.msra.mxu1 %v7354_v48 }
  0x76   :  { %5022 = vmatprep.subr.bf16.mxu1 %v7357_v52 }
  0x77   :  { %4960 = vmatpush1.bf16.msra.mxu0 %v7346_v42 }
  0x78   :  { %4962 = vmatprep.subr.bf16.mxu0 %v7351_v46 }
  0x79   :  { %5024 = vmatpush1.bf16.msra.mxu1 %v7366_v62 }
  0x7a   :  { %5026 = vmatprep.subr.bf16.mxu1 %v7369_v1 }
  0x7b   :  { %4964 = vmatpush1.bf16.msra.mxu0 %v7360_v55 }
  0x7c   :  { %4966 = vmatprep.subr.bf16.mxu0 %v7363_v58 }
  0x7d   :  { %5028 = vmatpush1.bf16.msra.mxu1 %v7378_v15 }
  0x7e   :  { %5030 = vmatprep.subr.bf16.mxu1 %v7381_v18 }
  0x7f   :  { %4968 = vmatpush1.bf16.msra.mxu0 %v7372_v7 }
  0x80   :  { %4970 = vmatprep.subr.bf16.mxu0 %v7375_v10 }
  0x81   :  { %5032 = vmatpush1.bf16.msra.mxu1 %v7390_v32 }
  0x82   :  { %5034 = vmatprep.subr.bf16.mxu1 %v7393_v35 }
  0x83   :  { %4972 = vmatpush1.bf16.msra.mxu0 %v7384_v24 }
  0x84   :  { %4974 = vmatprep.subr.bf16.mxu0 %v7387_v27 }
  0x85   :  { %5036 = vmatpush1.bf16.msra.mxu1 %v7402_v50 }
  0x86   :  { %5038 = vmatprep.subr.bf16.mxu1 %v7405_v53 }
  0x87   :  { %4976 = vmatpush1.bf16.msra.mxu0 %v7396_v41 }
  0x88   :  { %4978 = vmatprep.subr.bf16.mxu0 %v7399_v43 }
  0x89   :  { %5040 = vmatpush1.bf16.msra.mxu1 %v7414_v5 }
  0x8a   :  { %5042 = vmatprep.subr.bf16.mxu1 %v7417_v11 }
  0x8b   :  { %4980 = vmatpush1.bf16.msra.mxu0 %v7408_v60 }
  0x8c   :  { %4982 = vmatprep.subr.bf16.mxu0 %v7411_v61 }
  0x8d   :  { %5044 = vmatpush1.bf16.msra.mxu1 %v7426_v31 }
  0x8e   :  { %5046 = vmatprep.subr.bf16.mxu1 %v7429_v36 }
  0x8f   :  { %4984 = vmatpush1.bf16.msra.mxu0 %v7420_v20 }
  0x90   :  { %4986 = vmatprep.subr.bf16.mxu0 %v7423_v21 }
  0x91   :  { %5048 = vmatpush1.bf16.msra.mxu1 %v7438_v57 }
  0x92   :  { %5050 = vmatprep.subr.bf16.mxu1 %v9512_v56 }
  0x93   :  { %4988 = vmatpush1.bf16.msra.mxu0 %v7432_v47 }
  0x94   :  { %4990 = vmatprep.subr.bf16.mxu0 %v7435_v49 }
  0x95   :  { %5052 = vmatpush1.bf16.msra.mxu1 %v9515_v59 }
  0x96   :  { %5054 = vmatprep.subr.bf16.mxu1 %v9516_v2 }
  0x97   :  { %4992 = vmatpush1.bf16.msra.mxu0 %v9513_v12 }
  0x98   :  { %4994 = vmatprep.subr.bf16.mxu0 %v9514_v28 }
  0x99   :  { %5056 = vmatpush1.bf16.msra.mxu1 %v9519_v54 }
  0x9a   :  { %5058 = vmatprep.subr.bf16.mxu1 %v9520_v40 }
  0x9b   :  { %4996 = vmatpush1.bf16.msra.mxu0 %v9517_v63 }
  0x9c   :  { %4998 = vmatprep.subr.bf16.mxu0 %v9518_v23 }
  0x9d   :  { %5060 = vmatpush1.bf16.msra.mxu1 %v7474_v38 }
  0x9e   :  { %5062 = vmatprep.subr.bf16.mxu1 %v7477_v51 }
  0x9f   :  { %5000 = vmatpush1.bf16.msra.mxu0 %v9521_v44 }
  0xa0   :  { %5002 = vmatprep.subr.bf16.mxu0 %v7471_v34  ;;  %v64_v34 = vlaneseq }
  0xa1   :  { %5064 = vmatpush1.bf16.msra.mxu1 %v7486_v13 }
  0xa2   :  { %5066 = vmatprep.subr.bf16.mxu1 %v7489_v19  ;;  %v62_v19 = vld [vmem:[%s9328_s2] sm:$0xf] }
  0xa3   :  { %5004 = vmatpush1.bf16.msra.mxu0 %v7480_v3  ;;  %v7576_v3 = vshrl.u32 %v64_v34, 7 }
  0xa4   :  { %5006 = vmatprep.subr.bf16.mxu0 %v7483_v6 }
  0xa5   :  { %5068 = vmatpush1.bf16.msra.mxu1 %v7496_v39  ;;  %9522 = vst [vmem:[#allocation15_spill] sm:$0xff] %v7576_v3  ;;  %v9382_v6 = vsub.s32 0, %v7576_v3 }
  0xa6   :  { %5070 = vmatprep.subr.bf16.mxu1 %v7499_v16 }
  0xa7   :  { %5008 = vmatpush1.bf16.msra.mxu0 %v7492_v29  ;;  %v9385_v29 = vsub.s32 1, %v7576_v3 }
  0xa8   :  { %5074 = vmatprep.subr.bf16.mxu0 %v7315_v4  ;;  %v7585_v4 = vrot.slane %v62_v19, %v9382_v6  ;;  %v9395_v6 = vsub.s32 2, %v7576_v3 }
  0xa9   :  { %5072 = vmatpush1.bf16.msra.mxu1 %v7506_v0  ;;  %v7589_v0 = vrot.slane %v62_v19, %v9385_v29 }
  0xaa   :  { %5138 = vmatprep.subr.bf16.mxu1 %v7328_v22  ;;  %9523 = vst [vmem:[#allocation18_spill] sm:$0xff] %v7585_v4  ;;  %v9388_v22 = vsub.s32 3, %v7576_v3 }
  0xab   :  { %9524 = vst [vmem:[#allocation19_spill] sm:$0xff] %v7589_v0 }
  0xac   :  { %v7596_v51 = vrot.slane %v62_v19, %v9388_v22 }
  0xae   :  { %9525 = vst [vmem:[#allocation36_spill] sm:$0xff] %v7596_v51 }
 0x13d   :  { %v350_v34 = vpop.f32.mrb[0].mxu0 }
 0x13e   :  { %v351_v16 = vadd.f32 %v350_v34, %v7585_v4  ;;  %v352_v39 = vpop.f32.mrb[1].mxu0  ;;  %v7602_v34 = vrot.slane %v62_v19, %v9395_v6  ;;  %v9542_v6 = vld [vmem:[#allocation32_spill] sm:$0xff] }
 0x13f   :  { %v353_v13 = vadd.f32 %v352_v39, %v7589_v0  ;;  %v421_v38 = vpop.f32.mrb[0].mxu1 }
 0x140   :  { %v4626_v44 = vmul.f32 -1.442695, %v351_v16  ;;  %v423_v29 = vpop.f32.mrb[1].mxu1  ;;  %9526 = vst [vmem:[#allocation37_spill] sm:$0xff] %v7602_v34  ;;  %v422_v39 = vadd.f32 %v421_v38, %v7602_v34 }
 0x141   :  { %v4627_v23 = vmul.f32 -1.442695, %v353_v13  ;;  %v424_v63 = vadd.f32 %v423_v29, %v7596_v51 }
 0x142   :  { %6901 = vpow2.f32 %v4626_v44 }
 0x143   :  { %6903 = vpow2.f32 %v4627_v23  ;;  %v4628_v4 = vmul.f32 -1.442695, %v424_v63 }
 0x145   :  { %6905 = vpow2.f32 %v4628_v4 }
 0x146   :  { %6907 = vtanh.f32 %v422_v39  ;;  %v9533_v39 = vld [vmem:[#allocation27_spill] sm:$0xff] }
 0x14c   :  { %v6902_v16 = vpop.eup %6901 }
 0x14d   :  { %v6904_v22 = vpop.eup %6903  ;;  %v429_v0 = vadd.f32 1.0, %v6902_v16  ;;  %v9534_v16 = vld [vmem:[#allocation24_spill] sm:$0xff] }
 0x14e   :  { %v435_v13 = vadd.f32 1.0, %v6904_v22  ;;  %v4629_v22 = vld [vmem:[%s9326_s0 + $0x2] sm:$0x3] }
 0x14f   :  { %6909 = vrcp.f32 %v429_v0  ;;  %v6906_v44 = vpop.eup %6905  ;;  %v9530_v0 = vld [vmem:[#allocation20_spill] sm:$0xff] }
 0x150   :  { %6911 = vrcp.f32 %v435_v13  ;;  %v6908_v23 = vpop.eup %6907  ;;  %v442_v28 = vadd.f32 1.0, %v6906_v44  ;;  %v9535_v13 = vld [vmem:[#allocation30_spill] sm:$0xff]  ;;  %v9536_v44 = vld [vmem:[#allocation25_spill] sm:$0xff] }
 0x152   :  { %6913 = vrcp.f32 %v442_v28  ;;  %v9531_v28 = vld [vmem:[#allocation26_spill] sm:$0xff] }
 0x159   :  { %v6910_v40 = vpop.eup %6909 }
 0x15a   :  { %v6912_v29 = vpop.eup %6911  ;;  %v446_v51 = vmul.f32 %v6910_v40, %v6908_v23  ;;  %v9532_v40 = vld [vmem:[#allocation21_spill] sm:$0xff]  ;;  %v9537_v23 = vld [vmem:[#allocation31_spill] sm:$0xff] }
 0x15b   :  { %v445_v3 = vmul.f32 0.0, %v6912_v29  ;;  %v9538_v29 = vld [vmem:[#allocation28_spill] sm:$0xff] }
 0x15c   :  { %v6914_v38 = vpop.eup %6913 }
 0x15d   :  { %v7605_v19 = vadd.f32 %v446_v51, %v445_v3  ;;  %v9528_v51 = vld [vmem:[#allocation17_spill] sm:$0xff]  ;;  %v9529_v3 = vld [vmem:[#allocation23_spill] sm:$0xff] }
 0x15f   :  { %6915 = vtanh.f32 %v7605_v19 }
 0x169   :  { %v6916_v4 = vpop.eup %6915 }
 0x16a   :  { %v7608_v63 = vmul.f32 %v6916_v4, %v6914_v38  ;;  %v9539_v38 = vld [vmem:[#allocation33_spill] sm:$0xff] }
 0x16b   :  { %v9540_v4 = vld [vmem:[#allocation29_spill] sm:$0xff] }
 0x16c   :  { %9527 = vst [vmem:[#allocation38_spill] sm:$0xff] %v7608_v63  ;;  %516 = vmatprep.mubr.f32.mxu0 %v7608_v63  ;;  %587 = vmatprep.mubr.f32.mxu1 %v7608_v63  ;;  %v9543_v63 = vld [vmem:[#allocation35_spill] sm:$0xff] }
 0x16d   :  { %517 = vmatmul.mubr.f32.vlgmr.msra.gmra.mrb[2].mxu0 %v4629_v22  ;;  %588 = vmatmul.mubr.f32.vlgmr.msra.gmra.mrb[2].mxu1 %v4629_v22  ;;  %v9541_v22 = vld [vmem:[#allocation34_spill] sm:$0xff] }
 0x16e   :  { %5076 = vmatpush1.bf16.msra.mxu0 %v7317_v8  ;;  %5140 = vmatpush1.bf16.msra.mxu1 %v7330_v25 }
 0x16f   :  { %5078 = vmatprep.subr.bf16.mxu0 %v7319_v9  ;;  %5142 = vmatprep.subr.bf16.mxu1 %v7340_v33 }
 0x172   :  { %5080 = vmatpush1.bf16.msra.mxu0 %v7323_v14  ;;  %5144 = vmatpush1.bf16.msra.mxu1 %v7342_v37 }
 0x173   :  { %5082 = vmatprep.subr.bf16.mxu0 %v7326_v17  ;;  %5146 = vmatprep.subr.bf16.mxu1 %v7348_v45 }
 0x176   :  { %5084 = vmatpush1.bf16.msra.mxu0 %v7333_v26  ;;  %5148 = vmatpush1.bf16.msra.mxu1 %v7354_v48 }
 0x177   :  { %5086 = vmatprep.subr.bf16.mxu0 %v7337_v30  ;;  %5150 = vmatprep.subr.bf16.mxu1 %v7357_v52 }
 0x17a   :  { %5088 = vmatpush1.bf16.msra.mxu0 %v7346_v42  ;;  %5152 = vmatpush1.bf16.msra.mxu1 %v7366_v62 }
 0x17b   :  { %5090 = vmatprep.subr.bf16.mxu0 %v7351_v46  ;;  %5154 = vmatprep.subr.bf16.mxu1 %v7369_v1 }
 0x17e   :  { %5092 = vmatpush1.bf16.msra.mxu0 %v7360_v55  ;;  %5156 = vmatpush1.bf16.msra.mxu1 %v7378_v15 }
 0x17f   :  { %5094 = vmatprep.subr.bf16.mxu0 %v7363_v58  ;;  %5158 = vmatprep.subr.bf16.mxu1 %v7381_v18 }
 0x182   :  { %5096 = vmatpush1.bf16.msra.mxu0 %v7372_v7  ;;  %5160 = vmatpush1.bf16.msra.mxu1 %v7390_v32 }
 0x183   :  { %5098 = vmatprep.subr.bf16.mxu0 %v7375_v10  ;;  %5162 = vmatprep.subr.bf16.mxu1 %v7393_v35 }
 0x186   :  { %5100 = vmatpush1.bf16.msra.mxu0 %v7384_v24  ;;  %5164 = vmatpush1.bf16.msra.mxu1 %v7402_v50 }
 0x187   :  { %5102 = vmatprep.subr.bf16.mxu0 %v7387_v27  ;;  %5166 = vmatprep.subr.bf16.mxu1 %v7405_v53 }
 0x18a   :  { %5104 = vmatpush1.bf16.msra.mxu0 %v7396_v41  ;;  %5168 = vmatpush1.bf16.msra.mxu1 %v7414_v5 }
 0x18b   :  { %5106 = vmatprep.subr.bf16.mxu0 %v7399_v43  ;;  %5170 = vmatprep.subr.bf16.mxu1 %v7417_v11 }
 0x18e   :  { %5108 = vmatpush1.bf16.msra.mxu0 %v7408_v60  ;;  %5172 = vmatpush1.bf16.msra.mxu1 %v7426_v31 }
 0x18f   :  { %5110 = vmatprep.subr.bf16.mxu0 %v7411_v61  ;;  %5174 = vmatprep.subr.bf16.mxu1 %v7429_v36 }
 0x192   :  { %5112 = vmatpush1.bf16.msra.mxu0 %v7420_v20  ;;  %5176 = vmatpush1.bf16.msra.mxu1 %v7438_v57 }
 0x193   :  { %5114 = vmatprep.subr.bf16.mxu0 %v7423_v21  ;;  %5178 = vmatprep.subr.bf16.mxu1 %v9512_v56 }
 0x196   :  { %5116 = vmatpush1.bf16.msra.mxu0 %v7432_v47  ;;  %5180 = vmatpush1.bf16.msra.mxu1 %v9515_v59 }
 0x197   :  { %5118 = vmatprep.subr.bf16.mxu0 %v7435_v49  ;;  %5182 = vmatprep.subr.bf16.mxu1 %v9516_v2 }
 0x19a   :  { %5120 = vmatpush1.bf16.msra.mxu0 %v9513_v12  ;;  %5184 = vmatpush1.bf16.msra.mxu1 %v9519_v54 }
 0x19b   :  { %5122 = vmatprep.subr.bf16.mxu0 %v9528_v51  ;;  %5186 = vmatprep.subr.bf16.mxu1 %v9529_v3 }
 0x19e   :  { %5124 = vmatpush1.bf16.msra.mxu0 %v9530_v0  ;;  %5188 = vmatpush1.bf16.msra.mxu1 %v9531_v28  ;;  %v9547_v0 = vld [vmem:[#allocation19_spill] sm:$0xff] }
 0x19f   :  { %5126 = vmatprep.subr.bf16.mxu0 %v9532_v40  ;;  %5190 = vmatprep.subr.bf16.mxu1 %v9533_v39  ;;  %v9544_v39 = vld [vmem:[#allocation13_spill] sm:$0xff]  ;;  %v9546_v40 = vld [vmem:[#allocation18_spill] sm:$0xff] }
 0x1a2   :  { %5128 = vmatpush1.bf16.msra.mxu0 %v9534_v16  ;;  %5192 = vmatpush1.bf16.msra.mxu1 %v9535_v13  ;;  %v9545_v16 = vld [vmem:[#allocation14_spill] sm:$0xff] }
 0x1a3   :  { %5130 = vmatprep.subr.bf16.mxu0 %v9536_v44  ;;  %5194 = vmatprep.subr.bf16.mxu1 %v9537_v23 }
 0x1a6   :  { %5132 = vmatpush1.bf16.msra.mxu0 %v9538_v29  ;;  %5196 = vmatpush1.bf16.msra.mxu1 %v9539_v38 }
 0x1a7   :  { %5134 = vmatprep.subr.bf16.mxu0 %v9540_v4  ;;  %5198 = vmatprep.subr.bf16.mxu1 %v9541_v22  ;;  %v9548_v22 = vld [vmem:[#allocation36_spill] sm:$0xff] }
 0x1aa   :  { %5136 = vmatpush1.bf16.msra.mxu0 %v9542_v6  ;;  %5200 = vmatpush1.bf16.msra.mxu1 %v9543_v63 }
 0x1ab   :  { %5202 = vmatprep.subr.bf16.mxu0 %v9544_v39  ;;  %5266 = vmatprep.subr.bf16.mxu1 %v9545_v16 }
 0x240   :  { %v518_v13 = vpop.f32.mrb[2].mxu0  ;;  %v589_v44 = vpop.f32.mrb[2].mxu1 }
 0x241   :  { %v519_v23 = vadd.f32 %v518_v13, %v9546_v40  ;;  %v520_v28 = vpop.f32.mrb[3].mxu0  ;;  %v591_v29 = vpop.f32.mrb[3].mxu1  ;;  %v590_v63 = vadd.f32 %v589_v44, %v7602_v34  ;;  %v9555_v44 = vld [vmem:[#allocation26_spill] sm:$0xff] }
 0x242   :  { %v521_v38 = vadd.f32 %v520_v28, %v9547_v0  ;;  %v592_v6 = vadd.f32 %v591_v29, %v9548_v22 }
 0x243   :  { %v4630_v3 = vmul.f32 -1.442695, %v519_v23 }
 0x244   :  { %v4631_v4 = vmul.f32 -1.442695, %v521_v38  ;;  %v4632_v51 = vmul.f32 -1.442695, %v592_v6 }
 0x245   :  { %6917 = vpow2.f32 %v4630_v3 }
 0x246   :  { %6919 = vpow2.f32 %v4631_v4 }
 0x247   :  { %6921 = vpow2.f32 %v4632_v51 }
 0x248   :  { %6923 = vtanh.f32 %v590_v63  ;;  %v9552_v63 = vld [vmem:[#allocation17_spill] sm:$0xff] }
 0x24f   :  { %v6918_v39 = vpop.eup %6917 }
 0x250   :  { %v6920_v16 = vpop.eup %6919  ;;  %v597_v54 = vadd.f32 1.0, %v6918_v39 }
 0x251   :  { %v603_v12 = vadd.f32 1.0, %v6920_v16  ;;  %v6922_v13 = vpop.eup %6921  ;;  %v9554_v16 = vld [vmem:[#allocation20_spill] sm:$0xff] }
 0x252   :  { %6925 = vrcp.f32 %v597_v54  ;;  %v6924_v40 = vpop.eup %6923  ;;  %v610_v23 = vadd.f32 1.0, %v6922_v13  ;;  %v9550_v54 = vld [vmem:[#allocation16_spill] sm:$0xff]  ;;  %v9556_v13 = vld [vmem:[#allocation21_spill] sm:$0xff] }
 0x253   :  { %6927 = vrcp.f32 %v603_v12  ;;  %v4633_v12 = vld [vmem:[%s9326_s0 + $0x4] sm:$0x3] }
 0x254   :  { %6929 = vrcp.f32 %v610_v23  ;;  %v9558_v23 = vld [vmem:[#allocation24_spill] sm:$0xff] }
 0x25c   :  { %v6926_v28 = vpop.eup %6925 }
 0x25d   :  { %v6928_v38 = vpop.eup %6927  ;;  %v614_v3 = vmul.f32 %v6926_v28, %v6924_v40  ;;  %v9553_v40 = vld [vmem:[#allocation23_spill] sm:$0xff] }
 0x25e   :  { %v613_v4 = vmul.f32 %v6928_v38, %v7605_v19  ;;  %v6930_v6 = vpop.eup %6929  ;;  %v9551_v19 = vld [vmem:[#allocation22_spill] sm:$0xff]  ;;  %v9557_v28 = vld [vmem:[#allocation27_spill] sm:$0xff] }
 0x25f   :  { %v9559_v38 = vld [vmem:[#allocation30_spill] sm:$0xff] }
 0x260   :  { %v7684_v29 = vadd.f32 %v614_v3, %v613_v4  ;;  %v9560_v3 = vld [vmem:[#allocation25_spill] sm:$0xff]  ;;  %v9561_v4 = vld [vmem:[#allocation31_spill] sm:$0xff] }
 0x262   :  { %6931 = vtanh.f32 %v7684_v29 }
 0x26c   :  { %v6932_v51 = vpop.eup %6931 }
 0x26d   :  { %v7687_v39 = vmul.f32 %v6932_v51, %v6930_v6  ;;  %v9562_v6 = vld [vmem:[#allocation28_spill] sm:$0xff]  ;;  %v9563_v51 = vld [vmem:[#allocation33_spill] sm:$0xff] }
 0x26f   :  { %9549 = vst [vmem:[#allocation39_spill] sm:$0xff] %v7687_v39  ;;  %684 = vmatprep.mubr.f32.mxu0 %v7687_v39  ;;  %755 = vmatprep.mubr.f32.mxu1 %v7687_v39  ;;  %v9565_v39 = vld [vmem:[#allocation34_spill] sm:$0xff] }
 0x270   :  { %685 = vmatmul.mubr.f32.vlgmr.msra.gmra.mrb[4].mxu0 %v4633_v12  ;;  %756 = vmatmul.mubr.f32.vlgmr.msra.gmra.mrb[4].mxu1 %v4633_v12  ;;  %v9564_v12 = vld [vmem:[#allocation29_spill] sm:$0xff] }
 0x271   :  { %5204 = vmatpush1.bf16.msra.mxu0 %v7317_v8  ;;  %5268 = vmatpush1.bf16.msra.mxu1 %v7330_v25 }
 0x272   :  { %5206 = vmatprep.subr.bf16.mxu0 %v7319_v9  ;;  %5270 = vmatprep.subr.bf16.mxu1 %v7340_v33 }
 0x275   :  { %5208 = vmatpush1.bf16.msra.mxu0 %v7323_v14  ;;  %5272 = vmatpush1.bf16.msra.mxu1 %v7342_v37 }
 0x276   :  { %5210 = vmatprep.subr.bf16.mxu0 %v7326_v17  ;;  %5274 = vmatprep.subr.bf16.mxu1 %v7348_v45 }
 0x279   :  { %5212 = vmatpush1.bf16.msra.mxu0 %v7333_v26  ;;  %5276 = vmatpush1.bf16.msra.mxu1 %v7354_v48 }
 0x27a   :  { %5214 = vmatprep.subr.bf16.mxu0 %v7337_v30  ;;  %5278 = vmatprep.subr.bf16.mxu1 %v7357_v52 }
 0x27d   :  { %5216 = vmatpush1.bf16.msra.mxu0 %v7346_v42  ;;  %5280 = vmatpush1.bf16.msra.mxu1 %v7366_v62 }
 0x27e   :  { %5218 = vmatprep.subr.bf16.mxu0 %v7351_v46  ;;  %5282 = vmatprep.subr.bf16.mxu1 %v7369_v1 }
 0x281   :  { %5220 = vmatpush1.bf16.msra.mxu0 %v7360_v55  ;;  %5284 = vmatpush1.bf16.msra.mxu1 %v7378_v15 }
 0x282   :  { %5222 = vmatprep.subr.bf16.mxu0 %v7363_v58  ;;  %5286 = vmatprep.subr.bf16.mxu1 %v7381_v18 }
 0x285   :  { %5224 = vmatpush1.bf16.msra.mxu0 %v7372_v7  ;;  %5288 = vmatpush1.bf16.msra.mxu1 %v7390_v32 }
 0x286   :  { %5226 = vmatprep.subr.bf16.mxu0 %v7375_v10  ;;  %5290 = vmatprep.subr.bf16.mxu1 %v7393_v35 }
 0x289   :  { %5228 = vmatpush1.bf16.msra.mxu0 %v7384_v24  ;;  %5292 = vmatpush1.bf16.msra.mxu1 %v7402_v50 }
 0x28a   :  { %5230 = vmatprep.subr.bf16.mxu0 %v7387_v27  ;;  %5294 = vmatprep.subr.bf16.mxu1 %v7405_v53 }
 0x28d   :  { %5232 = vmatpush1.bf16.msra.mxu0 %v7396_v41  ;;  %5296 = vmatpush1.bf16.msra.mxu1 %v7414_v5 }
 0x28e   :  { %5234 = vmatprep.subr.bf16.mxu0 %v7399_v43  ;;  %5298 = vmatprep.subr.bf16.mxu1 %v7417_v11 }
 0x291   :  { %5236 = vmatpush1.bf16.msra.mxu0 %v7408_v60  ;;  %5300 = vmatpush1.bf16.msra.mxu1 %v7426_v31 }
 0x292   :  { %5238 = vmatprep.subr.bf16.mxu0 %v7411_v61  ;;  %5302 = vmatprep.subr.bf16.mxu1 %v7429_v36 }
 0x295   :  { %5240 = vmatpush1.bf16.msra.mxu0 %v7420_v20  ;;  %5304 = vmatpush1.bf16.msra.mxu1 %v7438_v57 }
 0x296   :  { %5242 = vmatprep.subr.bf16.mxu0 %v7423_v21  ;;  %5306 = vmatprep.subr.bf16.mxu1 %v9512_v56 }
 0x299   :  { %5244 = vmatpush1.bf16.msra.mxu0 %v7432_v47  ;;  %5308 = vmatpush1.bf16.msra.mxu1 %v9515_v59 }
 0x29a   :  { %5246 = vmatprep.subr.bf16.mxu0 %v7435_v49  ;;  %5310 = vmatprep.subr.bf16.mxu1 %v9516_v2 }
 0x29d   :  { %5248 = vmatpush1.bf16.msra.mxu0 %v9550_v54  ;;  %5312 = vmatpush1.bf16.msra.mxu1 %v9551_v19 }
 0x29e   :  { %5250 = vmatprep.subr.bf16.mxu0 %v9552_v63  ;;  %5314 = vmatprep.subr.bf16.mxu1 %v9553_v40 }
 0x2a1   :  { %5252 = vmatpush1.bf16.msra.mxu0 %v9554_v16  ;;  %5316 = vmatpush1.bf16.msra.mxu1 %v9555_v44  ;;  %v9566_v44 = vld [vmem:[#allocation32_spill] sm:$0xff]  ;;  %v9570_v16 = vld [vmem:[#allocation18_spill] sm:$0xff] }
 0x2a2   :  { %5254 = vmatprep.subr.bf16.mxu0 %v9556_v13  ;;  %5318 = vmatprep.subr.bf16.mxu1 %v9557_v28  ;;  %v9567_v13 = vld [vmem:[#allocation35_spill] sm:$0xff]  ;;  %v9568_v28 = vld [vmem:[#allocation13_spill] sm:$0xff] }
 0x2a5   :  { %5256 = vmatpush1.bf16.msra.mxu0 %v9558_v23  ;;  %5320 = vmatpush1.bf16.msra.mxu1 %v9559_v38  ;;  %v9569_v23 = vld [vmem:[#allocation14_spill] sm:$0xff] }
 0x2a6   :  { %5258 = vmatprep.subr.bf16.mxu0 %v9560_v3  ;;  %5322 = vmatprep.subr.bf16.mxu1 %v9561_v4 }
 0x2a9   :  { %5260 = vmatpush1.bf16.msra.mxu0 %v9562_v6  ;;  %5324 = vmatpush1.bf16.msra.mxu1 %v9563_v51 }
 0x2aa   :  { %5262 = vmatprep.subr.bf16.mxu0 %v9564_v12  ;;  %5326 = vmatprep.subr.bf16.mxu1 %v9565_v39 }
 0x2ad   :  { %5264 = vmatpush1.bf16.msra.mxu0 %v9566_v44  ;;  %5328 = vmatpush1.bf16.msra.mxu1 %v9567_v13 }
 0x2ae   :  { %5330 = vmatprep.subr.bf16.mxu0 %v9568_v28  ;;  %5394 = vmatprep.subr.bf16.mxu1 %v9569_v23 }
 0x343   :  { %v686_v38 = vpop.f32.mrb[4].mxu0  ;;  %v757_v3 = vpop.f32.mrb[4].mxu1 }
 0x344   :  { %v687_v4 = vadd.f32 %v686_v38, %v9570_v16  ;;  %v688_v40 = vpop.f32.mrb[5].mxu0  ;;  %v759_v6 = vpop.f32.mrb[5].mxu1  ;;  %v758_v13 = vadd.f32 %v757_v3, %v7602_v34  ;;  %v9577_v3 = vld [vmem:[#allocation26_spill] sm:$0xff] }
 0x345   :  { %v689_v51 = vadd.f32 %v688_v40, %v9547_v0  ;;  %v760_v44 = vadd.f32 %v759_v6, %v9548_v22 }
 0x346   :  { %v4634_v63 = vmul.f32 -1.442695, %v687_v4 }
 0x347   :  { %v4635_v12 = vmul.f32 -1.442695, %v689_v51  ;;  %v4636_v39 = vmul.f32 -1.442695, %v760_v44 }
 0x348   :  { %6933 = vpow2.f32 %v4634_v63 }
 0x349   :  { %6935 = vpow2.f32 %v4635_v12 }
 0x34a   :  { %6937 = vpow2.f32 %v4636_v39 }
 0x34b   :  { %6939 = vtanh.f32 %v758_v13  ;;  %v9575_v13 = vld [vmem:[#allocation23_spill] sm:$0xff] }
 0x352   :  { %v6934_v28 = vpop.eup %6933 }
 0x353   :  { %v6936_v23 = vpop.eup %6935  ;;  %v765_v19 = vadd.f32 1.0, %v6934_v28 }
 0x354   :  { %v771_v54 = vadd.f32 1.0, %v6936_v23  ;;  %v6938_v38 = vpop.eup %6937  ;;  %v9576_v23 = vld [vmem:[#allocation20_spill] sm:$0xff] }
 0x355   :  { %6941 = vrcp.f32 %v765_v19  ;;  %v6940_v16 = vpop.eup %6939  ;;  %v778_v4 = vadd.f32 1.0, %v6938_v38  ;;  %v9573_v19 = vld [vmem:[#allocation22_spill] sm:$0xff]  ;;  %v9578_v38 = vld [vmem:[#allocation21_spill] sm:$0xff] }
 0x356   :  { %6943 = vrcp.f32 %v771_v54  ;;  %v4637_v54 = vld [vmem:[%s9326_s0 + $0x6] sm:$0x3] }
 0x357   :  { %6945 = vrcp.f32 %v778_v4  ;;  %v9580_v4 = vld [vmem:[#allocation24_spill] sm:$0xff] }
 0x35f   :  { %v6942_v40 = vpop.eup %6941 }
 0x360   :  { %v6944_v51 = vpop.eup %6943  ;;  %v782_v63 = vmul.f32 %v6942_v40, %v6940_v16  ;;  %v9574_v16 = vld [vmem:[#allocation17_spill] sm:$0xff]  ;;  %v9579_v40 = vld [vmem:[#allocation27_spill] sm:$0xff] }
 0x361   :  { %v781_v12 = vmul.f32 %v6944_v51, %v7684_v29  ;;  %v6946_v39 = vpop.eup %6945  ;;  %v9572_v29 = vld [vmem:[#allocation16_spill] sm:$0xff]  ;;  %v9581_v51 = vld [vmem:[#allocation30_spill] sm:$0xff] }
 0x363   :  { %v7763_v6 = vadd.f32 %v782_v63, %v781_v12  ;;  %v9582_v63 = vld [vmem:[#allocation25_spill] sm:$0xff]  ;;  %v9583_v12 = vld [vmem:[#allocation31_spill] sm:$0xff] }
 0x365   :  { %6947 = vtanh.f32 %v7763_v6 }
 0x36f   :  { %v6948_v44 = vpop.eup %6947 }
 0x370   :  { %v7766_v28 = vmul.f32 %v6948_v44, %v6946_v39  ;;  %v9584_v39 = vld [vmem:[#allocation28_spill] sm:$0xff]  ;;  %v9585_v44 = vld [vmem:[#allocation33_spill] sm:$0xff] }
 0x372   :  { %9571 = vst [vmem:[#allocation40_spill] sm:$0xff] %v7766_v28  ;;  %852 = vmatprep.mubr.f32.mxu0 %v7766_v28  ;;  %923 = vmatprep.mubr.f32.mxu1 %v7766_v28  ;;  %v9587_v28 = vld [vmem:[#allocation34_spill] sm:$0xff] }
 0x373   :  { %853 = vmatmul.mubr.f32.vlgmr.msra.gmra.mrb[6].mxu0 %v4637_v54  ;;  %924 = vmatmul.mubr.f32.vlgmr.msra.gmra.mrb[6].mxu1 %v4637_v54  ;;  %v9586_v54 = vld [vmem:[#allocation29_spill] sm:$0xff] }
 0x374   :  { %5332 = vmatpush1.bf16.msra.mxu0 %v7317_v8  ;;  %5396 = vmatpush1.bf16.msra.mxu1 %v7330_v25 }
 0x375   :  { %5334 = vmatprep.subr.bf16.mxu0 %v7319_v9  ;;  %5398 = vmatprep.subr.bf16.mxu1 %v7340_v33 }
 0x378   :  { %5336 = vmatpush1.bf16.msra.mxu0 %v7323_v14  ;;  %5400 = vmatpush1.bf16.msra.mxu1 %v7342_v37 }
 0x379   :  { %5338 = vmatprep.subr.bf16.mxu0 %v7326_v17  ;;  %5402 = vmatprep.subr.bf16.mxu1 %v7348_v45 }
 0x37c   :  { %5340 = vmatpush1.bf16.msra.mxu0 %v7333_v26  ;;  %5404 = vmatpush1.bf16.msra.mxu1 %v7354_v48 }
 0x37d   :  { %5342 = vmatprep.subr.bf16.mxu0 %v7337_v30  ;;  %5406 = vmatprep.subr.bf16.mxu1 %v7357_v52 }
 0x380   :  { %5344 = vmatpush1.bf16.msra.mxu0 %v7346_v42  ;;  %5408 = vmatpush1.bf16.msra.mxu1 %v7366_v62 }
 0x381   :  { %5346 = vmatprep.subr.bf16.mxu0 %v7351_v46  ;;  %5410 = vmatprep.subr.bf16.mxu1 %v7369_v1 }
 0x384   :  { %5348 = vmatpush1.bf16.msra.mxu0 %v7360_v55  ;;  %5412 = vmatpush1.bf16.msra.mxu1 %v7378_v15 }
 0x385   :  { %5350 = vmatprep.subr.bf16.mxu0 %v7363_v58  ;;  %5414 = vmatprep.subr.bf16.mxu1 %v7381_v18 }
 0x388   :  { %5352 = vmatpush1.bf16.msra.mxu0 %v7372_v7  ;;  %5416 = vmatpush1.bf16.msra.mxu1 %v7390_v32 }
 0x389   :  { %5354 = vmatprep.subr.bf16.mxu0 %v7375_v10  ;;  %5418 = vmatprep.subr.bf16.mxu1 %v7393_v35 }
 0x38c   :  { %5356 = vmatpush1.bf16.msra.mxu0 %v7384_v24  ;;  %5420 = vmatpush1.bf16.msra.mxu1 %v7402_v50 }
 0x38d   :  { %5358 = vmatprep.subr.bf16.mxu0 %v7387_v27  ;;  %5422 = vmatprep.subr.bf16.mxu1 %v7405_v53 }
 0x390   :  { %5360 = vmatpush1.bf16.msra.mxu0 %v7396_v41  ;;  %5424 = vmatpush1.bf16.msra.mxu1 %v7414_v5 }
 0x391   :  { %5362 = vmatprep.subr.bf16.mxu0 %v7399_v43  ;;  %5426 = vmatprep.subr.bf16.mxu1 %v7417_v11 }
 0x394   :  { %5364 = vmatpush1.bf16.msra.mxu0 %v7408_v60  ;;  %5428 = vmatpush1.bf16.msra.mxu1 %v7426_v31 }
 0x395   :  { %5366 = vmatprep.subr.bf16.mxu0 %v7411_v61  ;;  %5430 = vmatprep.subr.bf16.mxu1 %v7429_v36 }
 0x398   :  { %5368 = vmatpush1.bf16.msra.mxu0 %v7420_v20  ;;  %5432 = vmatpush1.bf16.msra.mxu1 %v7438_v57 }
 0x399   :  { %5370 = vmatprep.subr.bf16.mxu0 %v7423_v21  ;;  %5434 = vmatprep.subr.bf16.mxu1 %v9512_v56 }
 0x39c   :  { %5372 = vmatpush1.bf16.msra.mxu0 %v7432_v47  ;;  %5436 = vmatpush1.bf16.msra.mxu1 %v9515_v59 }
 0x39d   :  { %5374 = vmatprep.subr.bf16.mxu0 %v7435_v49  ;;  %5438 = vmatprep.subr.bf16.mxu1 %v9516_v2 }
 0x3a0   :  { %5376 = vmatpush1.bf16.msra.mxu0 %v9572_v29  ;;  %5440 = vmatpush1.bf16.msra.mxu1 %v9573_v19 }
 0x3a1   :  { %5378 = vmatprep.subr.bf16.mxu0 %v9574_v16  ;;  %5442 = vmatprep.subr.bf16.mxu1 %v9575_v13 }
 0x3a4   :  { %5380 = vmatpush1.bf16.msra.mxu0 %v9576_v23  ;;  %5444 = vmatpush1.bf16.msra.mxu1 %v9577_v3  ;;  %v9588_v3 = vld [vmem:[#allocation32_spill] sm:$0xff]  ;;  %v9592_v23 = vld [vmem:[#allocation18_spill] sm:$0xff] }
 0x3a5   :  { %5382 = vmatprep.subr.bf16.mxu0 %v9578_v38  ;;  %5446 = vmatprep.subr.bf16.mxu1 %v9579_v40  ;;  %v9589_v38 = vld [vmem:[#allocation35_spill] sm:$0xff]  ;;  %v9590_v40 = vld [vmem:[#allocation13_spill] sm:$0xff] }
 0x3a8   :  { %5384 = vmatpush1.bf16.msra.mxu0 %v9580_v4  ;;  %5448 = vmatpush1.bf16.msra.mxu1 %v9581_v51  ;;  %v9591_v4 = vld [vmem:[#allocation14_spill] sm:$0xff] }
 0x3a9   :  { %5386 = vmatprep.subr.bf16.mxu0 %v9582_v63  ;;  %5450 = vmatprep.subr.bf16.mxu1 %v9583_v12 }
 0x3ac   :  { %5388 = vmatpush1.bf16.msra.mxu0 %v9584_v39  ;;  %5452 = vmatpush1.bf16.msra.mxu1 %v9585_v44 }
 0x3ad   :  { %5390 = vmatprep.subr.bf16.mxu0 %v9586_v54  ;;  %5454 = vmatprep.subr.bf16.mxu1 %v9587_v28 }
 0x3b0   :  { %5392 = vmatpush1.bf16.msra.mxu0 %v9588_v3  ;;  %5456 = vmatpush1.bf16.msra.mxu1 %v9589_v38 }
 0x3b1   :  { %5458 = vmatprep.subr.bf16.mxu0 %v9590_v40  ;;  %5522 = vmatprep.subr.bf16.mxu1 %v9591_v4 }
 0x446   :  { %v854_v51 = vpop.f32.mrb[6].mxu0  ;;  %v925_v63 = vpop.f32.mrb[6].mxu1 }
 0x447   :  { %v855_v12 = vadd.f32 %v854_v51, %v9592_v23  ;;  %v856_v13 = vpop.f32.mrb[7].mxu0  ;;  %v927_v39 = vpop.f32.mrb[7].mxu1  ;;  %v926_v38 = vadd.f32 %v925_v63, %v7602_v34  ;;  %v9599_v63 = vld [vmem:[#allocation26_spill] sm:$0xff] }
 0x448   :  { %v857_v44 = vadd.f32 %v856_v13, %v9547_v0  ;;  %v928_v3 = vadd.f32 %v927_v39, %v9548_v22 }
 0x449   :  { %v4638_v16 = vmul.f32 -1.442695, %v855_v12 }
 0x44a   :  { %v4639_v54 = vmul.f32 -1.442695, %v857_v44  ;;  %v4640_v28 = vmul.f32 -1.442695, %v928_v3 }
 0x44b   :  { %6949 = vpow2.f32 %v4638_v16 }
 0x44c   :  { %6951 = vpow2.f32 %v4639_v54 }
 0x44d   :  { %6953 = vpow2.f32 %v4640_v28 }
 0x44e   :  { %6955 = vtanh.f32 %v926_v38  ;;  %v9597_v38 = vld [vmem:[#allocation23_spill] sm:$0xff] }
 0x455   :  { %v6950_v40 = vpop.eup %6949 }
 0x456   :  { %v6952_v4 = vpop.eup %6951  ;;  %v933_v19 = vadd.f32 1.0, %v6950_v40 }
 0x457   :  { %v939_v29 = vadd.f32 1.0, %v6952_v4  ;;  %v6954_v51 = vpop.eup %6953  ;;  %v9598_v4 = vld [vmem:[#allocation20_spill] sm:$0xff] }
 0x458   :  { %6957 = vrcp.f32 %v933_v19  ;;  %v6956_v23 = vpop.eup %6955  ;;  %v946_v12 = vadd.f32 1.0, %v6954_v51  ;;  %v9595_v19 = vld [vmem:[#allocation22_spill] sm:$0xff]  ;;  %v9600_v51 = vld [vmem:[#allocation21_spill] sm:$0xff] }
 0x459   :  { %6959 = vrcp.f32 %v939_v29  ;;  %v4641_v29 = vld [vmem:[%s9326_s0 + $0x8] sm:$0x3] }
 0x45a   :  { %6961 = vrcp.f32 %v946_v12  ;;  %v9602_v12 = vld [vmem:[#allocation24_spill] sm:$0xff] }
 0x462   :  { %v6958_v13 = vpop.eup %6957 }
 0x463   :  { %v6960_v44 = vpop.eup %6959  ;;  %v950_v16 = vmul.f32 %v6958_v13, %v6956_v23  ;;  %v9596_v23 = vld [vmem:[#allocation17_spill] sm:$0xff]  ;;  %v9601_v13 = vld [vmem:[#allocation27_spill] sm:$0xff] }
 0x464   :  { %v949_v54 = vmul.f32 %v6960_v44, %v7763_v6  ;;  %v6962_v28 = vpop.eup %6961  ;;  %v9594_v6 = vld [vmem:[#allocation16_spill] sm:$0xff]  ;;  %v9603_v44 = vld [vmem:[#allocation30_spill] sm:$0xff] }
 0x466   :  { %v7842_v39 = vadd.f32 %v950_v16, %v949_v54  ;;  %v9604_v16 = vld [vmem:[#allocation25_spill] sm:$0xff]  ;;  %v9605_v54 = vld [vmem:[#allocation31_spill] sm:$0xff] }
 0x468   :  { %6963 = vtanh.f32 %v7842_v39 }
 0x472   :  { %v6964_v3 = vpop.eup %6963 }
 0x473   :  { %v7845_v40 = vmul.f32 %v6964_v3, %v6962_v28  ;;  %v9606_v28 = vld [vmem:[#allocation28_spill] sm:$0xff]  ;;  %v9607_v3 = vld [vmem:[#allocation33_spill] sm:$0xff] }
 0x475   :  { %9593 = vst [vmem:[#allocation41_spill] sm:$0xff] %v7845_v40  ;;  %1020 = vmatprep.mubr.f32.mxu0 %v7845_v40  ;;  %1091 = vmatprep.mubr.f32.mxu1 %v7845_v40  ;;  %v9609_v40 = vld [vmem:[#allocation34_spill] sm:$0xff] }
 0x476   :  { %1021 = vmatmul.mubr.f32.vlgmr.msra.gmra.mrb[8].mxu0 %v4641_v29  ;;  %1092 = vmatmul.mubr.f32.vlgmr.msra.gmra.mrb[8].mxu1 %v4641_v29  ;;  %v9608_v29 = vld [vmem:[#allocation29_spill] sm:$0xff] }
 0x477   :  { %5460 = vmatpush1.bf16.msra.mxu0 %v7317_v8  ;;  %5524 = vmatpush1.bf16.msra.mxu1 %v7330_v25 }
 0x478   :  { %5462 = vmatprep.subr.bf16.mxu0 %v7319_v9  ;;  %5526 = vmatprep.subr.bf16.mxu1 %v7340_v33 }
 0x47b   :  { %5464 = vmatpush1.bf16.msra.mxu0 %v7323_v14  ;;  %5528 = vmatpush1.bf16.msra.mxu1 %v7342_v37 }
 0x47c   :  { %5466 = vmatprep.subr.bf16.mxu0 %v7326_v17  ;;  %5530 = vmatprep.subr.bf16.mxu1 %v7348_v45 }
 0x47f   :  { %5468 = vmatpush1.bf16.msra.mxu0 %v7333_v26  ;;  %5532 = vmatpush1.bf16.msra.mxu1 %v7354_v48 }
 0x480   :  { %5470 = vmatprep.subr.bf16.mxu0 %v7337_v30  ;;  %5534 = vmatprep.subr.bf16.mxu1 %v7357_v52 }
 0x483   :  { %5472 = vmatpush1.bf16.msra.mxu0 %v7346_v42  ;;  %5536 = vmatpush1.bf16.msra.mxu1 %v7366_v62 }
 0x484   :  { %5474 = vmatprep.subr.bf16.mxu0 %v7351_v46  ;;  %5538 = vmatprep.subr.bf16.mxu1 %v7369_v1 }
 0x487   :  { %5476 = vmatpush1.bf16.msra.mxu0 %v7360_v55  ;;  %5540 = vmatpush1.bf16.msra.mxu1 %v7378_v15 }
 0x488   :  { %5478 = vmatprep.subr.bf16.mxu0 %v7363_v58  ;;  %5542 = vmatprep.subr.bf16.mxu1 %v7381_v18 }
 0x48b   :  { %5480 = vmatpush1.bf16.msra.mxu0 %v7372_v7  ;;  %5544 = vmatpush1.bf16.msra.mxu1 %v7390_v32 }
 0x48c   :  { %5482 = vmatprep.subr.bf16.mxu0 %v7375_v10  ;;  %5546 = vmatprep.subr.bf16.mxu1 %v7393_v35 }
 0x48f   :  { %5484 = vmatpush1.bf16.msra.mxu0 %v7384_v24  ;;  %5548 = vmatpush1.bf16.msra.mxu1 %v7402_v50 }
 0x490   :  { %5486 = vmatprep.subr.bf16.mxu0 %v7387_v27  ;;  %5550 = vmatprep.subr.bf16.mxu1 %v7405_v53 }
 0x493   :  { %5488 = vmatpush1.bf16.msra.mxu0 %v7396_v41  ;;  %5552 = vmatpush1.bf16.msra.mxu1 %v7414_v5 }
 0x494   :  { %5490 = vmatprep.subr.bf16.mxu0 %v7399_v43  ;;  %5554 = vmatprep.subr.bf16.mxu1 %v7417_v11 }
 0x497   :  { %5492 = vmatpush1.bf16.msra.mxu0 %v7408_v60  ;;  %5556 = vmatpush1.bf16.msra.mxu1 %v7426_v31 }
 0x498   :  { %5494 = vmatprep.subr.bf16.mxu0 %v7411_v61  ;;  %5558 = vmatprep.subr.bf16.mxu1 %v7429_v36 }
 0x49b   :  { %5496 = vmatpush1.bf16.msra.mxu0 %v7420_v20  ;;  %5560 = vmatpush1.bf16.msra.mxu1 %v7438_v57 }
 0x49c   :  { %5498 = vmatprep.subr.bf16.mxu0 %v7423_v21  ;;  %5562 = vmatprep.subr.bf16.mxu1 %v9512_v56 }
 0x49f   :  { %5500 = vmatpush1.bf16.msra.mxu0 %v7432_v47  ;;  %5564 = vmatpush1.bf16.msra.mxu1 %v9515_v59 }
 0x4a0   :  { %5502 = vmatprep.subr.bf16.mxu0 %v7435_v49  ;;  %5566 = vmatprep.subr.bf16.mxu1 %v9516_v2 }
 0x4a3   :  { %5504 = vmatpush1.bf16.msra.mxu0 %v9594_v6  ;;  %5568 = vmatpush1.bf16.msra.mxu1 %v9595_v19 }
 0x4a4   :  { %5506 = vmatprep.subr.bf16.mxu0 %v9596_v23  ;;  %5570 = vmatprep.subr.bf16.mxu1 %v9597_v38 }
 0x4a7   :  { %5508 = vmatpush1.bf16.msra.mxu0 %v9598_v4  ;;  %5572 = vmatpush1.bf16.msra.mxu1 %v9599_v63  ;;  %v9610_v63 = vld [vmem:[#allocation32_spill] sm:$0xff]  ;;  %v9614_v4 = vld [vmem:[#allocation18_spill] sm:$0xff] }
 0x4a8   :  { %5510 = vmatprep.subr.bf16.mxu0 %v9600_v51  ;;  %5574 = vmatprep.subr.bf16.mxu1 %v9601_v13  ;;  %v9611_v51 = vld [vmem:[#allocation35_spill] sm:$0xff]  ;;  %v9612_v13 = vld [vmem:[#allocation13_spill] sm:$0xff] }
 0x4ab   :  { %5512 = vmatpush1.bf16.msra.mxu0 %v9602_v12  ;;  %5576 = vmatpush1.bf16.msra.mxu1 %v9603_v44  ;;  %v9613_v12 = vld [vmem:[#allocation14_spill] sm:$0xff] }
 0x4ac   :  { %5514 = vmatprep.subr.bf16.mxu0 %v9604_v16  ;;  %5578 = vmatprep.subr.bf16.mxu1 %v9605_v54 }
 0x4af   :  { %5516 = vmatpush1.bf16.msra.mxu0 %v9606_v28  ;;  %5580 = vmatpush1.bf16.msra.mxu1 %v9607_v3 }
 0x4b0   :  { %5518 = vmatprep.subr.bf16.mxu0 %v9608_v29  ;;  %5582 = vmatprep.subr.bf16.mxu1 %v9609_v40 }
 0x4b3   :  { %5520 = vmatpush1.bf16.msra.mxu0 %v9610_v63  ;;  %5584 = vmatpush1.bf16.msra.mxu1 %v9611_v51 }
 0x4b4   :  { %5586 = vmatprep.subr.bf16.mxu0 %v9612_v13  ;;  %5650 = vmatprep.subr.bf16.mxu1 %v9613_v12 }
 0x549   :  { %v1022_v44 = vpop.f32.mrb[8].mxu0  ;;  %v1093_v16 = vpop.f32.mrb[8].mxu1 }
 0x54a   :  { %v1023_v54 = vadd.f32 %v1022_v44, %v9614_v4  ;;  %v1024_v38 = vpop.f32.mrb[9].mxu0  ;;  %v1095_v28 = vpop.f32.mrb[9].mxu1  ;;  %v1094_v51 = vadd.f32 %v1093_v16, %v7602_v34  ;;  %v9621_v16 = vld [vmem:[#allocation26_spill] sm:$0xff] }
 0x54b   :  { %v1025_v3 = vadd.f32 %v1024_v38, %v9547_v0  ;;  %v1096_v63 = vadd.f32 %v1095_v28, %v9548_v22 }
 0x54c   :  { %v4642_v23 = vmul.f32 -1.442695, %v1023_v54 }
 0x54d   :  { %v4643_v29 = vmul.f32 -1.442695, %v1025_v3  ;;  %v4644_v40 = vmul.f32 -1.442695, %v1096_v63 }
 0x54e   :  { %6965 = vpow2.f32 %v4642_v23 }
 0x54f   :  { %6967 = vpow2.f32 %v4643_v29 }
 0x550   :  { %6969 = vpow2.f32 %v4644_v40 }
 0x551   :  { %6971 = vtanh.f32 %v1094_v51  ;;  %v9619_v51 = vld [vmem:[#allocation23_spill] sm:$0xff] }
 0x558   :  { %v6966_v13 = vpop.eup %6965 }
 0x559   :  { %v6968_v12 = vpop.eup %6967  ;;  %v1101_v19 = vadd.f32 1.0, %v6966_v13 }
 0x55a   :  { %v1107_v6 = vadd.f32 1.0, %v6968_v12  ;;  %v6970_v44 = vpop.eup %6969  ;;  %v9620_v12 = vld [vmem:[#allocation20_spill] sm:$0xff] }
 0x55b   :  { %6973 = vrcp.f32 %v1101_v19  ;;  %v6972_v4 = vpop.eup %6971  ;;  %v1114_v54 = vadd.f32 1.0, %v6970_v44  ;;  %v9617_v19 = vld [vmem:[#allocation22_spill] sm:$0xff]  ;;  %v9622_v44 = vld [vmem:[#allocation21_spill] sm:$0xff] }
 0x55c   :  { %6975 = vrcp.f32 %v1107_v6  ;;  %v4645_v6 = vld [vmem:[%s9326_s0 + $0xa] sm:$0x3] }
 0x55d   :  { %6977 = vrcp.f32 %v1114_v54  ;;  %v9624_v54 = vld [vmem:[#allocation24_spill] sm:$0xff] }
 0x565   :  { %v6974_v38 = vpop.eup %6973 }
 0x566   :  { %v6976_v3 = vpop.eup %6975  ;;  %v1118_v23 = vmul.f32 %v6974_v38, %v6972_v4  ;;  %v9618_v4 = vld [vmem:[#allocation17_spill] sm:$0xff]  ;;  %v9623_v38 = vld [vmem:[#allocation27_spill] sm:$0xff] }
 0x567   :  { %v1117_v29 = vmul.f32 %v6976_v3, %v7842_v39  ;;  %v6978_v40 = vpop.eup %6977  ;;  %v9616_v39 = vld [vmem:[#allocation16_spill] sm:$0xff]  ;;  %v9625_v3 = vld [vmem:[#allocation30_spill] sm:$0xff] }
 0x569   :  { %v7921_v28 = vadd.f32 %v1118_v23, %v1117_v29  ;;  %v9626_v23 = vld [vmem:[#allocation25_spill] sm:$0xff]  ;;  %v9627_v29 = vld [vmem:[#allocation31_spill] sm:$0xff] }
 0x56b   :  { %6979 = vtanh.f32 %v7921_v28 }
 0x575   :  { %v6980_v63 = vpop.eup %6979 }
 0x576   :  { %v7924_v13 = vmul.f32 %v6980_v63, %v6978_v40  ;;  %v9628_v40 = vld [vmem:[#allocation28_spill] sm:$0xff]  ;;  %v9629_v63 = vld [vmem:[#allocation33_spill] sm:$0xff] }
 0x578   :  { %9615 = vst [vmem:[#allocation42_spill] sm:$0xff] %v7924_v13  ;;  %1188 = vmatprep.mubr.f32.mxu0 %v7924_v13  ;;  %1259 = vmatprep.mubr.f32.mxu1 %v7924_v13  ;;  %v9631_v13 = vld [vmem:[#allocation34_spill] sm:$0xff] }
 0x579   :  { %1189 = vmatmul.mubr.f32.vlgmr.msra.gmra.mrb[10].mxu0 %v4645_v6  ;;  %1260 = vmatmul.mubr.f32.vlgmr.msra.gmra.mrb[10].mxu1 %v4645_v6  ;;  %v9630_v6 = vld [vmem:[#allocation29_spill] sm:$0xff] }
 0x57a   :  { %5588 = vmatpush1.bf16.msra.mxu0 %v7317_v8  ;;  %5652 = vmatpush1.bf16.msra.mxu1 %v7330_v25 }
 0x57b   :  { %5590 = vmatprep.subr.bf16.mxu0 %v7319_v9  ;;  %5654 = vmatprep.subr.bf16.mxu1 %v7340_v33 }
 0x57e   :  { %5592 = vmatpush1.bf16.msra.mxu0 %v7323_v14  ;;  %5656 = vmatpush1.bf16.msra.mxu1 %v7342_v37 }
 0x57f   :  { %5594 = vmatprep.subr.bf16.mxu0 %v7326_v17  ;;  %5658 = vmatprep.subr.bf16.mxu1 %v7348_v45 }
 0x582   :  { %5596 = vmatpush1.bf16.msra.mxu0 %v7333_v26  ;;  %5660 = vmatpush1.bf16.msra.mxu1 %v7354_v48 }
 0x583   :  { %5598 = vmatprep.subr.bf16.mxu0 %v7337_v30  ;;  %5662 = vmatprep.subr.bf16.mxu1 %v7357_v52 }
 0x586   :  { %5600 = vmatpush1.bf16.msra.mxu0 %v7346_v42  ;;  %5664 = vmatpush1.bf16.msra.mxu1 %v7366_v62 }
 0x587   :  { %5602 = vmatprep.subr.bf16.mxu0 %v7351_v46  ;;  %5666 = vmatprep.subr.bf16.mxu1 %v7369_v1 }
 0x58a   :  { %5604 = vmatpush1.bf16.msra.mxu0 %v7360_v55  ;;  %5668 = vmatpush1.bf16.msra.mxu1 %v7378_v15 }
 0x58b   :  { %5606 = vmatprep.subr.bf16.mxu0 %v7363_v58  ;;  %5670 = vmatprep.subr.bf16.mxu1 %v7381_v18 }
 0x58e   :  { %5608 = vmatpush1.bf16.msra.mxu0 %v7372_v7  ;;  %5672 = vmatpush1.bf16.msra.mxu1 %v7390_v32 }
 0x58f   :  { %5610 = vmatprep.subr.bf16.mxu0 %v7375_v10  ;;  %5674 = vmatprep.subr.bf16.mxu1 %v7393_v35 }
 0x592   :  { %5612 = vmatpush1.bf16.msra.mxu0 %v7384_v24  ;;  %5676 = vmatpush1.bf16.msra.mxu1 %v7402_v50 }
 0x593   :  { %5614 = vmatprep.subr.bf16.mxu0 %v7387_v27  ;;  %5678 = vmatprep.subr.bf16.mxu1 %v7405_v53 }
 0x596   :  { %5616 = vmatpush1.bf16.msra.mxu0 %v7396_v41  ;;  %5680 = vmatpush1.bf16.msra.mxu1 %v7414_v5 }
 0x597   :  { %5618 = vmatprep.subr.bf16.mxu0 %v7399_v43  ;;  %5682 = vmatprep.subr.bf16.mxu1 %v7417_v11 }
 0x59a   :  { %5620 = vmatpush1.bf16.msra.mxu0 %v7408_v60  ;;  %5684 = vmatpush1.bf16.msra.mxu1 %v7426_v31 }
 0x59b   :  { %5622 = vmatprep.subr.bf16.mxu0 %v7411_v61  ;;  %5686 = vmatprep.subr.bf16.mxu1 %v7429_v36 }
 0x59e   :  { %5624 = vmatpush1.bf16.msra.mxu0 %v7420_v20  ;;  %5688 = vmatpush1.bf16.msra.mxu1 %v7438_v57 }
 0x59f   :  { %5626 = vmatprep.subr.bf16.mxu0 %v7423_v21  ;;  %5690 = vmatprep.subr.bf16.mxu1 %v9512_v56 }
 0x5a2   :  { %5628 = vmatpush1.bf16.msra.mxu0 %v7432_v47  ;;  %5692 = vmatpush1.bf16.msra.mxu1 %v9515_v59 }
 0x5a3   :  { %5630 = vmatprep.subr.bf16.mxu0 %v7435_v49  ;;  %5694 = vmatprep.subr.bf16.mxu1 %v9516_v2 }
 0x5a6   :  { %5632 = vmatpush1.bf16.msra.mxu0 %v9616_v39  ;;  %5696 = vmatpush1.bf16.msra.mxu1 %v9617_v19 }
 0x5a7   :  { %5634 = vmatprep.subr.bf16.mxu0 %v9618_v4  ;;  %5698 = vmatprep.subr.bf16.mxu1 %v9619_v51 }
 0x5aa   :  { %5636 = vmatpush1.bf16.msra.mxu0 %v9620_v12  ;;  %5700 = vmatpush1.bf16.msra.mxu1 %v9621_v16  ;;  %v9632_v16 = vld [vmem:[#allocation32_spill] sm:$0xff]  ;;  %v9636_v12 = vld [vmem:[#allocation18_spill] sm:$0xff] }
 0x5ab   :  { %5638 = vmatprep.subr.bf16.mxu0 %v9622_v44  ;;  %5702 = vmatprep.subr.bf16.mxu1 %v9623_v38  ;;  %v9633_v44 = vld [vmem:[#allocation35_spill] sm:$0xff]  ;;  %v9634_v38 = vld [vmem:[#allocation13_spill] sm:$0xff] }
 0x5ae   :  { %5640 = vmatpush1.bf16.msra.mxu0 %v9624_v54  ;;  %5704 = vmatpush1.bf16.msra.mxu1 %v9625_v3  ;;  %v9635_v54 = vld [vmem:[#allocation14_spill] sm:$0xff] }
 0x5af   :  { %5642 = vmatprep.subr.bf16.mxu0 %v9626_v23  ;;  %5706 = vmatprep.subr.bf16.mxu1 %v9627_v29 }
 0x5b2   :  { %5644 = vmatpush1.bf16.msra.mxu0 %v9628_v40  ;;  %5708 = vmatpush1.bf16.msra.mxu1 %v9629_v63 }
 0x5b3   :  { %5646 = vmatprep.subr.bf16.mxu0 %v9630_v6  ;;  %5710 = vmatprep.subr.bf16.mxu1 %v9631_v13 }
 0x5b6   :  { %5648 = vmatpush1.bf16.msra.mxu0 %v9632_v16  ;;  %5712 = vmatpush1.bf16.msra.mxu1 %v9633_v44 }
 0x5b7   :  { %5714 = vmatprep.subr.bf16.mxu0 %v9634_v38  ;;  %5778 = vmatprep.subr.bf16.mxu1 %v9635_v54 }
 0x64c   :  { %v1190_v3 = vpop.f32.mrb[10].mxu0  ;;  %v1261_v23 = vpop.f32.mrb[10].mxu1 }
 0x64d   :  { %v1191_v29 = vadd.f32 %v1190_v3, %v9636_v12  ;;  %v1192_v51 = vpop.f32.mrb[11].mxu0  ;;  %v1263_v40 = vpop.f32.mrb[11].mxu1  ;;  %v1262_v44 = vadd.f32 %v1261_v23, %v7602_v34 }
 0x64e   :  { %v1193_v63 = vadd.f32 %v1192_v51, %v9547_v0  ;;  %v1264_v16 = vadd.f32 %v1263_v40, %v9548_v22 }
 0x64f   :  { %v4646_v4 = vmul.f32 -1.442695, %v1191_v29 }
 0x650   :  { %v4647_v6 = vmul.f32 -1.442695, %v1193_v63  ;;  %v4648_v13 = vmul.f32 -1.442695, %v1264_v16 }
 0x651   :  { %6981 = vpow2.f32 %v4646_v4 }
 0x652   :  { %6983 = vpow2.f32 %v4647_v6 }
 0x653   :  { %6985 = vpow2.f32 %v4648_v13 }
 0x654   :  { %6987 = vtanh.f32 %v1262_v44 }
 0x65b   :  { %v6982_v38 = vpop.eup %6981 }
 0x65c   :  { %v6984_v54 = vpop.eup %6983  ;;  %v1269_v19 = vadd.f32 1.0, %v6982_v38  ;;  %v1626_v38 = vld [vmem:[#allocation7] sm:$0xff] }
 0x65d   :  { %v1275_v39 = vadd.f32 1.0, %v6984_v54  ;;  %v6986_v3 = vpop.eup %6985  ;;  %v1630_v54 = vld [vmem:[#allocation7 + $0x20] sm:$0xff] }
 0x65e   :  { %6989 = vrcp.f32 %v1269_v19  ;;  %v6988_v12 = vpop.eup %6987  ;;  %v1282_v29 = vadd.f32 1.0, %v6986_v3 }
 0x65f   :  { %6991 = vrcp.f32 %v1275_v39  ;;  %v4649_v39 = vld [vmem:[%s9326_s0 + $0xc] sm:$0x3] }
 0x660   :  { %6993 = vrcp.f32 %v1282_v29  ;;  %v1632_v29 = vld [vmem:[#allocation7 + $0x30] sm:$0xff] }
 0x668   :  { %v6990_v51 = vpop.eup %6989 }
 0x669   :  { %v6992_v63 = vpop.eup %6991  ;;  %v1286_v4 = vmul.f32 %v6990_v51, %v6988_v12  ;;  %v1628_v51 = vld [vmem:[#allocation7 + $0x10] sm:$0xff] }
 0x66a   :  { %v1285_v6 = vmul.f32 %v6992_v63, %v7921_v28  ;;  %v6994_v13 = vpop.eup %6993  ;;  %v1635_v63 = vld [vmem:[#allocation7 + $0x48] sm:$0xff] }
 0x66c   :  { %v8000_v40 = vadd.f32 %v1286_v4, %v1285_v6  ;;  %v1639_v4 = vld [vmem:[#allocation7 + $0x68] sm:$0xff]  ;;  %v1637_v6 = vld [vmem:[#allocation7 + $0x58] sm:$0xff] }
 0x66e   :  { %6995 = vtanh.f32 %v8000_v40 }
 0x678   :  { %v6996_v16 = vpop.eup %6995 }
 0x679   :  { %v8003_v23 = vmul.f32 %v6996_v16, %v6994_v13  ;;  %v1641_v13 = vld [vmem:[#allocation7 + $0x78] sm:$0xff] }
 0x67b   :  { %9637 = vst [vmem:[#allocation13_spill] sm:$0xff] %v8003_v23  ;;  %1356 = vmatprep.mubr.f32.mxu0 %v8003_v23  ;;  %1427 = vmatprep.mubr.f32.mxu1 %v8003_v23  ;;  %v1723_v23 = vld [vmem:[#allocation7 + $0x308] sm:$0xff] }
 0x67c   :  { %1357 = vmatmul.mubr.f32.vlgmr.msra.gmra.mrb[12].mxu0 %v4649_v39  ;;  %1428 = vmatmul.mubr.f32.vlgmr.msra.gmra.mrb[12].mxu1 %v4649_v39 }
 0x67d   :  { %5716 = vmatpush1.bf16.msra.mxu0 %v7317_v8  ;;  %5780 = vmatpush1.bf16.msra.mxu1 %v7330_v25  ;;  %v9638_v8 = vld [vmem:[#allocation16_spill] sm:$0xff] }
 0x67e   :  { %5718 = vmatprep.subr.bf16.mxu0 %v7319_v9  ;;  %5782 = vmatprep.subr.bf16.mxu1 %v7340_v33  ;;  %v9639_v9 = vld [vmem:[#allocation22_spill] sm:$0xff]  ;;  %v9642_v25 = vld [vmem:[#allocation20_spill] sm:$0xff]  ;;  %v9645_v33 = vld [vmem:[#allocation27_spill] sm:$0xff] }
 0x681   :  { %5720 = vmatpush1.bf16.msra.mxu0 %v7323_v14  ;;  %5784 = vmatpush1.bf16.msra.mxu1 %v7342_v37  ;;  %v9640_v14 = vld [vmem:[#allocation17_spill] sm:$0xff]  ;;  %v9646_v37 = vld [vmem:[#allocation24_spill] sm:$0xff] }
 0x682   :  { %5722 = vmatprep.subr.bf16.mxu0 %v7326_v17  ;;  %5786 = vmatprep.subr.bf16.mxu1 %v7348_v45  ;;  %v9641_v17 = vld [vmem:[#allocation23_spill] sm:$0xff]  ;;  %v9648_v45 = vld [vmem:[#allocation25_spill] sm:$0xff] }
 0x685   :  { %5724 = vmatpush1.bf16.msra.mxu0 %v7333_v26  ;;  %5788 = vmatpush1.bf16.msra.mxu1 %v7354_v48  ;;  %v9643_v26 = vld [vmem:[#allocation26_spill] sm:$0xff]  ;;  %v9650_v48 = vld [vmem:[#allocation28_spill] sm:$0xff] }
 0x686   :  { %5726 = vmatprep.subr.bf16.mxu0 %v7337_v30  ;;  %5790 = vmatprep.subr.bf16.mxu1 %v7357_v52  ;;  %v9644_v30 = vld [vmem:[#allocation21_spill] sm:$0xff] }
 0x687   :  { %v9651_v52 = vld [vmem:[#allocation33_spill] sm:$0xff] }
 0x689   :  { %5728 = vmatpush1.bf16.msra.mxu0 %v7346_v42  ;;  %5792 = vmatpush1.bf16.msra.mxu1 %v7366_v62  ;;  %v9647_v42 = vld [vmem:[#allocation30_spill] sm:$0xff]  ;;  %v9654_v62 = vld [vmem:[#allocation32_spill] sm:$0xff] }
 0x68a   :  { %5730 = vmatprep.subr.bf16.mxu0 %v7351_v46  ;;  %5794 = vmatprep.subr.bf16.mxu1 %v7369_v1  ;;  %v9649_v46 = vld [vmem:[#allocation31_spill] sm:$0xff] }
 0x68b   :  { %v9655_v1 = vld [vmem:[#allocation35_spill] sm:$0xff] }
 0x68d   :  { %5732 = vmatpush1.bf16.msra.mxu0 %v7360_v55  ;;  %5796 = vmatpush1.bf16.msra.mxu1 %v7378_v15  ;;  %v9652_v55 = vld [vmem:[#allocation29_spill] sm:$0xff]  ;;  %v1629_v15 = vld [vmem:[#allocation7 + $0x18] sm:$0xff] }
 0x68e   :  { %5734 = vmatprep.subr.bf16.mxu0 %v7363_v58  ;;  %5798 = vmatprep.subr.bf16.mxu1 %v7381_v18  ;;  %v9653_v58 = vld [vmem:[#allocation34_spill] sm:$0xff] }
 0x691   :  { %5736 = vmatpush1.bf16.msra.mxu0 %v7372_v7  ;;  %5800 = vmatpush1.bf16.msra.mxu1 %v7390_v32  ;;  %v1627_v7 = vld [vmem:[#allocation7 + $0x8] sm:$0xff] }
 0x692   :  { %5738 = vmatprep.subr.bf16.mxu0 %v7375_v10  ;;  %5802 = vmatprep.subr.bf16.mxu1 %v7393_v35  ;;  %v1631_v10 = vld [vmem:[#allocation7 + $0x28] sm:$0xff] }
 0x693   :  { %v8072_v18 = vpack.c.bf16 %v1631_v10, %v1627_v7  ;;  %v1644_v7 = vld [vmem:[#allocation7 + $0x90] sm:$0xff] }
 0x694   :  { %v1648_v10 = vld [vmem:[#allocation7 + $0xb0] sm:$0xff] }
 0x695   :  { %5740 = vmatpush1.bf16.msra.mxu0 %v7384_v24  ;;  %5804 = vmatpush1.bf16.msra.mxu1 %v7402_v50  ;;  %v1633_v24 = vld [vmem:[#allocation7 + $0x38] sm:$0xff] }
 0x696   :  { %5742 = vmatprep.subr.bf16.mxu0 %v7387_v27  ;;  %5806 = vmatprep.subr.bf16.mxu1 %v7405_v53  ;;  %v8074_v27 = vpack.c.bf16 %v1633_v24, %v1629_v15  ;;  %v1651_v15 = vld [vmem:[#allocation7 + $0xc8] sm:$0xff] }
 0x697   :  { %v1655_v24 = vld [vmem:[#allocation7 + $0xe8] sm:$0xff] }
 0x699   :  { %5744 = vmatpush1.bf16.msra.mxu0 %v7396_v41  ;;  %5808 = vmatpush1.bf16.msra.mxu1 %v7414_v5  ;;  %v9656_v41 = vld [vmem:[#allocation18_spill] sm:$0xff] }
 0x69a   :  { %5746 = vmatprep.subr.bf16.mxu0 %v7399_v43  ;;  %5810 = vmatprep.subr.bf16.mxu1 %v7417_v11 }
 0x69d   :  { %5748 = vmatpush1.bf16.msra.mxu0 %v7408_v60  ;;  %5812 = vmatpush1.bf16.msra.mxu1 %v7426_v31 }
 0x69e   :  { %5750 = vmatprep.subr.bf16.mxu0 %v7411_v61  ;;  %5814 = vmatprep.subr.bf16.mxu1 %v7429_v36 }
 0x6a1   :  { %5752 = vmatpush1.bf16.msra.mxu0 %v7420_v20  ;;  %5816 = vmatpush1.bf16.msra.mxu1 %v7438_v57 }
 0x6a2   :  { %5754 = vmatprep.subr.bf16.mxu0 %v7423_v21  ;;  %5818 = vmatprep.subr.bf16.mxu1 %v9512_v56 }
 0x6a5   :  { %5756 = vmatpush1.bf16.msra.mxu0 %v7432_v47  ;;  %5820 = vmatpush1.bf16.msra.mxu1 %v9515_v59 }
 0x6a6   :  { %5758 = vmatprep.subr.bf16.mxu0 %v7435_v49  ;;  %5822 = vmatprep.subr.bf16.mxu1 %v9516_v2 }
 0x6a9   :  { %5760 = vmatpush1.bf16.msra.mxu0 %v9638_v8  ;;  %5824 = vmatpush1.bf16.msra.mxu1 %v9639_v9  ;;  %v8091_v8 = vpack.c.bf16 %v1630_v54, %v1626_v38  ;;  %v8093_v9 = vpack.c.bf16 %v1632_v29, %v1628_v51  ;;  %v1664_v38 = vld [vmem:[#allocation7 + $0x130] sm:$0xff]  ;;  %v1667_v54 = vld [vmem:[#allocation7 + $0x148] sm:$0xff]  ;;  %v1669_v51 = vld [vmem:[#allocation7 + $0x158] sm:$0xff] }
 0x6aa   :  { %5762 = vmatprep.subr.bf16.mxu0 %v9640_v14  ;;  %5826 = vmatprep.subr.bf16.mxu1 %v9641_v17  ;;  %v1634_v14 = vld [vmem:[#allocation7 + $0x40] sm:$0xff]  ;;  %v1673_v29 = vld [vmem:[#allocation7 + $0x178] sm:$0xff] }
 0x6ab   :  { %v1638_v17 = vld [vmem:[#allocation7 + $0x60] sm:$0xff] }
 0x6ad   :  { %5764 = vmatpush1.bf16.msra.mxu0 %v9642_v25  ;;  %5828 = vmatpush1.bf16.msra.mxu1 %v9643_v26  ;;  %v8095_v25 = vpack.c.bf16 %v1639_v4, %v1635_v63  ;;  %v8097_v26 = vpack.c.bf16 %v1641_v13, %v1637_v6  ;;  %v1666_v6 = vld [vmem:[#allocation7 + $0x140] sm:$0xff] }
 0x6ae   :  { %5766 = vmatprep.subr.bf16.mxu0 %v9644_v30  ;;  %5830 = vmatprep.subr.bf16.mxu1 %v9645_v33  ;;  %v1636_v30 = vld [vmem:[#allocation7 + $0x50] sm:$0xff]  ;;  %v1670_v13 = vld [vmem:[#allocation7 + $0x160] sm:$0xff] }
 0x6af   :  { %v1640_v33 = vld [vmem:[#allocation7 + $0x70] sm:$0xff] }
 0x6b1   :  { %5768 = vmatpush1.bf16.msra.mxu0 %v9646_v37  ;;  %5832 = vmatpush1.bf16.msra.mxu1 %v9647_v42  ;;  %v1643_v37 = vld [vmem:[#allocation7 + $0x88] sm:$0xff] }
 0x6b2   :  { %5770 = vmatprep.subr.bf16.mxu0 %v9648_v45  ;;  %5834 = vmatprep.subr.bf16.mxu1 %v9649_v46  ;;  %v1647_v42 = vld [vmem:[#allocation7 + $0xa8] sm:$0xff]  ;;  %v1645_v45 = vld [vmem:[#allocation7 + $0x98] sm:$0xff] }
 0x6b3   :  { %v1649_v46 = vld [vmem:[#allocation7 + $0xb8] sm:$0xff] }
 0x6b5   :  { %5772 = vmatpush1.bf16.msra.mxu0 %v9650_v48  ;;  %5836 = vmatpush1.bf16.msra.mxu1 %v9651_v52  ;;  %v8103_v48 = vpack.c.bf16 %v1638_v17, %v1634_v14  ;;  %v8105_v52 = vpack.c.bf16 %v1640_v33, %v1636_v30  ;;  %v1668_v14 = vld [vmem:[#allocation7 + $0x150] sm:$0xff]  ;;  %v1675_v30 = vld [vmem:[#allocation7 + $0x188] sm:$0xff] }
 0x6b6   :  { %5774 = vmatprep.subr.bf16.mxu0 %v9652_v55  ;;  %5838 = vmatprep.subr.bf16.mxu1 %v9653_v58  ;;  %v1642_v55 = vld [vmem:[#allocation7 + $0x80] sm:$0xff]  ;;  %v1672_v17 = vld [vmem:[#allocation7 + $0x170] sm:$0xff]  ;;  %v1679_v33 = vld [vmem:[#allocation7 + $0x1a8] sm:$0xff] }
 0x6b7   :  { %v1646_v58 = vld [vmem:[#allocation7 + $0xa0] sm:$0xff] }
 0x6b9   :  { %5776 = vmatpush1.bf16.msra.mxu0 %v9654_v62  ;;  %5840 = vmatpush1.bf16.msra.mxu1 %v9655_v1  ;;  %v8109_v62 = vpack.c.bf16 %v1647_v42, %v1643_v37  ;;  %v8111_v1 = vpack.c.bf16 %v1649_v46, %v1645_v45  ;;  %v1677_v37 = vld [vmem:[#allocation7 + $0x198] sm:$0xff]  ;;  %v8153_v45 = vpack.c.bf16 %v1670_v13, %v1666_v6  ;;  %v1690_v6 = vld [vmem:[#allocation7 + $0x200] sm:$0xff] }
 0x6ba   :  { %5842 = vmatprep.subr.bf16.mxu0 %v8072_v18  ;;  %5906 = vmatprep.subr.bf16.mxu1 %v8074_v27  ;;  %v1681_v42 = vld [vmem:[#allocation7 + $0x1b8] sm:$0xff]  ;;  %v8155_v46 = vpack.c.bf16 %v1672_v17, %v1668_v14  ;;  %v1694_v13 = vld [vmem:[#allocation7 + $0x220] sm:$0xff] }
 0x74f   :  { %v1358_v32 = vpop.f32.mrb[12].mxu0  ;;  %v1429_v35 = vpop.f32.mrb[12].mxu1 }
 0x750   :  { %v1359_v43 = vadd.f32 %v1358_v32, %v9656_v41  ;;  %v1360_v50 = vpop.f32.mrb[13].mxu0  ;;  %v1431_v53 = vpop.f32.mrb[13].mxu1  ;;  %v1430_v21 = vadd.f32 %v1429_v35, %v7602_v34  ;;  %v1653_v32 = vld [vmem:[#allocation7 + $0xd8] sm:$0xff]  ;;  %v1735_v41 = vld [vmem:[#allocation7 + $0x368] sm:$0xff] }
 0x751   :  { %v1361_v60 = vadd.f32 %v1360_v50, %v9547_v0  ;;  %v1432_v11 = vadd.f32 %v1431_v53, %v9548_v22  ;;  %v1657_v35 = vld [vmem:[#allocation7 + $0xf8] sm:$0xff]  ;;  %v8117_v50 = vpack.c.bf16 %v1646_v58, %v1642_v55  ;;  %v8119_v53 = vpack.c.bf16 %v1648_v10, %v1644_v7  ;;  %v1674_v55 = vld [vmem:[#allocation7 + $0x180] sm:$0xff]  ;;  %v1731_v0 = vld [vmem:[#allocation7 + $0x348] sm:$0xff] }
 0x752   :  { %v4650_v61 = vmul.f32 -1.442695, %v1359_v43  ;;  %v9659_v43 = vmov 0.0   ;;  %v1678_v58 = vld [vmem:[#allocation7 + $0x1a0] sm:$0xff]  ;;  %v8159_v7 = vpack.c.bf16 %v1679_v33, %v1675_v30  ;;  %v8161_v10 = vpack.c.bf16 %v1681_v42, %v1677_v37  ;;  %v1692_v30 = vld [vmem:[#allocation7 + $0x210] sm:$0xff]  ;;  %v1699_v37 = vld [vmem:[#allocation7 + $0x248] sm:$0xff] }
 0x753   :  { %v4651_v5 = vmul.f32 -1.442695, %v1361_v60  ;;  %v4652_v20 = vmul.f32 -1.442695, %v1432_v11  ;;  %v1650_v60 = vld [vmem:[#allocation7 + $0xc0] sm:$0xff]  ;;  %v8125_v11 = vpack.c.bf16 %v1657_v35, %v1653_v32  ;;  %v1683_v32 = vld [vmem:[#allocation7 + $0x1c8] sm:$0xff] }
 0x754   :  { %6997 = vpow2.f32 %v4650_v61  ;;  %v1654_v61 = vld [vmem:[#allocation7 + $0xe0] sm:$0xff]  ;;  %v1687_v35 = vld [vmem:[#allocation7 + $0x1e8] sm:$0xff]  ;;  %v1696_v33 = vld [vmem:[#allocation7 + $0x230] sm:$0xff] }
 0x755   :  { %6999 = vpow2.f32 %v4651_v5  ;;  %v8123_v5 = vpack.c.bf16 %v1655_v24, %v1651_v15  ;;  %v1676_v15 = vld [vmem:[#allocation7 + $0x190] sm:$0xff]  ;;  %v1703_v42 = vld [vmem:[#allocation7 + $0x268] sm:$0xff]  ;;  %v1725_v34 = vld [vmem:[#allocation7 + $0x318] sm:$0xff] }
 0x756   :  { %7001 = vpow2.f32 %v4652_v20  ;;  %v1652_v20 = vld [vmem:[#allocation7 + $0xd0] sm:$0xff]  ;;  %v1729_v22 = vld [vmem:[#allocation7 + $0x338] sm:$0xff] }
 0x757   :  { %7003 = vtanh.f32 %v1430_v21  ;;  %v1656_v21 = vld [vmem:[#allocation7 + $0xf0] sm:$0xff] }
 0x758   :  { %v1680_v24 = vld [vmem:[#allocation7 + $0x1b0] sm:$0xff] }
 0x75e   :  { %v6998_v31 = vpop.eup %6997 }
 0x75f   :  { %v7000_v36 = vpop.eup %6999  ;;  %v1437_v47 = vadd.f32 1.0, %v6998_v31  ;;  %v1659_v31 = vld [vmem:[#allocation7 + $0x108] sm:$0xff] }
 0x760   :  { %v1443_v49 = vadd.f32 1.0, %v7000_v36  ;;  %v7002_v57 = vpop.eup %7001  ;;  %v1663_v36 = vld [vmem:[#allocation7 + $0x128] sm:$0xff] }
 0x761   :  { %7005 = vrcp.f32 %v1437_v47  ;;  %v7004_v56 = vpop.eup %7003  ;;  %v1450_v2 = vadd.f32 1.0, %v7002_v57  ;;  %v1661_v47 = vld [vmem:[#allocation7 + $0x118] sm:$0xff]  ;;  %v8129_v57 = vpack.c.bf16 %v1654_v61, %v1650_v60 }
 0x762   :  { %7007 = vrcp.f32 %v1443_v49  ;;  %v1665_v49 = vld [vmem:[#allocation7 + $0x138] sm:$0xff] }
 0x763   :  { %7009 = vrcp.f32 %v1450_v2  ;;  %v1662_v2 = vld [vmem:[#allocation7 + $0x120] sm:$0xff]  ;;  %v1685_v60 = vld [vmem:[#allocation7 + $0x1d8] sm:$0xff] }
 0x764   :  { %v1689_v61 = vld [vmem:[#allocation7 + $0x1f8] sm:$0xff] }
 0x76b   :  { %v7006_v59 = vpop.eup %7005 }
 0x76c   :  { %v7008_v28 = vpop.eup %7007  ;;  %v1454_v19 = vmul.f32 %v7006_v59, %v7004_v56  ;;  %v8131_v56 = vpack.c.bf16 %v1656_v21, %v1652_v20  ;;  %v1658_v59 = vld [vmem:[#allocation7 + $0x100] sm:$0xff]  ;;  %v8165_v20 = vpack.c.bf16 %v1678_v58, %v1674_v55  ;;  %v8167_v21 = vpack.c.bf16 %v1680_v24, %v1676_v15  ;;  %v1701_v55 = vld [vmem:[#allocation7 + $0x258] sm:$0xff] }
 0x76d   :  { %v1453_v12 = vmul.f32 %v7008_v28, %v8000_v40  ;;  %v7010_v3 = vpop.eup %7009  ;;  %v4653_v40 = vld [vmem:[%s9326_s0 + $0xe] sm:$0x3]  ;;  %v8135_v28 = vpack.c.bf16 %v1663_v36, %v1659_v31  ;;  %v8141_v63 = vpack.c.bf16 %v1662_v2, %v1658_v59  ;;  %v1682_v31 = vld [vmem:[#allocation7 + $0x1c0] sm:$0xff]  ;;  %v1684_v59 = vld [vmem:[#allocation7 + $0x1d0] sm:$0xff]  ;;  %v8189_v15 = vpack.c.bf16 %v1694_v13, %v1690_v6 }
 0x76e   :  { %v1686_v36 = vld [vmem:[#allocation7 + $0x1e0] sm:$0xff]  ;;  %v1688_v2 = vld [vmem:[#allocation7 + $0x1f0] sm:$0xff]  ;;  %v1705_v58 = vld [vmem:[#allocation7 + $0x278] sm:$0xff]  ;;  %v8191_v24 = vpack.c.bf16 %v1696_v33, %v1692_v30 }
 0x76f   :  { %v8083_v44 = vadd.f32 %v1454_v19, %v1453_v12  ;;  %v8137_v19 = vpack.c.bf16 %v1665_v49, %v1661_v47  ;;  %v1660_v12 = vld [vmem:[#allocation7 + $0x110] sm:$0xff]  ;;  %v8171_v47 = vpack.c.bf16 %v1687_v35, %v1683_v32  ;;  %v8173_v49 = vpack.c.bf16 %v1689_v61, %v1685_v60  ;;  %v1698_v32 = vld [vmem:[#allocation7 + $0x240] sm:$0xff] }
 0x770   :  { %v8143_v4 = vpack.c.bf16 %v1664_v38, %v1660_v12  ;;  %v1691_v12 = vld [vmem:[#allocation7 + $0x208] sm:$0xff]  ;;  %v1702_v35 = vld [vmem:[#allocation7 + $0x260] sm:$0xff]  ;;  %v8195_v60 = vpack.c.bf16 %v1703_v42, %v1699_v37  ;;  %v8197_v61 = vpack.c.bf16 %v1705_v58, %v1701_v55  ;;  %v1708_v37 = vld [vmem:[#allocation7 + $0x290] sm:$0xff] }
 0x771   :  { %9657 = vst [vmem:[#allocation14_spill] sm:$0xff] %v8083_v44  ;;  %7011 = vtanh.f32 %v8083_v44  ;;  %v1695_v38 = vld [vmem:[#allocation7 + $0x228] sm:$0xff]  ;;  %v1706_v6 = vld [vmem:[#allocation7 + $0x280] sm:$0xff]  ;;  %v1712_v42 = vld [vmem:[#allocation7 + $0x2b0] sm:$0xff] }
 0x772   :  { %v8183_v14 = vpack.c.bf16 %v1695_v38, %v1691_v12  ;;  %v1709_v12 = vld [vmem:[#allocation7 + $0x298] sm:$0xff]  ;;  %v1710_v13 = vld [vmem:[#allocation7 + $0x2a0] sm:$0xff]  ;;  %v1715_v55 = vld [vmem:[#allocation7 + $0x2c8] sm:$0xff] }
 0x773   :  { %v1713_v38 = vld [vmem:[#allocation7 + $0x2b8] sm:$0xff]  ;;  %v1719_v58 = vld [vmem:[#allocation7 + $0x2e8] sm:$0xff] }
 0x774   :  { %v8209_v33 = vpack.c.bf16 %v1713_v38, %v1709_v12  ;;  %v1716_v12 = vld [vmem:[#allocation7 + $0x2d0] sm:$0xff]  ;;  %v1727_v44 = vld [vmem:[#allocation7 + $0x328] sm:$0xff] }
 0x775   :  { %v1720_v38 = vld [vmem:[#allocation7 + $0x2f0] sm:$0xff] }
 0x77b   :  { %v7012_v16 = vpop.eup %7011 }
 0x77c   :  { %v8086_v39 = vmul.f32 %v7012_v16, %v7010_v3  ;;  %v1671_v3 = vld [vmem:[#allocation7 + $0x168] sm:$0xff] }
 0x77d   :  { %v8147_v16 = vpack.c.bf16 %v1671_v3, %v1667_v54  ;;  %v1693_v54 = vld [vmem:[#allocation7 + $0x218] sm:$0xff] }
 0x77e   :  { %9658 = vst [vmem:[#allocation16_spill] sm:$0xff] %v8086_v39  ;;  %1524 = vmatprep.mubr.f32.mxu0 %v8086_v39  ;;  %1595 = vmatprep.mubr.f32.mxu1 %v8086_v39  ;;  %v1697_v3 = vld [vmem:[#allocation7 + $0x238] sm:$0xff] }
 0x77f   :  { %1525 = vmatmul.mubr.f32.vlgmr.msra.gmra.mrb[14].mxu0 %v4653_v40  ;;  %1596 = vmatmul.mubr.f32.vlgmr.msra.gmra.mrb[14].mxu1 %v4653_v40  ;;  %v8149_v40 = vpack.c.bf16 %v1673_v29, %v1669_v51  ;;  %v8177_v51 = vpack.c.bf16 %v1686_v36, %v1682_v31  ;;  %v8179_v29 = vpack.c.bf16 %v1688_v2, %v1684_v59  ;;  %v1700_v31 = vld [vmem:[#allocation7 + $0x250] sm:$0xff]  ;;  %v1707_v59 = vld [vmem:[#allocation7 + $0x288] sm:$0xff]  ;;  %v1721_v39 = vld [vmem:[#allocation7 + $0x2f8] sm:$0xff] }
 0x780   :  { %5844 = vmatpush1.bf16.msra.mxu0 %v8091_v8  ;;  %5908 = vmatpush1.bf16.msra.mxu1 %v8093_v9  ;;  %v8185_v17 = vpack.c.bf16 %v1697_v3, %v1693_v54  ;;  %v1704_v36 = vld [vmem:[#allocation7 + $0x270] sm:$0xff]  ;;  %v1711_v2 = vld [vmem:[#allocation7 + $0x2a8] sm:$0xff]  ;;  %v8201_v54 = vpack.c.bf16 %v1702_v35, %v1698_v32  ;;  %v8213_v32 = vpack.c.bf16 %v1710_v13, %v1706_v6 }
 0x781   :  { %5846 = vmatprep.subr.bf16.mxu0 %v8095_v25  ;;  %5910 = vmatprep.subr.bf16.mxu1 %v8097_v26  ;;  %v8203_v3 = vpack.c.bf16 %v1704_v36, %v1700_v31  ;;  %v8207_v30 = vpack.c.bf16 %v1711_v2, %v1707_v59  ;;  %v8215_v35 = vpack.c.bf16 %v1712_v42, %v1708_v37  ;;  %v1714_v31 = vld [vmem:[#allocation7 + $0x2c0] sm:$0xff] }
 0x782   :  { %1818 = vmatprep.mubr.f32.mxu0 %v9659_v43  ;;  %1889 = vmatprep.mubr.f32.mxu1 %v9659_v43  ;;  %v1717_v43 = vld [vmem:[#allocation7 + $0x2d8] sm:$0xff]  ;;  %9660 = vst [vmem:[#allocation22_spill] sm:$0xff] %v8213_v32  ;;  %v1718_v36 = vld [vmem:[#allocation7 + $0x2e0] sm:$0xff]  ;;  %v8219_v59 = vpack.c.bf16 %v1719_v58, %v1715_v55  ;;  %v8227_v13 = vpack.c.bf16 %v1720_v38, %v1716_v12  ;;  %v1724_v55 = vld [vmem:[#allocation7 + $0x310] sm:$0xff] }
 0x783   :  { %9661 = vst [vmem:[#allocation17_spill] sm:$0xff] %v8215_v35  ;;  %v8221_v2 = vpack.c.bf16 %v1721_v39, %v1717_v43  ;;  %v8225_v6 = vpack.c.bf16 %v1718_v36, %v1714_v31  ;;  %v1722_v37 = vld [vmem:[#allocation7 + $0x300] sm:$0xff]  ;;  %v8231_v39 = vpack.c.bf16 %v1727_v44, %v1723_v23  ;;  %v8233_v43 = vpack.c.bf16 %v1729_v22, %v1725_v34  ;;  %v1728_v58 = vld [vmem:[#allocation7 + $0x330] sm:$0xff] }
 0x784   :  { %5848 = vmatpush1.bf16.msra.mxu0 %v8103_v48  ;;  %5912 = vmatpush1.bf16.msra.mxu1 %v8105_v52  ;;  %9662 = vst [vmem:[#allocation23_spill] sm:$0xff] %v8219_v59  ;;  %9665 = vst [vmem:[#allocation21_spill] sm:$0xff] %v8227_v13  ;;  %v1726_v42 = vld [vmem:[#allocation7 + $0x320] sm:$0xff]  ;;  %v8239_v36 = vpack.c.bf16 %v1728_v58, %v1724_v55  ;;  %v8243_v34 = vpack.c.bf16 %v1735_v41, %v1731_v0  ;;  %v1732_v23 = vld [vmem:[#allocation7 + $0x350] sm:$0xff] }
 0x785   :  { %5850 = vmatprep.subr.bf16.mxu0 %v8109_v62  ;;  %5914 = vmatprep.subr.bf16.mxu1 %v8111_v1  ;;  %9663 = vst [vmem:[#allocation20_spill] sm:$0xff] %v8221_v2  ;;  %9664 = vst [vmem:[#allocation26_spill] sm:$0xff] %v8225_v6  ;;  %v8237_v31 = vpack.c.bf16 %v1726_v42, %v1722_v37  ;;  %v1730_v12 = vld [vmem:[#allocation7 + $0x340] sm:$0xff]  ;;  %v1736_v44 = vld [vmem:[#allocation7 + $0x370] sm:$0xff] }
 0x786   :  { %9666 = vst [vmem:[#allocation27_spill] sm:$0xff] %v8231_v39  ;;  %9667 = vst [vmem:[#allocation24_spill] sm:$0xff] %v8233_v43  ;;  %v1734_v38 = vld [vmem:[#allocation7 + $0x360] sm:$0xff]  ;;  %v8251_v42 = vpack.c.bf16 %v1736_v44, %v1732_v23  ;;  %v1752_v44 = vld [vmem:[#allocation7 + $0x3f0] sm:$0xff] }
 0x787   :  { %9668 = vst [vmem:[#allocation30_spill] sm:$0xff] %v8237_v31  ;;  %9669 = vst [vmem:[#allocation25_spill] sm:$0xff] %v8239_v36  ;;  %v8249_v37 = vpack.c.bf16 %v1734_v38, %v1730_v12  ;;  %v1738_v55 = vld [vmem:[#allocation7 + $0x380] sm:$0xff] }
 0x788   :  { %5852 = vmatpush1.bf16.msra.mxu0 %v8117_v50  ;;  %5916 = vmatpush1.bf16.msra.mxu1 %v8119_v53  ;;  %v1742_v58 = vld [vmem:[#allocation7 + $0x3a0] sm:$0xff] }
 0x789   :  { %5854 = vmatprep.subr.bf16.mxu0 %v8123_v5  ;;  %5918 = vmatprep.subr.bf16.mxu1 %v8125_v11  ;;  %v8261_v12 = vpack.c.bf16 %v1742_v58, %v1738_v55  ;;  %v1746_v23 = vld [vmem:[#allocation7 + $0x3c0] sm:$0xff] }
 0x78c   :  { %5856 = vmatpush1.bf16.msra.mxu0 %v8129_v57  ;;  %5920 = vmatpush1.bf16.msra.mxu1 %v8131_v56 }
 0x78d   :  { %5858 = vmatprep.subr.bf16.mxu0 %v8135_v28  ;;  %5922 = vmatprep.subr.bf16.mxu1 %v8137_v19 }
 0x790   :  { %5860 = vmatpush1.bf16.msra.mxu0 %v8141_v63  ;;  %5924 = vmatpush1.bf16.msra.mxu1 %v8143_v4 }
 0x791   :  { %5862 = vmatprep.subr.bf16.mxu0 %v8147_v16  ;;  %5926 = vmatprep.subr.bf16.mxu1 %v8149_v40 }
 0x794   :  { %5864 = vmatpush1.bf16.msra.mxu0 %v8153_v45  ;;  %5928 = vmatpush1.bf16.msra.mxu1 %v8155_v46 }
 0x795   :  { %5866 = vmatprep.subr.bf16.mxu0 %v8159_v7  ;;  %5930 = vmatprep.subr.bf16.mxu1 %v8161_v10 }
 0x798   :  { %5868 = vmatpush1.bf16.msra.mxu0 %v8165_v20  ;;  %5932 = vmatpush1.bf16.msra.mxu1 %v8167_v21 }
 0x799   :  { %5870 = vmatprep.subr.bf16.mxu0 %v8171_v47  ;;  %5934 = vmatprep.subr.bf16.mxu1 %v8173_v49 }
 0x79c   :  { %5872 = vmatpush1.bf16.msra.mxu0 %v8177_v51  ;;  %5936 = vmatpush1.bf16.msra.mxu1 %v8179_v29 }
 0x79d   :  { %5874 = vmatprep.subr.bf16.mxu0 %v8183_v14  ;;  %5938 = vmatprep.subr.bf16.mxu1 %v8185_v17 }
 0x7a0   :  { %5876 = vmatpush1.bf16.msra.mxu0 %v8189_v15  ;;  %5940 = vmatpush1.bf16.msra.mxu1 %v8191_v24 }
 0x7a1   :  { %5878 = vmatprep.subr.bf16.mxu0 %v8195_v60  ;;  %5942 = vmatprep.subr.bf16.mxu1 %v8197_v61 }
 0x7a4   :  { %5880 = vmatpush1.bf16.msra.mxu0 %v8201_v54  ;;  %5944 = vmatpush1.bf16.msra.mxu1 %v8203_v3 }
 0x7a5   :  { %5882 = vmatprep.subr.bf16.mxu0 %v8207_v30  ;;  %5946 = vmatprep.subr.bf16.mxu1 %v8209_v33 }
 0x7a8   :  { %5884 = vmatpush1.bf16.msra.mxu0 %v8213_v32  ;;  %5948 = vmatpush1.bf16.msra.mxu1 %v8215_v35  ;;  %v1733_v32 = vld [vmem:[#allocation7 + $0x358] sm:$0xff] }
 0x7a9   :  { %5886 = vmatprep.subr.bf16.mxu0 %v8219_v59  ;;  %5950 = vmatprep.subr.bf16.mxu1 %v8221_v2  ;;  %v1737_v35 = vld [vmem:[#allocation7 + $0x378] sm:$0xff]  ;;  %v1739_v2 = vld [vmem:[#allocation7 + $0x388] sm:$0xff] }
 0x7aa   :  { %v8245_v22 = vpack.c.bf16 %v1737_v35, %v1733_v32  ;;  %v1741_v59 = vld [vmem:[#allocation7 + $0x398] sm:$0xff]  ;;  %v1740_v32 = vld [vmem:[#allocation7 + $0x390] sm:$0xff] }
 0x7ab   :  { %v1744_v35 = vld [vmem:[#allocation7 + $0x3b0] sm:$0xff] }
 0x7ac   :  { %5888 = vmatpush1.bf16.msra.mxu0 %v8225_v6  ;;  %5952 = vmatpush1.bf16.msra.mxu1 %v8227_v13  ;;  %v1743_v6 = vld [vmem:[#allocation7 + $0x3a8] sm:$0xff]  ;;  %v1745_v13 = vld [vmem:[#allocation7 + $0x3b8] sm:$0xff]  ;;  %v8263_v38 = vpack.c.bf16 %v1744_v35, %v1740_v32 }
 0x7ad   :  { %5890 = vmatprep.subr.bf16.mxu0 %v8231_v39  ;;  %5954 = vmatprep.subr.bf16.mxu1 %v8233_v43  ;;  %v8255_v0 = vpack.c.bf16 %v1743_v6, %v1739_v2  ;;  %v8257_v41 = vpack.c.bf16 %v1745_v13, %v1741_v59  ;;  %v1747_v43 = vld [vmem:[#allocation7 + $0x3c8] sm:$0xff]  ;;  %v1749_v39 = vld [vmem:[#allocation7 + $0x3d8] sm:$0xff]  ;;  %v1750_v6 = vld [vmem:[#allocation7 + $0x3e0] sm:$0xff] }
 0x7ae   :  { %v1748_v13 = vld [vmem:[#allocation7 + $0x3d0] sm:$0xff]  ;;  %v8273_v55 = vpack.c.bf16 %v1750_v6, %v1746_v23 }
 0x7af   :  { %v8275_v58 = vpack.c.bf16 %v1752_v44, %v1748_v13 }
 0x7b0   :  { %5892 = vmatpush1.bf16.msra.mxu0 %v8237_v31  ;;  %5956 = vmatpush1.bf16.msra.mxu1 %v8239_v36  ;;  %v1751_v31 = vld [vmem:[#allocation7 + $0x3e8] sm:$0xff]  ;;  %v1753_v36 = vld [vmem:[#allocation7 + $0x3f8] sm:$0xff] }
 0x7b1   :  { %5894 = vmatprep.subr.bf16.mxu0 %v8243_v34  ;;  %5958 = vmatprep.subr.bf16.mxu1 %v8245_v22  ;;  %v8267_v59 = vpack.c.bf16 %v1751_v31, %v1747_v43  ;;  %v8269_v2 = vpack.c.bf16 %v1753_v36, %v1749_v39  ;;  %v9670_v39 = vld [vmem:[#allocation38_spill] sm:$0xff] }
 0x7b4   :  { %5896 = vmatpush1.bf16.msra.mxu0 %v8249_v37  ;;  %5960 = vmatpush1.bf16.msra.mxu1 %v8251_v42 }
 0x7b5   :  { %5898 = vmatprep.subr.bf16.mxu0 %v8255_v0  ;;  %5962 = vmatprep.subr.bf16.mxu1 %v8257_v41 }
 0x7b8   :  { %5900 = vmatpush1.bf16.msra.mxu0 %v8261_v12  ;;  %5964 = vmatpush1.bf16.msra.mxu1 %v8263_v38 }
 0x7b9   :  { %5902 = vmatprep.subr.bf16.mxu0 %v8267_v59  ;;  %5966 = vmatprep.subr.bf16.mxu1 %v8269_v2 }
 0x7bc   :  { %5904 = vmatpush1.bf16.msra.mxu0 %v8273_v55  ;;  %5968 = vmatpush1.bf16.msra.mxu1 %v8275_v58 }
 0x7bd   :  { %5970 = vmatprep.subr.bf16.mxu0 %v8072_v18  ;;  %6034 = vmatprep.subr.bf16.mxu1 %v8074_v27  ;;  %v9671_v18 = vld [vmem:[#allocation22_spill] sm:$0xff]  ;;  %v9672_v27 = vld [vmem:[#allocation17_spill] sm:$0xff] }
 0x7bf   :  { %1819 = vmatmul.mubr.f32.vlgmr.msra.gmra.mrb[16].mxu0 %v9670_v39  ;;  %1890 = vmatmul.mubr.f32.vlgmr.msra.gmra.mrb[16].mxu1 %v9670_v39 }
 0x7c0   :  { %5972 = vmatpush1.bf16.msra.mxu0 %v8091_v8  ;;  %6036 = vmatpush1.bf16.msra.mxu1 %v8093_v9  ;;  %v9673_v8 = vld [vmem:[#allocation23_spill] sm:$0xff]  ;;  %v9674_v9 = vld [vmem:[#allocation20_spill] sm:$0xff] }
 0x7c1   :  { %5974 = vmatprep.subr.bf16.mxu0 %v8095_v25  ;;  %6038 = vmatprep.subr.bf16.mxu1 %v8097_v26  ;;  %v9675_v25 = vld [vmem:[#allocation26_spill] sm:$0xff]  ;;  %v9676_v26 = vld [vmem:[#allocation21_spill] sm:$0xff] }
 0x7c4   :  { %5976 = vmatpush1.bf16.msra.mxu0 %v8103_v48  ;;  %6040 = vmatpush1.bf16.msra.mxu1 %v8105_v52  ;;  %v9677_v48 = vld [vmem:[#allocation27_spill] sm:$0xff]  ;;  %v9678_v52 = vld [vmem:[#allocation24_spill] sm:$0xff] }
 0x7c5   :  { %5978 = vmatprep.subr.bf16.mxu0 %v8109_v62  ;;  %6042 = vmatprep.subr.bf16.mxu1 %v8111_v1  ;;  %v9679_v62 = vld [vmem:[#allocation30_spill] sm:$0xff]  ;;  %v9680_v1 = vld [vmem:[#allocation25_spill] sm:$0xff] }
 0x7c8   :  { %5980 = vmatpush1.bf16.msra.mxu0 %v8117_v50  ;;  %6044 = vmatpush1.bf16.msra.mxu1 %v8119_v53  ;;  %v2269_v50 = vld [vmem:[#allocation7 + $0x8] sm:$0xff] }
 0x7c9   :  { %5982 = vmatprep.subr.bf16.mxu0 %v8123_v5  ;;  %6046 = vmatprep.subr.bf16.mxu1 %v8125_v11  ;;  %v2273_v53 = vld [vmem:[#allocation7 + $0x28] sm:$0xff]  ;;  %v2271_v5 = vld [vmem:[#allocation7 + $0x18] sm:$0xff] }
 0x7ca   :  { %v8347_v11 = vpack.c.bf16 %v2273_v53, %v2269_v50 }
 0x7cc   :  { %5984 = vmatpush1.bf16.msra.mxu0 %v8129_v57  ;;  %6048 = vmatpush1.bf16.msra.mxu1 %v8131_v56  ;;  %v2275_v57 = vld [vmem:[#allocation7 + $0x38] sm:$0xff] }
 0x7cd   :  { %5986 = vmatprep.subr.bf16.mxu0 %v8135_v28  ;;  %6050 = vmatprep.subr.bf16.mxu1 %v8137_v19  ;;  %v8349_v56 = vpack.c.bf16 %v2275_v57, %v2271_v5 }
 0x7d0   :  { %5988 = vmatpush1.bf16.msra.mxu0 %v8141_v63  ;;  %6052 = vmatpush1.bf16.msra.mxu1 %v8143_v4  ;;  %v9681_v63 = vld [vmem:[#allocation18_spill] sm:$0xff] }
 0x7d1   :  { %5990 = vmatprep.subr.bf16.mxu0 %v8147_v16  ;;  %6054 = vmatprep.subr.bf16.mxu1 %v8149_v40 }
 0x7d4   :  { %5992 = vmatpush1.bf16.msra.mxu0 %v8153_v45  ;;  %6056 = vmatpush1.bf16.msra.mxu1 %v8155_v46  ;;  %v9682_v45 = vld [vmem:[#allocation19_spill] sm:$0xff] }
 0x7d5   :  { %5994 = vmatprep.subr.bf16.mxu0 %v8159_v7  ;;  %6058 = vmatprep.subr.bf16.mxu1 %v8161_v10 }
 0x7d8   :  { %5996 = vmatpush1.bf16.msra.mxu0 %v8165_v20  ;;  %6060 = vmatpush1.bf16.msra.mxu1 %v8167_v21  ;;  %v9683_v20 = vld [vmem:[#allocation36_spill] sm:$0xff] }
 0x7d9   :  { %5998 = vmatprep.subr.bf16.mxu0 %v8171_v47  ;;  %6062 = vmatprep.subr.bf16.mxu1 %v8173_v49  ;;  %v9684_v49 = vld [vmem:[#allocation37_spill] sm:$0xff] }
 0x7dc   :  { %6000 = vmatpush1.bf16.msra.mxu0 %v8177_v51  ;;  %6064 = vmatpush1.bf16.msra.mxu1 %v8179_v29 }
 0x7dd   :  { %6002 = vmatprep.subr.bf16.mxu0 %v8183_v14  ;;  %6066 = vmatprep.subr.bf16.mxu1 %v8185_v17 }
 0x7e0   :  { %6004 = vmatpush1.bf16.msra.mxu0 %v8189_v15  ;;  %6068 = vmatpush1.bf16.msra.mxu1 %v8191_v24 }
 0x7e1   :  { %6006 = vmatprep.subr.bf16.mxu0 %v8195_v60  ;;  %6070 = vmatprep.subr.bf16.mxu1 %v8197_v61 }
 0x7e4   :  { %6008 = vmatpush1.bf16.msra.mxu0 %v8201_v54  ;;  %6072 = vmatpush1.bf16.msra.mxu1 %v8203_v3 }
 0x7e5   :  { %6010 = vmatprep.subr.bf16.mxu0 %v8207_v30  ;;  %6074 = vmatprep.subr.bf16.mxu1 %v8209_v33  ;;  %v9685_v33 = vld [vmem:[#allocation14_spill] sm:$0xff] }
 0x7e8   :  { %6012 = vmatpush1.bf16.msra.mxu0 %v9671_v18  ;;  %6076 = vmatpush1.bf16.msra.mxu1 %v9672_v27 }
 0x7e9   :  { %6014 = vmatprep.subr.bf16.mxu0 %v9673_v8  ;;  %6078 = vmatprep.subr.bf16.mxu1 %v9674_v9 }
 0x7ec   :  { %6016 = vmatpush1.bf16.msra.mxu0 %v9675_v25  ;;  %6080 = vmatpush1.bf16.msra.mxu1 %v9676_v26 }
 0x7ed   :  { %6018 = vmatprep.subr.bf16.mxu0 %v9677_v48  ;;  %6082 = vmatprep.subr.bf16.mxu1 %v9678_v52 }
 0x7f0   :  { %6020 = vmatpush1.bf16.msra.mxu0 %v9679_v62  ;;  %6084 = vmatpush1.bf16.msra.mxu1 %v9680_v1 }
 0x7f1   :  { %6022 = vmatprep.subr.bf16.mxu0 %v8243_v34  ;;  %6086 = vmatprep.subr.bf16.mxu1 %v8245_v22 }
 0x7f4   :  { %6024 = vmatpush1.bf16.msra.mxu0 %v8249_v37  ;;  %6088 = vmatpush1.bf16.msra.mxu1 %v8251_v42  ;;  %v84_v37 = vld [vmem:[%s9330_s4] sm:$0xf] }
 0x7f5   :  { %6026 = vmatprep.subr.bf16.mxu0 %v8255_v0  ;;  %6090 = vmatprep.subr.bf16.mxu1 %v8257_v41  ;;  %v9687_v42 = vld [vmem:[#allocation15_spill] sm:$0xff] }
 0x7f6   :  { %v9688_v0 = vsub.s32 0, %v9687_v42  ;;  %v9690_v32 = vsub.s32 1, %v9687_v42  ;;  %v9692_v18 = vsub.s32 2, %v9687_v42 }
 0x7f8   :  { %6028 = vmatpush1.bf16.msra.mxu0 %v8261_v12  ;;  %6092 = vmatpush1.bf16.msra.mxu1 %v8263_v38  ;;  %v8365_v41 = vrot.slane %v84_v37, %v9688_v0  ;;  %v8369_v35 = vrot.slane %v84_v37, %v9690_v32  ;;  %v8380_v27 = vrot.slane %v84_v37, %v9692_v18 }
 0x7f9   :  { %6030 = vmatprep.subr.bf16.mxu0 %v8267_v59  ;;  %6094 = vmatprep.subr.bf16.mxu1 %v8269_v2 }
 0x7fa   :  { %9689 = vst [vmem:[#allocation28_spill] sm:$0xff] %v8365_v41 }
 0x7fc   :  { %6032 = vmatpush1.bf16.msra.mxu0 %v8273_v55  ;;  %6096 = vmatpush1.bf16.msra.mxu1 %v8275_v58  ;;  %v9691_v55 = vsub.s32 3, %v9687_v42 }
 0x7fd   :  { %6098 = vmatprep.subr.bf16.mxu0 %v8347_v11  ;;  %6162 = vmatprep.subr.bf16.mxu1 %v8349_v56 }
 0x7fe   :  { %v8375_v58 = vrot.slane %v84_v37, %v9691_v55  ;;  %v9693_v37 = vld [vmem:[#allocation39_spill] sm:$0xff] }
 0x7ff   :  { %v2295_v55 = vld [vmem:[#allocation7 + $0xd8] sm:$0xff] }
 0x852   :  { %v1526_v28 = vpop.f32.mrb[14].mxu0  ;;  %v1597_v19 = vpop.f32.mrb[14].mxu1 }
 0x853   :  { %v1527_v4 = vadd.f32 %v1526_v28, %v9681_v63  ;;  %v1528_v16 = vpop.f32.mrb[15].mxu0  ;;  %v1599_v40 = vpop.f32.mrb[15].mxu1  ;;  %v1598_v51 = vadd.f32 %v1597_v19, %v9684_v49  ;;  %v7234_v63 = vmov 1966171168   ;;  %v2279_v49 = vld [vmem:[#allocation7 + $0x58] sm:$0xff] }
 0x854   :  { %v1529_v46 = vadd.f32 %v1528_v16, %v9682_v45  ;;  %v1600_v21 = vadd.f32 %v1599_v40, %v9683_v20  ;;  %v2268_v40 = vld [vmem:[#allocation7] sm:$0xff] }
 0x855   :  { %v4654_v7 = vmul.f32 -1.442695, %v1527_v4  ;;  %v1922_v4 = vunpack.c.l.s4 %v7234_v63  ;;  %v2272_v45 = vld [vmem:[#allocation7 + $0x20] sm:$0xff]  ;;  %v2307_v63 = vld [vmem:[#allocation7 + $0x138] sm:$0xff] }
 0x856   :  { %v4655_v10 = vmul.f32 -1.442695, %v1529_v46  ;;  %v4656_v47 = vmul.f32 -1.442695, %v1600_v21  ;;  %v2270_v46 = vld [vmem:[#allocation7 + $0x10] sm:$0xff] }
 0x857   :  { %7013 = vpow2.f32 %v4654_v7  ;;  %v1923_v16 = vunpack.c.0.s8 %v1922_v4  ;;  %v2274_v7 = vld [vmem:[#allocation7 + $0x30] sm:$0xff]  ;;  %v2300_v4 = vld [vmem:[#allocation7 + $0x100] sm:$0xff] }
 0x858   :  { %7015 = vpow2.f32 %v4655_v10  ;;  %v2277_v10 = vld [vmem:[#allocation7 + $0x48] sm:$0xff] }
 0x859   :  { %7017 = vpow2.f32 %v4656_v47  ;;  %v8387_v21 = vsub.s32 %v1923_v16, %v9687_v42  ;;  %v2281_v47 = vld [vmem:[#allocation7 + $0x68] sm:$0xff]  ;;  %v2304_v16 = vld [vmem:[#allocation7 + $0x120] sm:$0xff] }
 0x85a   :  { %7019 = vtanh.f32 %v1598_v51  ;;  %v2283_v51 = vld [vmem:[#allocation7 + $0x78] sm:$0xff] }
 0x861   :  { %v7014_v29 = vpop.eup %7013 }
 0x862   :  { %v7016_v14 = vpop.eup %7015  ;;  %v1605_v17 = vadd.f32 1.0, %v7014_v29 }
 0x863   :  { %v1611_v15 = vadd.f32 1.0, %v7016_v14  ;;  %v7018_v24 = vpop.eup %7017 }
 0x864   :  { %7021 = vrcp.f32 %v1605_v17  ;;  %v7020_v60 = vpop.eup %7019  ;;  %v1618_v54 = vadd.f32 1.0, %v7018_v24  ;;  %v8389_v17 = vpack.c.bf16 %v2272_v45, %v2268_v40  ;;  %v2276_v24 = vld [vmem:[#allocation7 + $0x40] sm:$0xff]  ;;  %v8438_v45 = vpack.c.bf16 %v2304_v16, %v2300_v4  ;;  %v2326_v4 = vld [vmem:[#allocation7 + $0x1d0] sm:$0xff] }
 0x865   :  { %7023 = vrcp.f32 %v1611_v15  ;;  %v8391_v15 = vpack.c.bf16 %v2274_v7, %v2270_v46  ;;  %v2302_v46 = vld [vmem:[#allocation7 + $0x110] sm:$0xff] }
 0x866   :  { %7025 = vrcp.f32 %v1618_v54  ;;  %v8395_v54 = vpack.c.bf16 %v2283_v51, %v2279_v49  ;;  %v2306_v7 = vld [vmem:[#allocation7 + $0x130] sm:$0xff]  ;;  %v2311_v49 = vld [vmem:[#allocation7 + $0x158] sm:$0xff] }
 0x867   :  { %v2330_v16 = vld [vmem:[#allocation7 + $0x1f0] sm:$0xff] }
 0x86e   :  { %v7022_v61 = vpop.eup %7021 }
 0x86f   :  { %v7024_v3 = vpop.eup %7023  ;;  %v1622_v30 = vmul.f32 %v7022_v61, %v7020_v60  ;;  %v2280_v60 = vld [vmem:[#allocation7 + $0x60] sm:$0xff]  ;;  %v8393_v61 = vpack.c.bf16 %v2281_v47, %v2277_v10  ;;  %v8441_v10 = vpack.c.bf16 %v2306_v7, %v2302_v46  ;;  %v2313_v47 = vld [vmem:[#allocation7 + $0x168] sm:$0xff]  ;;  %v8477_v46 = vpack.c.bf16 %v2330_v16, %v2326_v4 }
 0x870   :  { %v1621_v43 = vmul.f32 %v7024_v3, %v9685_v33  ;;  %v7026_v36 = vpop.eup %7025  ;;  %v2278_v3 = vld [vmem:[#allocation7 + $0x50] sm:$0xff]  ;;  %v2285_v33 = vld [vmem:[#allocation7 + $0x88] sm:$0xff]  ;;  %v8402_v0 = vpack.c.bf16 %v2280_v60, %v2276_v24  ;;  %v2312_v24 = vld [vmem:[#allocation7 + $0x160] sm:$0xff] }
 0x871   :  { %v2333_v7 = vld [vmem:[#allocation7 + $0x208] sm:$0xff] }
 0x872   :  { %v1623_v31 = vadd.f32 %v1622_v30, %v1621_v43  ;;  %v2282_v30 = vld [vmem:[#allocation7 + $0x70] sm:$0xff]  ;;  %v2349_v16 = vld [vmem:[#allocation7 + $0x288] sm:$0xff] }
 0x873   :  { %v8404_v32 = vpack.c.bf16 %v2282_v30, %v2278_v3  ;;  %v2310_v30 = vld [vmem:[#allocation7 + $0x150] sm:$0xff] }
 0x874   :  { %7027 = vtanh.f32 %v1623_v31  ;;  %v2289_v31 = vld [vmem:[#allocation7 + $0xa8] sm:$0xff] }
 0x87e   :  { %v7028_v34 = vpop.eup %7027 }
 0x87f   :  { %v8358_v22 = vmul.f32 %v7028_v34, %v7026_v36  ;;  %v2287_v36 = vld [vmem:[#allocation7 + $0x98] sm:$0xff] }
 0x880   :  { %v2291_v34 = vld [vmem:[#allocation7 + $0xb8] sm:$0xff] }
 0x881   :  { %9686 = vst [vmem:[#allocation31_spill] sm:$0xff] %v8358_v22 }
 0x892   :  { %v1820_v12 = vpop.f32.mrb[16].mxu0  ;;  %v1891_v38 = vpop.f32.mrb[16].mxu1 }
 0x893   :  { %v1821_v23 = vadd.f32 %v1820_v12, %v8365_v41  ;;  %v1822_v59 = vpop.f32.mrb[17].mxu0  ;;  %v1893_v2 = vpop.f32.mrb[17].mxu1  ;;  %v1892_v9 = vadd.f32 %v1891_v38, %v8380_v27  ;;  %v2284_v12 = vld [vmem:[#allocation7 + $0x80] sm:$0xff] }
 0x894   :  { %v1823_v6 = vadd.f32 %v1822_v59, %v8369_v35  ;;  %v1894_v39 = vadd.f32 %v1893_v2, %v8375_v58  ;;  %v2288_v38 = vld [vmem:[#allocation7 + $0xa0] sm:$0xff]  ;;  %v8410_v59 = vpack.c.bf16 %v2291_v34, %v2287_v36  ;;  %v2286_v2 = vld [vmem:[#allocation7 + $0x90] sm:$0xff]  ;;  %v2321_v36 = vld [vmem:[#allocation7 + $0x1a8] sm:$0xff] }
 0x895   :  { %v4657_v13 = vmul.f32 -1.442695, %v1821_v23  ;;  %v8408_v23 = vpack.c.bf16 %v2289_v31, %v2285_v33  ;;  %v8414_v18 = vpack.c.bf16 %v2288_v38, %v2284_v12  ;;  %v2314_v33 = vld [vmem:[#allocation7 + $0x170] sm:$0xff]  ;;  %v2317_v31 = vld [vmem:[#allocation7 + $0x188] sm:$0xff]  ;;  %v2319_v34 = vld [vmem:[#allocation7 + $0x198] sm:$0xff] }
 0x896   :  { %v4658_v44 = vmul.f32 -1.442695, %v1823_v6  ;;  %v4659_v8 = vmul.f32 -1.442695, %v1894_v39  ;;  %v2290_v6 = vld [vmem:[#allocation7 + $0xb0] sm:$0xff]  ;;  %v2299_v39 = vld [vmem:[#allocation7 + $0xf8] sm:$0xff] }
 0x897   :  { %7029 = vpow2.f32 %v4657_v13  ;;  %v2293_v13 = vld [vmem:[#allocation7 + $0xc8] sm:$0xff]  ;;  %v2316_v12 = vld [vmem:[#allocation7 + $0x180] sm:$0xff] }
 0x898   :  { %7031 = vpow2.f32 %v4658_v44  ;;  %v2297_v44 = vld [vmem:[#allocation7 + $0xe8] sm:$0xff]  ;;  %v2320_v38 = vld [vmem:[#allocation7 + $0x1a0] sm:$0xff] }
 0x899   :  { %7033 = vpow2.f32 %v4659_v8  ;;  %v8416_v8 = vpack.c.bf16 %v2290_v6, %v2286_v2  ;;  %v8462_v6 = vpack.c.bf16 %v2320_v38, %v2316_v12  ;;  %v2345_v12 = vld [vmem:[#allocation7 + $0x268] sm:$0xff]  ;;  %v2343_v38 = vld [vmem:[#allocation7 + $0x258] sm:$0xff] }
 0x89a   :  { %7035 = vtanh.f32 %v1892_v9  ;;  %v2292_v9 = vld [vmem:[#allocation7 + $0xc0] sm:$0xff] }
 0x8a1   :  { %v7030_v25 = vpop.eup %7029 }
 0x8a2   :  { %v7032_v26 = vpop.eup %7031  ;;  %v1899_v48 = vadd.f32 1.0, %v7030_v25  ;;  %v8420_v25 = vpack.c.bf16 %v2297_v44, %v2293_v13  ;;  %v2318_v13 = vld [vmem:[#allocation7 + $0x190] sm:$0xff] }
 0x8a3   :  { %v1905_v52 = vadd.f32 1.0, %v7032_v26  ;;  %v7034_v62 = vpop.eup %7033  ;;  %v8422_v26 = vpack.c.bf16 %v2299_v39, %v2295_v55  ;;  %v2322_v44 = vld [vmem:[#allocation7 + $0x1b0] sm:$0xff]  ;;  %v2325_v39 = vld [vmem:[#allocation7 + $0x1c8] sm:$0xff] }
 0x8a4   :  { %7037 = vrcp.f32 %v1899_v48  ;;  %v7036_v1 = vpop.eup %7035  ;;  %v1912_v57 = vadd.f32 1.0, %v7034_v62  ;;  %v2296_v48 = vld [vmem:[#allocation7 + $0xe0] sm:$0xff]  ;;  %v2298_v62 = vld [vmem:[#allocation7 + $0xf0] sm:$0xff]  ;;  %v8465_v55 = vpack.c.bf16 %v2322_v44, %v2318_v13  ;;  %v2347_v44 = vld [vmem:[#allocation7 + $0x278] sm:$0xff] }
 0x8a5   :  { %7039 = vrcp.f32 %v1905_v52  ;;  %v2294_v52 = vld [vmem:[#allocation7 + $0xd0] sm:$0xff] }
 0x8a6   :  { %7041 = vrcp.f32 %v1912_v57  ;;  %v2303_v57 = vld [vmem:[#allocation7 + $0x118] sm:$0xff] }
 0x8a7   :  { %v8436_v40 = vpack.c.bf16 %v2307_v63, %v2303_v57 }
 0x8ae   :  { %v7038_v50 = vpop.eup %7037 }
 0x8af   :  { %v7040_v53 = vpop.eup %7039  ;;  %v1916_v5 = vmul.f32 %v7038_v50, %v7036_v1  ;;  %v8426_v1 = vpack.c.bf16 %v2296_v48, %v2292_v9  ;;  %v8428_v50 = vpack.c.bf16 %v2298_v62, %v2294_v52  ;;  %v2329_v9 = vld [vmem:[#allocation7 + $0x1e8] sm:$0xff]  ;;  %v2327_v48 = vld [vmem:[#allocation7 + $0x1d8] sm:$0xff] }
 0x8b0   :  { %v1915_v28 = vmul.f32 0.0, %v7040_v53  ;;  %v7042_v20 = vpop.eup %7041  ;;  %v2301_v53 = vld [vmem:[#allocation7 + $0x108] sm:$0xff]  ;;  %v8470_v52 = vpack.c.bf16 %v2329_v9, %v2325_v39  ;;  %v2331_v62 = vld [vmem:[#allocation7 + $0x1f8] sm:$0xff]  ;;  %v2340_v39 = vld [vmem:[#allocation7 + $0x240] sm:$0xff] }
 0x8b1   :  { %v8472_v57 = vpack.c.bf16 %v2331_v62, %v2327_v48  ;;  %v2344_v9 = vld [vmem:[#allocation7 + $0x260] sm:$0xff]  ;;  %v8496_v48 = vpack.c.bf16 %v2347_v44, %v2343_v38  ;;  %v2357_v44 = vld [vmem:[#allocation7 + $0x2c8] sm:$0xff] }
 0x8b2   :  { %v8383_v19 = vadd.f32 %v1916_v5, %v1915_v28  ;;  %v2305_v5 = vld [vmem:[#allocation7 + $0x128] sm:$0xff]  ;;  %v8498_v62 = vpack.c.bf16 %v2344_v9, %v2340_v39  ;;  %v2359_v9 = vld [vmem:[#allocation7 + $0x2d8] sm:$0xff] }
 0x8b3   :  { %v8434_v28 = vpack.c.bf16 %v2305_v5, %v2301_v53  ;;  %v2324_v53 = vld [vmem:[#allocation7 + $0x1c0] sm:$0xff]  ;;  %v2361_v39 = vld [vmem:[#allocation7 + $0x2e8] sm:$0xff] }
 0x8b4   :  { %7043 = vtanh.f32 %v8383_v19  ;;  %v2328_v5 = vld [vmem:[#allocation7 + $0x1e0] sm:$0xff] }
 0x8b5   :  { %v8474_v63 = vpack.c.bf16 %v2328_v5, %v2324_v53  ;;  %v2342_v53 = vld [vmem:[#allocation7 + $0x250] sm:$0xff] }
 0x8b6   :  { %v2346_v5 = vld [vmem:[#allocation7 + $0x270] sm:$0xff] }
 0x8b7   :  { %v8501_v4 = vpack.c.bf16 %v2346_v5, %v2342_v53  ;;  %v8518_v53 = vpack.c.bf16 %v2361_v39, %v2357_v44  ;;  %v2363_v5 = vld [vmem:[#allocation7 + $0x2f8] sm:$0xff]  ;;  %v2369_v44 = vld [vmem:[#allocation7 + $0x328] sm:$0xff] }
 0x8b8   :  { %v2367_v39 = vld [vmem:[#allocation7 + $0x318] sm:$0xff] }
 0x8b9   :  { %9694 = vst [vmem:[#allocation33_spill] sm:$0xff] %v8501_v4  ;;  %9699 = vst [vmem:[#allocation38_spill] sm:$0xff] %v8518_v53 }
 0x8be   :  { %v7044_v29 = vpop.eup %7043 }
 0x8bf   :  { %v1919_v14 = vmul.f32 %v7044_v29, %v7042_v20  ;;  %v2309_v20 = vld [vmem:[#allocation7 + $0x148] sm:$0xff]  ;;  %v2315_v29 = vld [vmem:[#allocation7 + $0x178] sm:$0xff] }
 0x8c0   :  { %v8446_v51 = vpack.c.bf16 %v2313_v47, %v2309_v20  ;;  %v8448_v60 = vpack.c.bf16 %v2315_v29, %v2311_v49  ;;  %v2337_v20 = vld [vmem:[#allocation7 + $0x228] sm:$0xff]  ;;  %v2335_v47 = vld [vmem:[#allocation7 + $0x218] sm:$0xff] }
 0x8c1   :  { %v1927_v43 = vrot.slane %v1919_v14, %v8387_v21  ;;  %2139 = vmatprep.mubr.f32.mxu0 %v1919_v14  ;;  %2210 = vmatprep.mubr.f32.mxu1 %v1919_v14  ;;  %v2308_v14 = vld [vmem:[#allocation7 + $0x140] sm:$0xff]  ;;  %v8482_v49 = vpack.c.bf16 %v2337_v20, %v2333_v7  ;;  %v2339_v29 = vld [vmem:[#allocation7 + $0x238] sm:$0xff]  ;;  %v2353_v7 = vld [vmem:[#allocation7 + $0x2a8] sm:$0xff] }
 0x8c2   :  { %2140 = vmatmul.mubr.f32.vlgmr.msra.gmra.mrb[18].mxu0 %v9693_v37  ;;  %2211 = vmatmul.mubr.f32.vlgmr.msra.gmra.mrb[18].mxu1 %v9693_v37  ;;  %v8450_v3 = vpack.c.bf16 %v2312_v24, %v2308_v14  ;;  %v8458_v37 = vpack.c.bf16 %v2321_v36, %v2317_v31  ;;  %v2332_v14 = vld [vmem:[#allocation7 + $0x200] sm:$0xff]  ;;  %v2334_v31 = vld [vmem:[#allocation7 + $0x210] sm:$0xff]  ;;  %v2351_v20 = vld [vmem:[#allocation7 + $0x298] sm:$0xff] }
 0x8c3   :  { %v1928_v42 = vcombine.high %v1927_v43, %v1927_v43  ;;  %4660 = vst.sshfl [vmem:[#allocation2] sm:$0x1 pattern:$0x73625140] %v1927_v43  ;;  %6100 = vmatpush1.bf16.msra.mxu0 %v8389_v17  ;;  %6164 = vmatpush1.bf16.msra.mxu1 %v8391_v15  ;;  %v8453_v43 = vpack.c.bf16 %v2314_v33, %v2310_v30  ;;  %v2336_v24 = vld [vmem:[#allocation7 + $0x220] sm:$0xff]  ;;  %v2338_v36 = vld [vmem:[#allocation7 + $0x230] sm:$0xff] }
 0x8c4   :  { %6102 = vmatprep.subr.bf16.mxu0 %v8393_v61  ;;  %6166 = vmatprep.subr.bf16.mxu1 %v8395_v54  ;;  %v8484_v30 = vpack.c.bf16 %v2339_v29, %v2335_v47  ;;  %v8486_v33 = vpack.c.bf16 %v2336_v24, %v2332_v14  ;;  %v8506_v47 = vpack.c.bf16 %v2353_v7, %v2349_v16  ;;  %v2355_v29 = vld [vmem:[#allocation7 + $0x2b8] sm:$0xff]  ;;  %v2348_v14 = vld [vmem:[#allocation7 + $0x280] sm:$0xff] }
 0x8c5   :  { %4661 = vst.sshfl [vmem:[#allocation2 + $0x8] sm:$0x1 pattern:$0x73625140] %v1928_v42  ;;  %v2323_v42 = vld [vmem:[#allocation7 + $0x1b8] sm:$0xff]  ;;  %v2352_v24 = vld [vmem:[#allocation7 + $0x2a0] sm:$0xff] }
 0x8c6   :  { %v8460_v2 = vpack.c.bf16 %v2323_v42, %v2319_v34  ;;  %v8489_v34 = vpack.c.bf16 %v2338_v36, %v2334_v31  ;;  %v2341_v42 = vld [vmem:[#allocation7 + $0x248] sm:$0xff]  ;;  %9695 = vst [vmem:[#allocation29_spill] sm:$0xff] %v8506_v47  ;;  %v8508_v31 = vpack.c.bf16 %v2355_v29, %v2351_v20  ;;  %v8510_v36 = vpack.c.bf16 %v2352_v24, %v2348_v14  ;;  %v2356_v16 = vld [vmem:[#allocation7 + $0x2c0] sm:$0xff]  ;;  %v2358_v14 = vld [vmem:[#allocation7 + $0x2d0] sm:$0xff] }
 0x8c7   :  { %6104 = vmatpush1.bf16.msra.mxu0 %v8402_v0  ;;  %6168 = vmatpush1.bf16.msra.mxu1 %v8404_v32  ;;  %v8494_v13 = vpack.c.bf16 %v2345_v12, %v2341_v42  ;;  %v2350_v42 = vld [vmem:[#allocation7 + $0x290] sm:$0xff]  ;;  %v2360_v7 = vld [vmem:[#allocation7 + $0x2e0] sm:$0xff]  ;;  %v8520_v20 = vpack.c.bf16 %v2363_v5, %v2359_v9  ;;  %v2371_v9 = vld [vmem:[#allocation7 + $0x338] sm:$0xff] }
 0x8c8   :  { %6106 = vmatprep.subr.bf16.mxu0 %v8408_v23  ;;  %6170 = vmatprep.subr.bf16.mxu1 %v8410_v59  ;;  %9696 = vst [vmem:[#allocation34_spill] sm:$0xff] %v8508_v31  ;;  %9697 = vst [vmem:[#allocation32_spill] sm:$0xff] %v8510_v36  ;;  %v2354_v12 = vld [vmem:[#allocation7 + $0x2b0] sm:$0xff]  ;;  %v8522_v29 = vpack.c.bf16 %v2360_v7, %v2356_v16  ;;  %v2364_v5 = vld [vmem:[#allocation7 + $0x300] sm:$0xff]  ;;  %v8532_v7 = vpack.c.bf16 %v2371_v9, %v2367_v39 }
 0x8c9   :  { %v8513_v38 = vpack.c.bf16 %v2354_v12, %v2350_v42  ;;  %9700 = vst [vmem:[#allocation22_spill] sm:$0xff] %v8520_v20  ;;  %v2362_v24 = vld [vmem:[#allocation7 + $0x2f0] sm:$0xff]  ;;  %v2365_v12 = vld [vmem:[#allocation7 + $0x308] sm:$0xff]  ;;  %v2368_v16 = vld [vmem:[#allocation7 + $0x320] sm:$0xff] }
 0x8ca   :  { %9701 = vst [vmem:[#allocation17_spill] sm:$0xff] %v8522_v29  ;;  %v8525_v42 = vpack.c.bf16 %v2362_v24, %v2358_v14  ;;  %v8530_v22 = vpack.c.bf16 %v2369_v44, %v2365_v12  ;;  %9704 = vst [vmem:[#allocation26_spill] sm:$0xff] %v8532_v7  ;;  %v2366_v14 = vld [vmem:[#allocation7 + $0x310] sm:$0xff]  ;;  %v2372_v39 = vld [vmem:[#allocation7 + $0x340] sm:$0xff] }
 0x8cb   :  { %6108 = vmatpush1.bf16.msra.mxu0 %v8414_v18  ;;  %6172 = vmatpush1.bf16.msra.mxu1 %v8416_v8  ;;  %9698 = vst [vmem:[#allocation35_spill] sm:$0xff] %v8513_v38  ;;  %v2370_v24 = vld [vmem:[#allocation7 + $0x330] sm:$0xff]  ;;  %v2376_v9 = vld [vmem:[#allocation7 + $0x360] sm:$0xff] }
 0x8cc   :  { %6110 = vmatprep.subr.bf16.mxu0 %v8420_v25  ;;  %6174 = vmatprep.subr.bf16.mxu1 %v8422_v26  ;;  %9702 = vst [vmem:[#allocation23_spill] sm:$0xff] %v8525_v42  ;;  %9703 = vst [vmem:[#allocation20_spill] sm:$0xff] %v8530_v22 }
 0x8cf   :  { %6112 = vmatpush1.bf16.msra.mxu0 %v8426_v1  ;;  %6176 = vmatpush1.bf16.msra.mxu1 %v8428_v50 }
 0x8d0   :  { %6114 = vmatprep.subr.bf16.mxu0 %v8434_v28  ;;  %6178 = vmatprep.subr.bf16.mxu1 %v8436_v40 }
 0x8d3   :  { %6116 = vmatpush1.bf16.msra.mxu0 %v8438_v45  ;;  %6180 = vmatpush1.bf16.msra.mxu1 %v8441_v10 }
 0x8d4   :  { %6118 = vmatprep.subr.bf16.mxu0 %v8446_v51  ;;  %6182 = vmatprep.subr.bf16.mxu1 %v8448_v60 }
 0x8d7   :  { %6120 = vmatpush1.bf16.msra.mxu0 %v8450_v3  ;;  %6184 = vmatpush1.bf16.msra.mxu1 %v8453_v43 }
 0x8d8   :  { %6122 = vmatprep.subr.bf16.mxu0 %v8458_v37  ;;  %6186 = vmatprep.subr.bf16.mxu1 %v8460_v2 }
 0x8db   :  { %6124 = vmatpush1.bf16.msra.mxu0 %v8462_v6  ;;  %6188 = vmatpush1.bf16.msra.mxu1 %v8465_v55 }
 0x8dc   :  { %6126 = vmatprep.subr.bf16.mxu0 %v8470_v52  ;;  %6190 = vmatprep.subr.bf16.mxu1 %v8472_v57 }
 0x8df   :  { %6128 = vmatpush1.bf16.msra.mxu0 %v8474_v63  ;;  %6192 = vmatpush1.bf16.msra.mxu1 %v8477_v46 }
 0x8e0   :  { %6130 = vmatprep.subr.bf16.mxu0 %v8482_v49  ;;  %6194 = vmatprep.subr.bf16.mxu1 %v8484_v30 }
 0x8e3   :  { %6132 = vmatpush1.bf16.msra.mxu0 %v8486_v33  ;;  %6196 = vmatpush1.bf16.msra.mxu1 %v8489_v34 }
 0x8e4   :  { %6134 = vmatprep.subr.bf16.mxu0 %v8494_v13  ;;  %6198 = vmatprep.subr.bf16.mxu1 %v8496_v48 }
 0x8e7   :  { %6136 = vmatpush1.bf16.msra.mxu0 %v8498_v62  ;;  %6200 = vmatpush1.bf16.msra.mxu1 %v8501_v4  ;;  %v2391_v4 = vld [vmem:[#allocation7 + $0x3d8] sm:$0xff] }
 0x8e8   :  { %6138 = vmatprep.subr.bf16.mxu0 %v8506_v47  ;;  %6202 = vmatprep.subr.bf16.mxu1 %v8508_v31  ;;  %v2379_v31 = vld [vmem:[#allocation7 + $0x378] sm:$0xff]  ;;  %v2389_v47 = vld [vmem:[#allocation7 + $0x3c8] sm:$0xff] }
 0x8eb   :  { %6140 = vmatpush1.bf16.msra.mxu0 %v8510_v36  ;;  %6204 = vmatpush1.bf16.msra.mxu1 %v8513_v38  ;;  %v8534_v38 = vpack.c.bf16 %v2368_v16, %v2364_v5  ;;  %v2375_v36 = vld [vmem:[#allocation7 + $0x358] sm:$0xff]  ;;  %v2374_v5 = vld [vmem:[#allocation7 + $0x350] sm:$0xff]  ;;  %v8546_v16 = vpack.c.bf16 %v2376_v9, %v2372_v39 }
 0x8ec   :  { %6142 = vmatprep.subr.bf16.mxu0 %v8518_v53  ;;  %6206 = vmatprep.subr.bf16.mxu1 %v8520_v20  ;;  %v2373_v53 = vld [vmem:[#allocation7 + $0x348] sm:$0xff]  ;;  %v8543_v44 = vpack.c.bf16 %v2379_v31, %v2375_v36  ;;  %v2383_v31 = vld [vmem:[#allocation7 + $0x398] sm:$0xff]  ;;  %v2386_v39 = vld [vmem:[#allocation7 + $0x3b0] sm:$0xff] }
 0x8ed   :  { %9705 = vst [vmem:[#allocation21_spill] sm:$0xff] %v8534_v38  ;;  %v2377_v20 = vld [vmem:[#allocation7 + $0x368] sm:$0xff]  ;;  %9708 = vst [vmem:[#allocation30_spill] sm:$0xff] %v8546_v16  ;;  %v2387_v36 = vld [vmem:[#allocation7 + $0x3b8] sm:$0xff] }
 0x8ee   :  { %v8541_v12 = vpack.c.bf16 %v2377_v20, %v2373_v53  ;;  %v2380_v20 = vld [vmem:[#allocation7 + $0x380] sm:$0xff] }
 0x8ef   :  { %6144 = vmatpush1.bf16.msra.mxu0 %v8522_v29  ;;  %6208 = vmatpush1.bf16.msra.mxu1 %v8525_v42  ;;  %v8537_v29 = vpack.c.bf16 %v2370_v24, %v2366_v14  ;;  %v2378_v14 = vld [vmem:[#allocation7 + $0x370] sm:$0xff]  ;;  %v2381_v24 = vld [vmem:[#allocation7 + $0x388] sm:$0xff]  ;;  %v2384_v42 = vld [vmem:[#allocation7 + $0x3a0] sm:$0xff] }
 0x8f0   :  { %6146 = vmatprep.subr.bf16.mxu0 %v8530_v22  ;;  %6210 = vmatprep.subr.bf16.mxu1 %v8532_v7  ;;  %9707 = vst [vmem:[#allocation24_spill] sm:$0xff] %v8541_v12  ;;  %v2385_v22 = vld [vmem:[#allocation7 + $0x3a8] sm:$0xff]  ;;  %v8550_v7 = vpack.c.bf16 %v2378_v14, %v2374_v5  ;;  %v8557_v9 = vpack.c.bf16 %v2384_v42, %v2380_v20  ;;  %v2395_v14 = vld [vmem:[#allocation7 + $0x3f8] sm:$0xff]  ;;  %v2390_v42 = vld [vmem:[#allocation7 + $0x3d0] sm:$0xff] }
 0x8f1   :  { %9706 = vst [vmem:[#allocation27_spill] sm:$0xff] %v8537_v29  ;;  %v8552_v53 = vpack.c.bf16 %v2385_v22, %v2381_v24  ;;  %v2388_v24 = vld [vmem:[#allocation7 + $0x3c0] sm:$0xff]  ;;  %v2394_v20 = vld [vmem:[#allocation7 + $0x3f0] sm:$0xff] }
 0x8f3   :  { %6148 = vmatpush1.bf16.msra.mxu0 %v8534_v38  ;;  %6212 = vmatpush1.bf16.msra.mxu1 %v8537_v29  ;;  %v8554_v38 = vpack.c.bf16 %v2387_v36, %v2383_v31  ;;  %v2382_v29 = vld [vmem:[#allocation7 + $0x390] sm:$0xff]  ;;  %v2392_v31 = vld [vmem:[#allocation7 + $0x3e0] sm:$0xff]  ;;  %v8566_v36 = vpack.c.bf16 %v2395_v14, %v2391_v4 }
 0x8f4   :  { %6150 = vmatprep.subr.bf16.mxu0 %v8541_v12  ;;  %6214 = vmatprep.subr.bf16.mxu1 %v8543_v44  ;;  %v2393_v12 = vld [vmem:[#allocation7 + $0x3e8] sm:$0xff]  ;;  %v8561_v22 = vpack.c.bf16 %v2386_v39, %v2382_v29  ;;  %v8573_v29 = vpack.c.bf16 %v2394_v20, %v2390_v42 }
 0x8f5   :  { %v8563_v5 = vpack.c.bf16 %v2393_v12, %v2389_v47  ;;  %9710 = vst [vmem:[#allocation18_spill] sm:$0xff] %v8566_v36 }
 0x8f6   :  { %9712 = vst [vmem:[#allocation36_spill] sm:$0xff] %v8573_v29 }
 0x8f7   :  { %6152 = vmatpush1.bf16.msra.mxu0 %v8546_v16  ;;  %6216 = vmatpush1.bf16.msra.mxu1 %v8550_v7  ;;  %9709 = vst [vmem:[#allocation25_spill] sm:$0xff] %v8563_v5  ;;  %v8569_v16 = vpack.c.bf16 %v2392_v31, %v2388_v24 }
 0x8f8   :  { %6154 = vmatprep.subr.bf16.mxu0 %v8552_v53  ;;  %6218 = vmatprep.subr.bf16.mxu1 %v8554_v38 }
 0x8f9   :  { %9711 = vst [vmem:[#allocation19_spill] sm:$0xff] %v8569_v16 }
 0x8fb   :  { %6156 = vmatpush1.bf16.msra.mxu0 %v8557_v9  ;;  %6220 = vmatpush1.bf16.msra.mxu1 %v8561_v22 }
 0x8fc   :  { %6158 = vmatprep.subr.bf16.mxu0 %v8563_v5  ;;  %6222 = vmatprep.subr.bf16.mxu1 %v8566_v36 }
 0x8ff   :  { %6160 = vmatpush1.bf16.msra.mxu0 %v8569_v16  ;;  %6224 = vmatpush1.bf16.msra.mxu1 %v8573_v29 }
 0x900   :  { %6226 = vmatprep.subr.bf16.mxu0 %v8347_v11  ;;  %6290 = vmatprep.subr.bf16.mxu1 %v8349_v56 }
 0x995   :  { %v2141_v4 = vpop.f32.mrb[18].mxu0  ;;  %v2212_v47 = vpop.f32.mrb[18].mxu1 }
 0x996   :  { %v2142_v12 = vadd.f32 %v2141_v4, %v8365_v41  ;;  %v2143_v39 = vpop.f32.mrb[19].mxu0  ;;  %v2214_v14 = vpop.f32.mrb[19].mxu1  ;;  %v2213_v29 = vadd.f32 %v2212_v47, %v8380_v27 }
 0x997   :  { %v2144_v24 = vadd.f32 %v2143_v39, %v8369_v35  ;;  %v2215_v20 = vadd.f32 %v2214_v14, %v8375_v58 }
 0x998   :  { %v4662_v31 = vmul.f32 -1.442695, %v2142_v12 }
 0x999   :  { %v4663_v42 = vmul.f32 -1.442695, %v2144_v24  ;;  %v4664_v16 = vmul.f32 -1.442695, %v2215_v20 }
 0x99a   :  { %7045 = vpow2.f32 %v4662_v31 }
 0x99b   :  { %7047 = vpow2.f32 %v4663_v42 }
 0x99c   :  { %7049 = vpow2.f32 %v4664_v16 }
 0x99d   :  { %7051 = vtanh.f32 %v2213_v29 }
 0x9a4   :  { %v7046_v11 = vpop.eup %7045 }
 0x9a5   :  { %v7048_v36 = vpop.eup %7047  ;;  %v2220_v56 = vadd.f32 1.0, %v7046_v11 }
 0x9a6   :  { %v2226_v5 = vadd.f32 1.0, %v7048_v36  ;;  %v7050_v4 = vpop.eup %7049 }
 0x9a7   :  { %7053 = vrcp.f32 %v2220_v56  ;;  %v7052_v41 = vpop.eup %7051  ;;  %v2233_v31 = vadd.f32 1.0, %v7050_v4 }
 0x9a8   :  { %7055 = vrcp.f32 %v2226_v5  ;;  %v9713_v5 = vld [vmem:[#allocation40_spill] sm:$0xff] }
 0x9a9   :  { %7057 = vrcp.f32 %v2233_v31  ;;  %v2912_v31 = vld [vmem:[#allocation7 + $0x10] sm:$0xff] }
 0x9b1   :  { %v7054_v39 = vpop.eup %7053 }
 0x9b2   :  { %v7056_v12 = vpop.eup %7055  ;;  %v2237_v24 = vmul.f32 %v7054_v39, %v7052_v41 }
 0x9b3   :  { %v2236_v42 = vmul.f32 %v7056_v12, %v8383_v19  ;;  %v7058_v47 = vpop.eup %7057  ;;  %v9714_v19 = vld [vmem:[#allocation33_spill] sm:$0xff] }
 0x9b4   :  { %v2910_v12 = vld [vmem:[#allocation7] sm:$0xff] }
 0x9b5   :  { %v8585_v14 = vadd.f32 %v2237_v24, %v2236_v42  ;;  %v2914_v24 = vld [vmem:[#allocation7 + $0x20] sm:$0xff]  ;;  %v2916_v42 = vld [vmem:[#allocation7 + $0x30] sm:$0xff] }
 0x9b7   :  { %7059 = vtanh.f32 %v8585_v14 }
 0x9c1   :  { %v7060_v20 = vpop.eup %7059 }
 0x9c2   :  { %v2240_v16 = vmul.f32 %v7060_v20, %v7058_v47  ;;  %v2919_v47 = vld [vmem:[#allocation7 + $0x48] sm:$0xff] }
 0x9c4   :  { %v2248_v36 = vrot.slane %v2240_v16, %v8387_v21  ;;  %2460 = vmatprep.mubr.f32.mxu0 %v2240_v16  ;;  %2531 = vmatprep.mubr.f32.mxu1 %v2240_v16  ;;  %v2923_v16 = vld [vmem:[#allocation7 + $0x68] sm:$0xff] }
 0x9c5   :  { %2461 = vmatmul.mubr.f32.vlgmr.msra.gmra.mrb[20].mxu0 %v9713_v5  ;;  %2532 = vmatmul.mubr.f32.vlgmr.msra.gmra.mrb[20].mxu1 %v9713_v5  ;;  %v2925_v5 = vld [vmem:[#allocation7 + $0x78] sm:$0xff] }
 0x9c6   :  { %v2249_v41 = vcombine.high %v2248_v36, %v2248_v36  ;;  %4665 = vst.sshfl [vmem:[#allocation2 + $0x1] sm:$0x1 pattern:$0x73625140] %v2248_v36  ;;  %6228 = vmatpush1.bf16.msra.mxu0 %v8389_v17  ;;  %6292 = vmatpush1.bf16.msra.mxu1 %v8391_v15  ;;  %v9715_v17 = vld [vmem:[#allocation29_spill] sm:$0xff]  ;;  %v9716_v15 = vld [vmem:[#allocation34_spill] sm:$0xff] }
 0x9c7   :  { %6230 = vmatprep.subr.bf16.mxu0 %v8393_v61  ;;  %6294 = vmatprep.subr.bf16.mxu1 %v8395_v54  ;;  %v9717_v61 = vld [vmem:[#allocation32_spill] sm:$0xff]  ;;  %v9718_v54 = vld [vmem:[#allocation35_spill] sm:$0xff] }
 0x9c8   :  { %4666 = vst.sshfl [vmem:[#allocation2 + $0x9] sm:$0x1 pattern:$0x73625140] %v2249_v41  ;;  %v2921_v36 = vld [vmem:[#allocation7 + $0x58] sm:$0xff] }
 0x9ca   :  { %6232 = vmatpush1.bf16.msra.mxu0 %v8402_v0  ;;  %6296 = vmatpush1.bf16.msra.mxu1 %v8404_v32  ;;  %v9719_v0 = vld [vmem:[#allocation38_spill] sm:$0xff] }
 0x9cb   :  { %6234 = vmatprep.subr.bf16.mxu0 %v8408_v23  ;;  %6298 = vmatprep.subr.bf16.mxu1 %v8410_v59  ;;  %v9720_v32 = vld [vmem:[#allocation22_spill] sm:$0xff]  ;;  %v9721_v23 = vld [vmem:[#allocation17_spill] sm:$0xff]  ;;  %v9722_v59 = vld [vmem:[#allocation23_spill] sm:$0xff] }
 0x9ce   :  { %6236 = vmatpush1.bf16.msra.mxu0 %v8414_v18  ;;  %6300 = vmatpush1.bf16.msra.mxu1 %v8416_v8  ;;  %v9723_v18 = vld [vmem:[#allocation20_spill] sm:$0xff]  ;;  %v9724_v8 = vld [vmem:[#allocation26_spill] sm:$0xff] }
 0x9cf   :  { %6238 = vmatprep.subr.bf16.mxu0 %v8420_v25  ;;  %6302 = vmatprep.subr.bf16.mxu1 %v8422_v26  ;;  %v9725_v25 = vld [vmem:[#allocation21_spill] sm:$0xff]  ;;  %v9726_v26 = vld [vmem:[#allocation27_spill] sm:$0xff] }
 0x9d2   :  { %6240 = vmatpush1.bf16.msra.mxu0 %v8426_v1  ;;  %6304 = vmatpush1.bf16.msra.mxu1 %v8428_v50  ;;  %v9727_v1 = vld [vmem:[#allocation24_spill] sm:$0xff]  ;;  %v9728_v50 = vld [vmem:[#allocation30_spill] sm:$0xff] }
 0x9d3   :  { %6242 = vmatprep.subr.bf16.mxu0 %v8434_v28  ;;  %6306 = vmatprep.subr.bf16.mxu1 %v8436_v40  ;;  %v9729_v28 = vld [vmem:[#allocation25_spill] sm:$0xff]  ;;  %v9730_v40 = vld [vmem:[#allocation18_spill] sm:$0xff] }
 0x9d6   :  { %6244 = vmatpush1.bf16.msra.mxu0 %v8438_v45  ;;  %6308 = vmatpush1.bf16.msra.mxu1 %v8441_v10  ;;  %v9731_v45 = vld [vmem:[#allocation19_spill] sm:$0xff]  ;;  %v9732_v10 = vld [vmem:[#allocation36_spill] sm:$0xff] }
 0x9d7   :  { %6246 = vmatprep.subr.bf16.mxu0 %v8446_v51  ;;  %6310 = vmatprep.subr.bf16.mxu1 %v8448_v60  ;;  %v2911_v51 = vld [vmem:[#allocation7 + $0x8] sm:$0xff] }
 0x9d8   :  { %v2915_v60 = vld [vmem:[#allocation7 + $0x28] sm:$0xff] }
 0x9da   :  { %6248 = vmatpush1.bf16.msra.mxu0 %v8450_v3  ;;  %6312 = vmatpush1.bf16.msra.mxu1 %v8453_v43  ;;  %v2913_v3 = vld [vmem:[#allocation7 + $0x18] sm:$0xff]  ;;  %v8653_v43 = vpack.c.bf16 %v2915_v60, %v2911_v51 }
 0x9db   :  { %6250 = vmatprep.subr.bf16.mxu0 %v8458_v37  ;;  %6314 = vmatprep.subr.bf16.mxu1 %v8460_v2  ;;  %v2917_v37 = vld [vmem:[#allocation7 + $0x38] sm:$0xff] }
 0x9dc   :  { %v8655_v2 = vpack.c.bf16 %v2917_v37, %v2913_v3  ;;  %v2928_v3 = vld [vmem:[#allocation7 + $0x90] sm:$0xff] }
 0x9dd   :  { %v2932_v37 = vld [vmem:[#allocation7 + $0xb0] sm:$0xff] }
 0x9de   :  { %6252 = vmatpush1.bf16.msra.mxu0 %v8462_v6  ;;  %6316 = vmatpush1.bf16.msra.mxu1 %v8465_v55 }
 0x9df   :  { %6254 = vmatprep.subr.bf16.mxu0 %v8470_v52  ;;  %6318 = vmatprep.subr.bf16.mxu1 %v8472_v57  ;;  %v9733_v52 = vld [vmem:[#allocation28_spill] sm:$0xff] }
 0x9e2   :  { %6256 = vmatpush1.bf16.msra.mxu0 %v8474_v63  ;;  %6320 = vmatpush1.bf16.msra.mxu1 %v8477_v46 }
 0x9e3   :  { %6258 = vmatprep.subr.bf16.mxu0 %v8482_v49  ;;  %6322 = vmatprep.subr.bf16.mxu1 %v8484_v30 }
 0x9e6   :  { %6260 = vmatpush1.bf16.msra.mxu0 %v8486_v33  ;;  %6324 = vmatpush1.bf16.msra.mxu1 %v8489_v34 }
 0x9e7   :  { %6262 = vmatprep.subr.bf16.mxu0 %v8494_v13  ;;  %6326 = vmatprep.subr.bf16.mxu1 %v8496_v48 }
 0x9ea   :  { %6264 = vmatpush1.bf16.msra.mxu0 %v8498_v62  ;;  %6328 = vmatpush1.bf16.msra.mxu1 %v9714_v19 }
 0x9eb   :  { %6266 = vmatprep.subr.bf16.mxu0 %v9715_v17  ;;  %6330 = vmatprep.subr.bf16.mxu1 %v9716_v15  ;;  %v8667_v17 = vpack.c.bf16 %v2914_v24, %v2910_v12  ;;  %v8669_v15 = vpack.c.bf16 %v2916_v42, %v2912_v31  ;;  %v2944_v24 = vld [vmem:[#allocation7 + $0x110] sm:$0xff] }
 0x9ec   :  { %v2948_v31 = vld [vmem:[#allocation7 + $0x130] sm:$0xff] }
 0x9ed   :  { %v8719_v42 = vpack.c.bf16 %v2948_v31, %v2944_v24  ;;  %v2975_v24 = vld [vmem:[#allocation7 + $0x208] sm:$0xff] }
 0x9ee   :  { %6268 = vmatpush1.bf16.msra.mxu0 %v9717_v61  ;;  %6332 = vmatpush1.bf16.msra.mxu1 %v9718_v54  ;;  %v2922_v61 = vld [vmem:[#allocation7 + $0x60] sm:$0xff]  ;;  %v8671_v54 = vpack.c.bf16 %v2923_v16, %v2919_v47  ;;  %v2951_v47 = vld [vmem:[#allocation7 + $0x148] sm:$0xff]  ;;  %v2953_v16 = vld [vmem:[#allocation7 + $0x158] sm:$0xff] }
 0x9ef   :  { %6270 = vmatprep.subr.bf16.mxu0 %v9719_v0  ;;  %6334 = vmatprep.subr.bf16.mxu1 %v9720_v32  ;;  %v8673_v0 = vpack.c.bf16 %v2925_v5, %v2921_v36  ;;  %v2920_v32 = vld [vmem:[#allocation7 + $0x50] sm:$0xff]  ;;  %v2957_v5 = vld [vmem:[#allocation7 + $0x178] sm:$0xff]  ;;  %v2979_v31 = vld [vmem:[#allocation7 + $0x228] sm:$0xff] }
 0x9f2   :  { %6272 = vmatpush1.bf16.msra.mxu0 %v9721_v23  ;;  %6336 = vmatpush1.bf16.msra.mxu1 %v9722_v59  ;;  %v2924_v23 = vld [vmem:[#allocation7 + $0x70] sm:$0xff]  ;;  %v2927_v59 = vld [vmem:[#allocation7 + $0x88] sm:$0xff] }
 0x9f3   :  { %6274 = vmatprep.subr.bf16.mxu0 %v9723_v18  ;;  %6338 = vmatprep.subr.bf16.mxu1 %v9724_v8  ;;  %v2931_v8 = vld [vmem:[#allocation7 + $0xa8] sm:$0xff] }
 0x9f4   :  { %v8686_v51 = vpack.c.bf16 %v2931_v8, %v2927_v59  ;;  %v2963_v8 = vld [vmem:[#allocation7 + $0x1a8] sm:$0xff] }
 0x9f6   :  { %6276 = vmatpush1.bf16.msra.mxu0 %v9725_v25  ;;  %6340 = vmatpush1.bf16.msra.mxu1 %v9726_v26  ;;  %v2929_v25 = vld [vmem:[#allocation7 + $0x98] sm:$0xff] }
 0x9f7   :  { %6278 = vmatprep.subr.bf16.mxu0 %v9727_v1  ;;  %6342 = vmatprep.subr.bf16.mxu1 %v8543_v44  ;;  %v2933_v26 = vld [vmem:[#allocation7 + $0xb8] sm:$0xff]  ;;  %v9734_v1 = vld [vmem:[#allocation41_spill] sm:$0xff] }
 0x9f8   :  { %v8688_v60 = vpack.c.bf16 %v2933_v26, %v2929_v25  ;;  %v2961_v25 = vld [vmem:[#allocation7 + $0x198] sm:$0xff] }
 0x9fa   :  { %6280 = vmatpush1.bf16.msra.mxu0 %v9728_v50  ;;  %6344 = vmatpush1.bf16.msra.mxu1 %v8550_v7 }
 0x9fb   :  { %6282 = vmatprep.subr.bf16.mxu0 %v8552_v53  ;;  %6346 = vmatprep.subr.bf16.mxu1 %v8554_v38 }
 0x9fe   :  { %6284 = vmatpush1.bf16.msra.mxu0 %v8557_v9  ;;  %6348 = vmatpush1.bf16.msra.mxu1 %v8561_v22 }
 0x9ff   :  { %6286 = vmatprep.subr.bf16.mxu0 %v9729_v28  ;;  %6350 = vmatprep.subr.bf16.mxu1 %v9730_v40  ;;  %v8682_v40 = vpack.c.bf16 %v2924_v23, %v2920_v32  ;;  %v2952_v32 = vld [vmem:[#allocation7 + $0x150] sm:$0xff] }
 0xa00   :  { %v2956_v23 = vld [vmem:[#allocation7 + $0x170] sm:$0xff] }
 0xa01   :  { %v8731_v59 = vpack.c.bf16 %v2956_v23, %v2952_v32  ;;  %v2976_v23 = vld [vmem:[#allocation7 + $0x210] sm:$0xff] }
 0xa02   :  { %6288 = vmatpush1.bf16.msra.mxu0 %v9731_v45  ;;  %6352 = vmatpush1.bf16.msra.mxu1 %v9732_v10  ;;  %v2926_v45 = vld [vmem:[#allocation7 + $0x80] sm:$0xff] }
 0xa03   :  { %6354 = vmatprep.subr.bf16.mxu0 %v8653_v43  ;;  %6418 = vmatprep.subr.bf16.mxu1 %v8655_v2  ;;  %v2930_v10 = vld [vmem:[#allocation7 + $0xa0] sm:$0xff] }
 0xa98   :  { %v2462_v6 = vpop.f32.mrb[20].mxu0  ;;  %v2533_v55 = vpop.f32.mrb[20].mxu1 }
 0xa99   :  { %v2463_v57 = vadd.f32 %v2462_v6, %v9733_v52  ;;  %v2464_v63 = vpop.f32.mrb[21].mxu0  ;;  %v2535_v46 = vpop.f32.mrb[21].mxu1  ;;  %v2534_v48 = vadd.f32 %v2533_v55, %v8380_v27  ;;  %v2935_v6 = vld [vmem:[#allocation7 + $0xc8] sm:$0xff] }
 0xa9a   :  { %v2465_v49 = vadd.f32 %v2464_v63, %v8369_v35  ;;  %v2536_v34 = vadd.f32 %v2535_v46, %v8375_v58  ;;  %v2939_v55 = vld [vmem:[#allocation7 + $0xe8] sm:$0xff]  ;;  %v2941_v63 = vld [vmem:[#allocation7 + $0xf8] sm:$0xff]  ;;  %v8692_v46 = vpack.c.bf16 %v2930_v10, %v2926_v45  ;;  %v2962_v45 = vld [vmem:[#allocation7 + $0x1a0] sm:$0xff] }
 0xa9b   :  { %v4667_v30 = vmul.f32 -1.442695, %v2463_v57  ;;  %v2937_v57 = vld [vmem:[#allocation7 + $0xd8] sm:$0xff] }
 0xa9c   :  { %v4668_v33 = vmul.f32 -1.442695, %v2465_v49  ;;  %v4669_v13 = vmul.f32 -1.442695, %v2536_v34  ;;  %v8694_v49 = vpack.c.bf16 %v2932_v37, %v2928_v3  ;;  %v8700_v34 = vpack.c.bf16 %v2941_v63, %v2937_v57  ;;  %v2960_v37 = vld [vmem:[#allocation7 + $0x190] sm:$0xff]  ;;  %v2967_v57 = vld [vmem:[#allocation7 + $0x1c8] sm:$0xff] }
 0xa9d   :  { %7061 = vpow2.f32 %v4667_v30  ;;  %v2934_v30 = vld [vmem:[#allocation7 + $0xc0] sm:$0xff]  ;;  %v2971_v63 = vld [vmem:[#allocation7 + $0x1e8] sm:$0xff] }
 0xa9e   :  { %7063 = vpow2.f32 %v4668_v33  ;;  %v8698_v33 = vpack.c.bf16 %v2939_v55, %v2935_v6  ;;  %v2964_v6 = vld [vmem:[#allocation7 + $0x1b0] sm:$0xff] }
 0xa9f   :  { %7065 = vpow2.f32 %v4669_v13  ;;  %v2938_v13 = vld [vmem:[#allocation7 + $0xe0] sm:$0xff]  ;;  %v8743_v55 = vpack.c.bf16 %v2964_v6, %v2960_v37  ;;  %v2989_v37 = vld [vmem:[#allocation7 + $0x278] sm:$0xff] }
 0xaa0   :  { %7067 = vtanh.f32 %v2534_v48  ;;  %v2936_v48 = vld [vmem:[#allocation7 + $0xd0] sm:$0xff]  ;;  %v2982_v6 = vld [vmem:[#allocation7 + $0x240] sm:$0xff] }
 0xaa7   :  { %v7062_v62 = vpop.eup %7061 }
 0xaa8   :  { %v7064_v38 = vpop.eup %7063  ;;  %v2541_v7 = vadd.f32 1.0, %v7062_v62  ;;  %v2940_v62 = vld [vmem:[#allocation7 + $0xf0] sm:$0xff] }
 0xaa9   :  { %v2547_v44 = vadd.f32 1.0, %v7064_v38  ;;  %v7066_v53 = vpop.eup %7065  ;;  %v8704_v38 = vpack.c.bf16 %v2938_v13, %v2934_v30  ;;  %v2969_v30 = vld [vmem:[#allocation7 + $0x1d8] sm:$0xff]  ;;  %v8748_v13 = vpack.c.bf16 %v2971_v63, %v2967_v57  ;;  %v2986_v57 = vld [vmem:[#allocation7 + $0x260] sm:$0xff] }
 0xaaa   :  { %7069 = vrcp.f32 %v2541_v7  ;;  %v7068_v9 = vpop.eup %7067  ;;  %v2554_v56 = vadd.f32 1.0, %v7066_v53  ;;  %v8706_v7 = vpack.c.bf16 %v2940_v62, %v2936_v48  ;;  %v2947_v53 = vld [vmem:[#allocation7 + $0x128] sm:$0xff]  ;;  %v2973_v48 = vld [vmem:[#allocation7 + $0x1f8] sm:$0xff]  ;;  %v2966_v62 = vld [vmem:[#allocation7 + $0x1c0] sm:$0xff] }
 0xaab   :  { %7071 = vrcp.f32 %v2547_v44  ;;  %v2943_v44 = vld [vmem:[#allocation7 + $0x108] sm:$0xff] }
 0xaac   :  { %7073 = vrcp.f32 %v2554_v56  ;;  %v2946_v56 = vld [vmem:[#allocation7 + $0x120] sm:$0xff] }
 0xab4   :  { %v7070_v22 = vpop.eup %7069 }
 0xab5   :  { %v7072_v29 = vpop.eup %7071  ;;  %v2558_v11 = vmul.f32 %v7070_v22, %v7068_v9  ;;  %v2945_v9 = vld [vmem:[#allocation7 + $0x118] sm:$0xff]  ;;  %v8712_v22 = vpack.c.bf16 %v2947_v53, %v2943_v44  ;;  %v2970_v44 = vld [vmem:[#allocation7 + $0x1e0] sm:$0xff]  ;;  %v8750_v53 = vpack.c.bf16 %v2973_v48, %v2969_v30  ;;  %v8776_v30 = vpack.c.bf16 %v2986_v57, %v2982_v6  ;;  %v2984_v48 = vld [vmem:[#allocation7 + $0x250] sm:$0xff] }
 0xab6   :  { %v2557_v4 = vmul.f32 %v7072_v29, %v8585_v14  ;;  %v7074_v20 = vpop.eup %7073  ;;  %v2918_v14 = vld [vmem:[#allocation7 + $0x40] sm:$0xff]  ;;  %v2949_v29 = vld [vmem:[#allocation7 + $0x138] sm:$0xff] }
 0xab7   :  { %v8680_v28 = vpack.c.bf16 %v2922_v61, %v2918_v14  ;;  %v8726_v14 = vpack.c.bf16 %v2957_v5, %v2953_v16  ;;  %v2981_v16 = vld [vmem:[#allocation7 + $0x238] sm:$0xff]  ;;  %v2974_v5 = vld [vmem:[#allocation7 + $0x200] sm:$0xff] }
 0xab8   :  { %v8664_v39 = vadd.f32 %v2558_v11, %v2557_v4  ;;  %v2942_v11 = vld [vmem:[#allocation7 + $0x100] sm:$0xff]  ;;  %v8714_v4 = vpack.c.bf16 %v2949_v29, %v2945_v9  ;;  %v8752_v9 = vpack.c.bf16 %v2970_v44, %v2966_v62  ;;  %v2968_v29 = vld [vmem:[#allocation7 + $0x1d0] sm:$0xff]  ;;  %v3001_v6 = vld [vmem:[#allocation7 + $0x2d8] sm:$0xff] }
 0xab9   :  { %v8716_v12 = vpack.c.bf16 %v2946_v56, %v2942_v11  ;;  %v2972_v11 = vld [vmem:[#allocation7 + $0x1f0] sm:$0xff] }
 0xaba   :  { %7075 = vtanh.f32 %v8664_v39  ;;  %v8755_v56 = vpack.c.bf16 %v2972_v11, %v2968_v29  ;;  %v2988_v62 = vld [vmem:[#allocation7 + $0x270] sm:$0xff]  ;;  %v2991_v29 = vld [vmem:[#allocation7 + $0x288] sm:$0xff] }
 0xabb   :  { %v8779_v44 = vpack.c.bf16 %v2988_v62, %v2984_v48  ;;  %v2995_v11 = vld [vmem:[#allocation7 + $0x2a8] sm:$0xff]  ;;  %v3005_v48 = vld [vmem:[#allocation7 + $0x2f8] sm:$0xff]  ;;  %v2998_v62 = vld [vmem:[#allocation7 + $0x2c0] sm:$0xff] }
 0xabd   :  { %9735 = vst [vmem:[#allocation37_spill] sm:$0xff] %v8779_v44 }
 0xac4   :  { %v7076_v41 = vpop.eup %7075 }
 0xac5   :  { %v2561_v19 = vmul.f32 %v7076_v41, %v7074_v20  ;;  %v2955_v20 = vld [vmem:[#allocation7 + $0x168] sm:$0xff]  ;;  %v2950_v41 = vld [vmem:[#allocation7 + $0x140] sm:$0xff] }
 0xac6   :  { %v8724_v36 = vpack.c.bf16 %v2955_v20, %v2951_v47  ;;  %v2977_v47 = vld [vmem:[#allocation7 + $0x218] sm:$0xff]  ;;  %v8760_v20 = vpack.c.bf16 %v2979_v31, %v2975_v24  ;;  %v8784_v31 = vpack.c.bf16 %v2995_v11, %v2991_v29  ;;  %v3002_v29 = vld [vmem:[#allocation7 + $0x2e0] sm:$0xff]  ;;  %v8798_v11 = vpack.c.bf16 %v3005_v48, %v3001_v6 }
 0xac7   :  { %v2569_v18 = vrot.slane %v2561_v19, %v8387_v21  ;;  %2781 = vmatprep.mubr.f32.mxu0 %v2561_v19  ;;  %2852 = vmatprep.mubr.f32.mxu1 %v2561_v19  ;;  %v2954_v19 = vld [vmem:[#allocation7 + $0x160] sm:$0xff]  ;;  %v2993_v24 = vld [vmem:[#allocation7 + $0x298] sm:$0xff] }
 0xac8   :  { %2782 = vmatmul.mubr.f32.vlgmr.msra.gmra.mrb[22].mxu0 %v9734_v1  ;;  %2853 = vmatmul.mubr.f32.vlgmr.msra.gmra.mrb[22].mxu1 %v9734_v1  ;;  %v8728_v61 = vpack.c.bf16 %v2954_v19, %v2950_v41  ;;  %v2965_v1 = vld [vmem:[#allocation7 + $0x1b8] sm:$0xff]  ;;  %v2978_v41 = vld [vmem:[#allocation7 + $0x220] sm:$0xff]  ;;  %v8762_v19 = vpack.c.bf16 %v2981_v16, %v2977_v47  ;;  %9736 = vst [vmem:[#allocation14_spill] sm:$0xff] %v8784_v31  ;;  %9741 = vst [vmem:[#allocation29_spill] sm:$0xff] %v8798_v11 }
 0xac9   :  { %v2570_v50 = vcombine.high %v2569_v18, %v2569_v18  ;;  %4670 = vst.sshfl [vmem:[#allocation2 + $0x2] sm:$0x1 pattern:$0x73625140] %v2569_v18  ;;  %6356 = vmatpush1.bf16.msra.mxu0 %v8667_v17  ;;  %6420 = vmatpush1.bf16.msra.mxu1 %v8669_v15  ;;  %v2959_v18 = vld [vmem:[#allocation7 + $0x188] sm:$0xff]  ;;  %v8738_v10 = vpack.c.bf16 %v2965_v1, %v2961_v25  ;;  %v2997_v47 = vld [vmem:[#allocation7 + $0x2b8] sm:$0xff] }
 0xaca   :  { %6358 = vmatprep.subr.bf16.mxu0 %v8671_v54  ;;  %6422 = vmatprep.subr.bf16.mxu1 %v8673_v0  ;;  %v8736_v26 = vpack.c.bf16 %v2963_v8, %v2959_v18  ;;  %v8764_v32 = vpack.c.bf16 %v2978_v41, %v2974_v5  ;;  %v2980_v18 = vld [vmem:[#allocation7 + $0x230] sm:$0xff]  ;;  %v2983_v25 = vld [vmem:[#allocation7 + $0x248] sm:$0xff]  ;;  %v2990_v16 = vld [vmem:[#allocation7 + $0x280] sm:$0xff]  ;;  %v8786_v41 = vpack.c.bf16 %v2997_v47, %v2993_v24 }
 0xacb   :  { %4671 = vst.sshfl [vmem:[#allocation2 + $0xa] sm:$0x1 pattern:$0x73625140] %v2570_v50  ;;  %v2958_v50 = vld [vmem:[#allocation7 + $0x180] sm:$0xff]  ;;  %v8767_v8 = vpack.c.bf16 %v2980_v18, %v2976_v23  ;;  %v2987_v1 = vld [vmem:[#allocation7 + $0x268] sm:$0xff]  ;;  %v8800_v24 = vpack.c.bf16 %v3002_v29, %v2998_v62 }
 0xacc   :  { %v8740_v3 = vpack.c.bf16 %v2962_v45, %v2958_v50  ;;  %v2985_v50 = vld [vmem:[#allocation7 + $0x258] sm:$0xff]  ;;  %v8772_v45 = vpack.c.bf16 %v2987_v1, %v2983_v25  ;;  %v2994_v5 = vld [vmem:[#allocation7 + $0x2a0] sm:$0xff]  ;;  %9737 = vst [vmem:[#allocation15_spill] sm:$0xff] %v8786_v41  ;;  %v2992_v18 = vld [vmem:[#allocation7 + $0x290] sm:$0xff] }
 0xacd   :  { %6360 = vmatpush1.bf16.msra.mxu0 %v8680_v28  ;;  %6424 = vmatpush1.bf16.msra.mxu1 %v8682_v40  ;;  %v8774_v63 = vpack.c.bf16 %v2989_v37, %v2985_v50  ;;  %v8788_v23 = vpack.c.bf16 %v2994_v5, %v2990_v16  ;;  %v2996_v25 = vld [vmem:[#allocation7 + $0x2b0] sm:$0xff]  ;;  %v2999_v50 = vld [vmem:[#allocation7 + $0x2c8] sm:$0xff]  ;;  %9742 = vst [vmem:[#allocation34_spill] sm:$0xff] %v8800_v24  ;;  %v3013_v6 = vld [vmem:[#allocation7 + $0x338] sm:$0xff] }
 0xace   :  { %6362 = vmatprep.subr.bf16.mxu0 %v8686_v51  ;;  %6426 = vmatprep.subr.bf16.mxu1 %v8688_v60  ;;  %v8791_v1 = vpack.c.bf16 %v2996_v25, %v2992_v18  ;;  %v3003_v37 = vld [vmem:[#allocation7 + $0x2e8] sm:$0xff]  ;;  %v3000_v47 = vld [vmem:[#allocation7 + $0x2d0] sm:$0xff]  ;;  %v3006_v48 = vld [vmem:[#allocation7 + $0x300] sm:$0xff] }
 0xacf   :  { %9738 = vst [vmem:[#allocation39_spill] sm:$0xff] %v8788_v23  ;;  %v8796_v57 = vpack.c.bf16 %v3003_v37, %v2999_v50  ;;  %v3004_v16 = vld [vmem:[#allocation7 + $0x2f0] sm:$0xff]  ;;  %v3007_v18 = vld [vmem:[#allocation7 + $0x308] sm:$0xff]  ;;  %v3009_v50 = vld [vmem:[#allocation7 + $0x318] sm:$0xff] }
 0xad0   :  { %9739 = vst [vmem:[#allocation40_spill] sm:$0xff] %v8791_v1  ;;  %v8803_v5 = vpack.c.bf16 %v3004_v16, %v3000_v47  ;;  %v3011_v25 = vld [vmem:[#allocation7 + $0x328] sm:$0xff]  ;;  %v3010_v62 = vld [vmem:[#allocation7 + $0x320] sm:$0xff]  ;;  %v8810_v29 = vpack.c.bf16 %v3013_v6, %v3009_v50  ;;  %v3008_v47 = vld [vmem:[#allocation7 + $0x310] sm:$0xff] }
 0xad1   :  { %6364 = vmatpush1.bf16.msra.mxu0 %v8692_v46  ;;  %6428 = vmatpush1.bf16.msra.mxu1 %v8694_v49  ;;  %9740 = vst [vmem:[#allocation33_spill] sm:$0xff] %v8796_v57  ;;  %v8808_v37 = vpack.c.bf16 %v3011_v25, %v3007_v18  ;;  %v3012_v16 = vld [vmem:[#allocation7 + $0x330] sm:$0xff]  ;;  %v3014_v50 = vld [vmem:[#allocation7 + $0x340] sm:$0xff] }
 0xad2   :  { %6366 = vmatprep.subr.bf16.mxu0 %v8698_v33  ;;  %6430 = vmatprep.subr.bf16.mxu1 %v8700_v34  ;;  %9743 = vst [vmem:[#allocation32_spill] sm:$0xff] %v8803_v5  ;;  %9745 = vst [vmem:[#allocation38_spill] sm:$0xff] %v8810_v29  ;;  %v3018_v6 = vld [vmem:[#allocation7 + $0x360] sm:$0xff] }
 0xad3   :  { %9744 = vst [vmem:[#allocation35_spill] sm:$0xff] %v8808_v37 }
 0xad5   :  { %6368 = vmatpush1.bf16.msra.mxu0 %v8704_v38  ;;  %6432 = vmatpush1.bf16.msra.mxu1 %v8706_v7 }
 0xad6   :  { %6370 = vmatprep.subr.bf16.mxu0 %v8712_v22  ;;  %6434 = vmatprep.subr.bf16.mxu1 %v8714_v4 }
 0xad9   :  { %6372 = vmatpush1.bf16.msra.mxu0 %v8716_v12  ;;  %6436 = vmatpush1.bf16.msra.mxu1 %v8719_v42 }
 0xada   :  { %6374 = vmatprep.subr.bf16.mxu0 %v8724_v36  ;;  %6438 = vmatprep.subr.bf16.mxu1 %v8726_v14 }
 0xadd   :  { %6376 = vmatpush1.bf16.msra.mxu0 %v8728_v61  ;;  %6440 = vmatpush1.bf16.msra.mxu1 %v8731_v59 }
 0xade   :  { %6378 = vmatprep.subr.bf16.mxu0 %v8736_v26  ;;  %6442 = vmatprep.subr.bf16.mxu1 %v8738_v10 }
 0xae1   :  { %6380 = vmatpush1.bf16.msra.mxu0 %v8740_v3  ;;  %6444 = vmatpush1.bf16.msra.mxu1 %v8743_v55 }
 0xae2   :  { %6382 = vmatprep.subr.bf16.mxu0 %v8748_v13  ;;  %6446 = vmatprep.subr.bf16.mxu1 %v8750_v53 }
 0xae5   :  { %6384 = vmatpush1.bf16.msra.mxu0 %v8752_v9  ;;  %6448 = vmatpush1.bf16.msra.mxu1 %v8755_v56 }
 0xae6   :  { %6386 = vmatprep.subr.bf16.mxu0 %v8760_v20  ;;  %6450 = vmatprep.subr.bf16.mxu1 %v8762_v19 }
 0xae9   :  { %6388 = vmatpush1.bf16.msra.mxu0 %v8764_v32  ;;  %6452 = vmatpush1.bf16.msra.mxu1 %v8767_v8 }
 0xaea   :  { %6390 = vmatprep.subr.bf16.mxu0 %v8772_v45  ;;  %6454 = vmatprep.subr.bf16.mxu1 %v8774_v63 }
 0xaed   :  { %6392 = vmatpush1.bf16.msra.mxu0 %v8776_v30  ;;  %6456 = vmatpush1.bf16.msra.mxu1 %v8779_v44  ;;  %v3033_v44 = vld [vmem:[#allocation7 + $0x3d8] sm:$0xff] }
 0xaee   :  { %6394 = vmatprep.subr.bf16.mxu0 %v8784_v31  ;;  %6458 = vmatprep.subr.bf16.mxu1 %v8786_v41  ;;  %v3021_v41 = vld [vmem:[#allocation7 + $0x378] sm:$0xff]  ;;  %v3031_v31 = vld [vmem:[#allocation7 + $0x3c8] sm:$0xff] }
 0xaf1   :  { %6396 = vmatpush1.bf16.msra.mxu0 %v8788_v23  ;;  %6460 = vmatpush1.bf16.msra.mxu1 %v8791_v1  ;;  %v8812_v1 = vpack.c.bf16 %v3010_v62, %v3006_v48  ;;  %v3017_v23 = vld [vmem:[#allocation7 + $0x358] sm:$0xff]  ;;  %v3016_v48 = vld [vmem:[#allocation7 + $0x350] sm:$0xff]  ;;  %v8824_v62 = vpack.c.bf16 %v3018_v6, %v3014_v50 }
 0xaf2   :  { %6398 = vmatprep.subr.bf16.mxu0 %v8796_v57  ;;  %6462 = vmatprep.subr.bf16.mxu1 %v8798_v11  ;;  %v3015_v57 = vld [vmem:[#allocation7 + $0x348] sm:$0xff]  ;;  %v8821_v25 = vpack.c.bf16 %v3021_v41, %v3017_v23  ;;  %v3025_v41 = vld [vmem:[#allocation7 + $0x398] sm:$0xff]  ;;  %v3028_v50 = vld [vmem:[#allocation7 + $0x3b0] sm:$0xff] }
 0xaf3   :  { %9746 = vst [vmem:[#allocation22_spill] sm:$0xff] %v8812_v1  ;;  %v3019_v11 = vld [vmem:[#allocation7 + $0x368] sm:$0xff]  ;;  %9749 = vst [vmem:[#allocation20_spill] sm:$0xff] %v8824_v62  ;;  %v3029_v23 = vld [vmem:[#allocation7 + $0x3b8] sm:$0xff] }
 0xaf4   :  { %v8819_v18 = vpack.c.bf16 %v3019_v11, %v3015_v57  ;;  %v3022_v11 = vld [vmem:[#allocation7 + $0x380] sm:$0xff] }
 0xaf5   :  { %6400 = vmatpush1.bf16.msra.mxu0 %v8800_v24  ;;  %6464 = vmatpush1.bf16.msra.mxu1 %v8803_v5  ;;  %v8815_v24 = vpack.c.bf16 %v3012_v16, %v3008_v47  ;;  %v3020_v47 = vld [vmem:[#allocation7 + $0x370] sm:$0xff]  ;;  %v3023_v16 = vld [vmem:[#allocation7 + $0x388] sm:$0xff]  ;;  %v3026_v5 = vld [vmem:[#allocation7 + $0x3a0] sm:$0xff] }
 0xaf6   :  { %6402 = vmatprep.subr.bf16.mxu0 %v8808_v37  ;;  %6466 = vmatprep.subr.bf16.mxu1 %v8810_v29  ;;  %9748 = vst [vmem:[#allocation23_spill] sm:$0xff] %v8819_v18  ;;  %v3027_v37 = vld [vmem:[#allocation7 + $0x3a8] sm:$0xff]  ;;  %v8828_v29 = vpack.c.bf16 %v3020_v47, %v3016_v48  ;;  %v8835_v6 = vpack.c.bf16 %v3026_v5, %v3022_v11  ;;  %v3037_v47 = vld [vmem:[#allocation7 + $0x3f8] sm:$0xff]  ;;  %v3032_v5 = vld [vmem:[#allocation7 + $0x3d0] sm:$0xff] }
 0xaf7   :  { %9747 = vst [vmem:[#allocation17_spill] sm:$0xff] %v8815_v24  ;;  %v8830_v57 = vpack.c.bf16 %v3027_v37, %v3023_v16  ;;  %v3030_v16 = vld [vmem:[#allocation7 + $0x3c0] sm:$0xff]  ;;  %v3036_v11 = vld [vmem:[#allocation7 + $0x3f0] sm:$0xff] }
 0xaf9   :  { %6404 = vmatpush1.bf16.msra.mxu0 %v8812_v1  ;;  %6468 = vmatpush1.bf16.msra.mxu1 %v8815_v24  ;;  %v8832_v1 = vpack.c.bf16 %v3029_v23, %v3025_v41  ;;  %v3024_v24 = vld [vmem:[#allocation7 + $0x390] sm:$0xff]  ;;  %v3034_v41 = vld [vmem:[#allocation7 + $0x3e0] sm:$0xff]  ;;  %v8844_v23 = vpack.c.bf16 %v3037_v47, %v3033_v44 }
 0xafa   :  { %6406 = vmatprep.subr.bf16.mxu0 %v8819_v18  ;;  %6470 = vmatprep.subr.bf16.mxu1 %v8821_v25  ;;  %v3035_v18 = vld [vmem:[#allocation7 + $0x3e8] sm:$0xff]  ;;  %v8839_v37 = vpack.c.bf16 %v3028_v50, %v3024_v24  ;;  %v8851_v24 = vpack.c.bf16 %v3036_v11, %v3032_v5 }
 0xafb   :  { %v8841_v48 = vpack.c.bf16 %v3035_v18, %v3031_v31  ;;  %9751 = vst [vmem:[#allocation21_spill] sm:$0xff] %v8844_v23 }
 0xafc   :  { %9753 = vst [vmem:[#allocation24_spill] sm:$0xff] %v8851_v24 }
 0xafd   :  { %6408 = vmatpush1.bf16.msra.mxu0 %v8824_v62  ;;  %6472 = vmatpush1.bf16.msra.mxu1 %v8828_v29  ;;  %9750 = vst [vmem:[#allocation26_spill] sm:$0xff] %v8841_v48  ;;  %v8847_v62 = vpack.c.bf16 %v3034_v41, %v3030_v16 }
 0xafe   :  { %6410 = vmatprep.subr.bf16.mxu0 %v8830_v57  ;;  %6474 = vmatprep.subr.bf16.mxu1 %v8832_v1 }
 0xaff   :  { %9752 = vst [vmem:[#allocation27_spill] sm:$0xff] %v8847_v62 }
 0xb01   :  { %6412 = vmatpush1.bf16.msra.mxu0 %v8835_v6  ;;  %6476 = vmatpush1.bf16.msra.mxu1 %v8839_v37 }
 0xb02   :  { %6414 = vmatprep.subr.bf16.mxu0 %v8841_v48  ;;  %6478 = vmatprep.subr.bf16.mxu1 %v8844_v23 }
 0xb05   :  { %6416 = vmatpush1.bf16.msra.mxu0 %v8847_v62  ;;  %6480 = vmatpush1.bf16.msra.mxu1 %v8851_v24 }
 0xb06   :  { %6482 = vmatprep.subr.bf16.mxu0 %v8653_v43  ;;  %6546 = vmatprep.subr.bf16.mxu1 %v8655_v2 }
 0xb9b   :  { %v2783_v44 = vpop.f32.mrb[22].mxu0  ;;  %v2854_v31 = vpop.f32.mrb[22].mxu1 }
 0xb9c   :  { %v2784_v18 = vadd.f32 %v2783_v44, %v9733_v52  ;;  %v2785_v50 = vpop.f32.mrb[23].mxu0  ;;  %v2856_v47 = vpop.f32.mrb[23].mxu1  ;;  %v2855_v24 = vadd.f32 %v2854_v31, %v8380_v27 }
 0xb9d   :  { %v2786_v16 = vadd.f32 %v2785_v50, %v8369_v35  ;;  %v2857_v11 = vadd.f32 %v2856_v47, %v8375_v58 }
 0xb9e   :  { %v4672_v41 = vmul.f32 -1.442695, %v2784_v18 }
 0xb9f   :  { %v4673_v5 = vmul.f32 -1.442695, %v2786_v16  ;;  %v4674_v62 = vmul.f32 -1.442695, %v2857_v11 }
 0xba0   :  { %7077 = vpow2.f32 %v4672_v41 }
 0xba1   :  { %7079 = vpow2.f32 %v4673_v5 }
 0xba2   :  { %7081 = vpow2.f32 %v4674_v62 }
 0xba3   :  { %7083 = vtanh.f32 %v2855_v24 }
 0xbaa   :  { %v7078_v43 = vpop.eup %7077 }
 0xbab   :  { %v7080_v23 = vpop.eup %7079  ;;  %v2862_v2 = vadd.f32 1.0, %v7078_v43 }
 0xbac   :  { %v2868_v48 = vadd.f32 1.0, %v7080_v23  ;;  %v7082_v44 = vpop.eup %7081 }
 0xbad   :  { %7085 = vrcp.f32 %v2862_v2  ;;  %v7084_v52 = vpop.eup %7083  ;;  %v2875_v41 = vadd.f32 1.0, %v7082_v44 }
 0xbae   :  { %7087 = vrcp.f32 %v2868_v48  ;;  %v9754_v48 = vld [vmem:[#allocation42_spill] sm:$0xff] }
 0xbaf   :  { %7089 = vrcp.f32 %v2875_v41  ;;  %v3554_v41 = vld [vmem:[#allocation7 + $0x10] sm:$0xff] }
 0xbb7   :  { %v7086_v50 = vpop.eup %7085 }
 0xbb8   :  { %v7088_v18 = vpop.eup %7087  ;;  %v2879_v16 = vmul.f32 %v7086_v50, %v7084_v52 }
 0xbb9   :  { %v2878_v5 = vmul.f32 %v7088_v18, %v8664_v39  ;;  %v7090_v31 = vpop.eup %7089  ;;  %v9755_v39 = vld [vmem:[#allocation37_spill] sm:$0xff] }
 0xbba   :  { %v3552_v18 = vld [vmem:[#allocation7] sm:$0xff] }
 0xbbb   :  { %v8863_v47 = vadd.f32 %v2879_v16, %v2878_v5  ;;  %v3556_v16 = vld [vmem:[#allocation7 + $0x20] sm:$0xff]  ;;  %v3558_v5 = vld [vmem:[#allocation7 + $0x30] sm:$0xff] }
 0xbbd   :  { %7091 = vtanh.f32 %v8863_v47 }
 0xbc7   :  { %v7092_v11 = vpop.eup %7091 }
 0xbc8   :  { %v2882_v62 = vmul.f32 %v7092_v11, %v7090_v31  ;;  %v3561_v31 = vld [vmem:[#allocation7 + $0x48] sm:$0xff] }
 0xbca   :  { %v2890_v23 = vrot.slane %v2882_v62, %v8387_v21  ;;  %3102 = vmatprep.mubr.f32.mxu0 %v2882_v62  ;;  %3173 = vmatprep.mubr.f32.mxu1 %v2882_v62  ;;  %v3565_v62 = vld [vmem:[#allocation7 + $0x68] sm:$0xff] }
 0xbcb   :  { %3103 = vmatmul.mubr.f32.vlgmr.msra.gmra.mrb[24].mxu0 %v9754_v48  ;;  %3174 = vmatmul.mubr.f32.vlgmr.msra.gmra.mrb[24].mxu1 %v9754_v48  ;;  %v3567_v48 = vld [vmem:[#allocation7 + $0x78] sm:$0xff] }
 0xbcc   :  { %v2891_v52 = vcombine.high %v2890_v23, %v2890_v23  ;;  %4675 = vst.sshfl [vmem:[#allocation2 + $0x3] sm:$0x1 pattern:$0x73625140] %v2890_v23  ;;  %6484 = vmatpush1.bf16.msra.mxu0 %v8667_v17  ;;  %6548 = vmatpush1.bf16.msra.mxu1 %v8669_v15  ;;  %v9756_v17 = vld [vmem:[#allocation14_spill] sm:$0xff]  ;;  %v9757_v15 = vld [vmem:[#allocation15_spill] sm:$0xff] }
 0xbcd   :  { %6486 = vmatprep.subr.bf16.mxu0 %v8671_v54  ;;  %6550 = vmatprep.subr.bf16.mxu1 %v8673_v0  ;;  %v9758_v54 = vld [vmem:[#allocation39_spill] sm:$0xff]  ;;  %v9759_v0 = vld [vmem:[#allocation40_spill] sm:$0xff] }
 0xbce   :  { %4676 = vst.sshfl [vmem:[#allocation2 + $0xb] sm:$0x1 pattern:$0x73625140] %v2891_v52  ;;  %v3563_v23 = vld [vmem:[#allocation7 + $0x58] sm:$0xff] }
 0xbd0   :  { %6488 = vmatpush1.bf16.msra.mxu0 %v8680_v28  ;;  %6552 = vmatpush1.bf16.msra.mxu1 %v8682_v40  ;;  %v9760_v28 = vld [vmem:[#allocation33_spill] sm:$0xff] }
 0xbd1   :  { %6490 = vmatprep.subr.bf16.mxu0 %v8686_v51  ;;  %6554 = vmatprep.subr.bf16.mxu1 %v8688_v60  ;;  %v9761_v40 = vld [vmem:[#allocation29_spill] sm:$0xff]  ;;  %v9762_v51 = vld [vmem:[#allocation34_spill] sm:$0xff]  ;;  %v9763_v60 = vld [vmem:[#allocation32_spill] sm:$0xff] }
 0xbd4   :  { %6492 = vmatpush1.bf16.msra.mxu0 %v8692_v46  ;;  %6556 = vmatpush1.bf16.msra.mxu1 %v8694_v49  ;;  %v9764_v46 = vld [vmem:[#allocation35_spill] sm:$0xff]  ;;  %v9765_v49 = vld [vmem:[#allocation38_spill] sm:$0xff] }
 0xbd5   :  { %6494 = vmatprep.subr.bf16.mxu0 %v8698_v33  ;;  %6558 = vmatprep.subr.bf16.mxu1 %v8700_v34  ;;  %v9766_v33 = vld [vmem:[#allocation22_spill] sm:$0xff]  ;;  %v9767_v34 = vld [vmem:[#allocation17_spill] sm:$0xff] }
 0xbd8   :  { %6496 = vmatpush1.bf16.msra.mxu0 %v8704_v38  ;;  %6560 = vmatpush1.bf16.msra.mxu1 %v8706_v7  ;;  %v9768_v38 = vld [vmem:[#allocation23_spill] sm:$0xff]  ;;  %v9769_v7 = vld [vmem:[#allocation20_spill] sm:$0xff] }
 0xbd9   :  { %6498 = vmatprep.subr.bf16.mxu0 %v8712_v22  ;;  %6562 = vmatprep.subr.bf16.mxu1 %v8714_v4  ;;  %v9770_v22 = vld [vmem:[#allocation26_spill] sm:$0xff]  ;;  %v9771_v4 = vld [vmem:[#allocation21_spill] sm:$0xff] }
 0xbdc   :  { %6500 = vmatpush1.bf16.msra.mxu0 %v8716_v12  ;;  %6564 = vmatpush1.bf16.msra.mxu1 %v8719_v42  ;;  %v9772_v12 = vld [vmem:[#allocation27_spill] sm:$0xff]  ;;  %v9773_v42 = vld [vmem:[#allocation24_spill] sm:$0xff] }
 0xbdd   :  { %6502 = vmatprep.subr.bf16.mxu0 %v8724_v36  ;;  %6566 = vmatprep.subr.bf16.mxu1 %v8726_v14  ;;  %v3553_v36 = vld [vmem:[#allocation7 + $0x8] sm:$0xff] }
 0xbde   :  { %v3557_v14 = vld [vmem:[#allocation7 + $0x28] sm:$0xff] }
 0xbe0   :  { %6504 = vmatpush1.bf16.msra.mxu0 %v8728_v61  ;;  %6568 = vmatpush1.bf16.msra.mxu1 %v8731_v59  ;;  %v3555_v61 = vld [vmem:[#allocation7 + $0x18] sm:$0xff]  ;;  %v8931_v59 = vpack.c.bf16 %v3557_v14, %v3553_v36 }
 0xbe1   :  { %6506 = vmatprep.subr.bf16.mxu0 %v8736_v26  ;;  %6570 = vmatprep.subr.bf16.mxu1 %v8738_v10  ;;  %v3559_v26 = vld [vmem:[#allocation7 + $0x38] sm:$0xff] }
 0xbe2   :  { %v8933_v10 = vpack.c.bf16 %v3559_v26, %v3555_v61  ;;  %v3570_v61 = vld [vmem:[#allocation7 + $0x90] sm:$0xff] }
 0xbe3   :  { %v3574_v26 = vld [vmem:[#allocation7 + $0xb0] sm:$0xff] }
 0xbe4   :  { %6508 = vmatpush1.bf16.msra.mxu0 %v8740_v3  ;;  %6572 = vmatpush1.bf16.msra.mxu1 %v8743_v55 }
 0xbe5   :  { %6510 = vmatprep.subr.bf16.mxu0 %v8748_v13  ;;  %6574 = vmatprep.subr.bf16.mxu1 %v8750_v53  ;;  %v9774_v13 = vld [vmem:[#allocation28_spill] sm:$0xff] }
 0xbe8   :  { %6512 = vmatpush1.bf16.msra.mxu0 %v8752_v9  ;;  %6576 = vmatpush1.bf16.msra.mxu1 %v8755_v56 }
 0xbe9   :  { %6514 = vmatprep.subr.bf16.mxu0 %v8760_v20  ;;  %6578 = vmatprep.subr.bf16.mxu1 %v8762_v19 }
 0xbec   :  { %6516 = vmatpush1.bf16.msra.mxu0 %v8764_v32  ;;  %6580 = vmatpush1.bf16.msra.mxu1 %v8767_v8 }
 0xbed   :  { %6518 = vmatprep.subr.bf16.mxu0 %v8772_v45  ;;  %6582 = vmatprep.subr.bf16.mxu1 %v8774_v63 }
 0xbf0   :  { %6520 = vmatpush1.bf16.msra.mxu0 %v8776_v30  ;;  %6584 = vmatpush1.bf16.msra.mxu1 %v9755_v39 }
 0xbf1   :  { %6522 = vmatprep.subr.bf16.mxu0 %v9756_v17  ;;  %6586 = vmatprep.subr.bf16.mxu1 %v9757_v15  ;;  %v8945_v17 = vpack.c.bf16 %v3556_v16, %v3552_v18  ;;  %v8947_v15 = vpack.c.bf16 %v3558_v5, %v3554_v41  ;;  %v3586_v16 = vld [vmem:[#allocation7 + $0x110] sm:$0xff] }
 0xbf2   :  { %v3590_v41 = vld [vmem:[#allocation7 + $0x130] sm:$0xff] }
 0xbf3   :  { %v8997_v5 = vpack.c.bf16 %v3590_v41, %v3586_v16  ;;  %v3617_v16 = vld [vmem:[#allocation7 + $0x208] sm:$0xff] }
 0xbf4   :  { %6524 = vmatpush1.bf16.msra.mxu0 %v9758_v54  ;;  %6588 = vmatpush1.bf16.msra.mxu1 %v9759_v0  ;;  %v3564_v54 = vld [vmem:[#allocation7 + $0x60] sm:$0xff]  ;;  %v8949_v0 = vpack.c.bf16 %v3565_v62, %v3561_v31  ;;  %v3593_v31 = vld [vmem:[#allocation7 + $0x148] sm:$0xff]  ;;  %v3595_v62 = vld [vmem:[#allocation7 + $0x158] sm:$0xff] }
 0xbf5   :  { %6526 = vmatprep.subr.bf16.mxu0 %v9760_v28  ;;  %6590 = vmatprep.subr.bf16.mxu1 %v9761_v40  ;;  %v8951_v28 = vpack.c.bf16 %v3567_v48, %v3563_v23  ;;  %v3562_v40 = vld [vmem:[#allocation7 + $0x50] sm:$0xff]  ;;  %v3599_v48 = vld [vmem:[#allocation7 + $0x178] sm:$0xff]  ;;  %v3621_v41 = vld [vmem:[#allocation7 + $0x228] sm:$0xff] }
 0xbf8   :  { %6528 = vmatpush1.bf16.msra.mxu0 %v9762_v51  ;;  %6592 = vmatpush1.bf16.msra.mxu1 %v9763_v60  ;;  %v3566_v51 = vld [vmem:[#allocation7 + $0x70] sm:$0xff]  ;;  %v3569_v60 = vld [vmem:[#allocation7 + $0x88] sm:$0xff] }
 0xbf9   :  { %6530 = vmatprep.subr.bf16.mxu0 %v9764_v46  ;;  %6594 = vmatprep.subr.bf16.mxu1 %v9765_v49  ;;  %v3573_v49 = vld [vmem:[#allocation7 + $0xa8] sm:$0xff] }
 0xbfa   :  { %v8964_v36 = vpack.c.bf16 %v3573_v49, %v3569_v60  ;;  %v3605_v49 = vld [vmem:[#allocation7 + $0x1a8] sm:$0xff] }
 0xbfc   :  { %6532 = vmatpush1.bf16.msra.mxu0 %v9766_v33  ;;  %6596 = vmatpush1.bf16.msra.mxu1 %v9767_v34  ;;  %v3571_v33 = vld [vmem:[#allocation7 + $0x98] sm:$0xff] }
 0xbfd   :  { %6534 = vmatprep.subr.bf16.mxu0 %v9768_v38  ;;  %6598 = vmatprep.subr.bf16.mxu1 %v8821_v25  ;;  %v3575_v34 = vld [vmem:[#allocation7 + $0xb8] sm:$0xff]  ;;  %v9775_v38 = vld [vmem:[#allocation13_spill] sm:$0xff] }
 0xbfe   :  { %v8966_v14 = vpack.c.bf16 %v3575_v34, %v3571_v33  ;;  %v3603_v33 = vld [vmem:[#allocation7 + $0x198] sm:$0xff] }
 0xc00   :  { %6536 = vmatpush1.bf16.msra.mxu0 %v9769_v7  ;;  %6600 = vmatpush1.bf16.msra.mxu1 %v8828_v29 }
 0xc01   :  { %6538 = vmatprep.subr.bf16.mxu0 %v8830_v57  ;;  %6602 = vmatprep.subr.bf16.mxu1 %v8832_v1 }
 0xc04   :  { %6540 = vmatpush1.bf16.msra.mxu0 %v8835_v6  ;;  %6604 = vmatpush1.bf16.msra.mxu1 %v8839_v37 }
 0xc05   :  { %6542 = vmatprep.subr.bf16.mxu0 %v9770_v22  ;;  %6606 = vmatprep.subr.bf16.mxu1 %v9771_v4  ;;  %v8960_v4 = vpack.c.bf16 %v3566_v51, %v3562_v40  ;;  %v3594_v40 = vld [vmem:[#allocation7 + $0x150] sm:$0xff] }
 0xc06   :  { %v3598_v51 = vld [vmem:[#allocation7 + $0x170] sm:$0xff] }
 0xc07   :  { %v9009_v60 = vpack.c.bf16 %v3598_v51, %v3594_v40  ;;  %v3618_v51 = vld [vmem:[#allocation7 + $0x210] sm:$0xff] }
 0xc08   :  { %6544 = vmatpush1.bf16.msra.mxu0 %v9772_v12  ;;  %6608 = vmatpush1.bf16.msra.mxu1 %v9773_v42  ;;  %v3568_v12 = vld [vmem:[#allocation7 + $0x80] sm:$0xff] }
 0xc09   :  { %6610 = vmatprep.subr.bf16.mxu0 %v8931_v59  ;;  %6674 = vmatprep.subr.bf16.mxu1 %v8933_v10  ;;  %v3572_v42 = vld [vmem:[#allocation7 + $0xa0] sm:$0xff] }
 0xc9e   :  { %v3104_v3 = vpop.f32.mrb[24].mxu0  ;;  %v3175_v55 = vpop.f32.mrb[24].mxu1 }
 0xc9f   :  { %v3105_v53 = vadd.f32 %v3104_v3, %v9774_v13  ;;  %v3106_v9 = vpop.f32.mrb[25].mxu0  ;;  %v3177_v56 = vpop.f32.mrb[25].mxu1  ;;  %v3176_v63 = vadd.f32 %v3175_v55, %v8380_v27  ;;  %v3577_v3 = vld [vmem:[#allocation7 + $0xc8] sm:$0xff] }
 0xca0   :  { %v3107_v20 = vadd.f32 %v3106_v9, %v8369_v35  ;;  %v3178_v8 = vadd.f32 %v3177_v56, %v8375_v58  ;;  %v3581_v55 = vld [vmem:[#allocation7 + $0xe8] sm:$0xff]  ;;  %v3583_v9 = vld [vmem:[#allocation7 + $0xf8] sm:$0xff]  ;;  %v8970_v56 = vpack.c.bf16 %v3572_v42, %v3568_v12  ;;  %v3604_v12 = vld [vmem:[#allocation7 + $0x1a0] sm:$0xff] }
 0xca1   :  { %v4677_v19 = vmul.f32 -1.442695, %v3105_v53  ;;  %v3579_v53 = vld [vmem:[#allocation7 + $0xd8] sm:$0xff] }
 0xca2   :  { %v4678_v32 = vmul.f32 -1.442695, %v3107_v20  ;;  %v4679_v45 = vmul.f32 -1.442695, %v3178_v8  ;;  %v8972_v20 = vpack.c.bf16 %v3574_v26, %v3570_v61  ;;  %v8978_v8 = vpack.c.bf16 %v3583_v9, %v3579_v53  ;;  %v3602_v26 = vld [vmem:[#allocation7 + $0x190] sm:$0xff]  ;;  %v3609_v53 = vld [vmem:[#allocation7 + $0x1c8] sm:$0xff] }
 0xca3   :  { %7093 = vpow2.f32 %v4677_v19  ;;  %v3576_v19 = vld [vmem:[#allocation7 + $0xc0] sm:$0xff]  ;;  %v3613_v9 = vld [vmem:[#allocation7 + $0x1e8] sm:$0xff] }
 0xca4   :  { %7095 = vpow2.f32 %v4678_v32  ;;  %v8976_v32 = vpack.c.bf16 %v3581_v55, %v3577_v3  ;;  %v3606_v3 = vld [vmem:[#allocation7 + $0x1b0] sm:$0xff] }
 0xca5   :  { %7097 = vpow2.f32 %v4679_v45  ;;  %v3580_v45 = vld [vmem:[#allocation7 + $0xe0] sm:$0xff]  ;;  %v9021_v55 = vpack.c.bf16 %v3606_v3, %v3602_v26  ;;  %v3631_v26 = vld [vmem:[#allocation7 + $0x278] sm:$0xff] }
 0xca6   :  { %7099 = vtanh.f32 %v3176_v63  ;;  %v3578_v63 = vld [vmem:[#allocation7 + $0xd0] sm:$0xff]  ;;  %v3624_v3 = vld [vmem:[#allocation7 + $0x240] sm:$0xff] }
 0xcad   :  { %v7094_v30 = vpop.eup %7093 }
 0xcae   :  { %v7096_v1 = vpop.eup %7095  ;;  %v3183_v29 = vadd.f32 1.0, %v7094_v30  ;;  %v3582_v30 = vld [vmem:[#allocation7 + $0xf0] sm:$0xff] }
 0xcaf   :  { %v3189_v25 = vadd.f32 1.0, %v7096_v1  ;;  %v7098_v57 = vpop.eup %7097  ;;  %v8982_v1 = vpack.c.bf16 %v3580_v45, %v3576_v19  ;;  %v3611_v19 = vld [vmem:[#allocation7 + $0x1d8] sm:$0xff]  ;;  %v9026_v45 = vpack.c.bf16 %v3613_v9, %v3609_v53  ;;  %v3628_v53 = vld [vmem:[#allocation7 + $0x260] sm:$0xff] }
 0xcb0   :  { %7101 = vrcp.f32 %v3183_v29  ;;  %v7100_v6 = vpop.eup %7099  ;;  %v3196_v2 = vadd.f32 1.0, %v7098_v57  ;;  %v8984_v29 = vpack.c.bf16 %v3582_v30, %v3578_v63  ;;  %v3589_v57 = vld [vmem:[#allocation7 + $0x128] sm:$0xff]  ;;  %v3615_v63 = vld [vmem:[#allocation7 + $0x1f8] sm:$0xff]  ;;  %v3608_v30 = vld [vmem:[#allocation7 + $0x1c0] sm:$0xff] }
 0xcb1   :  { %7103 = vrcp.f32 %v3189_v25  ;;  %v3585_v25 = vld [vmem:[#allocation7 + $0x108] sm:$0xff] }
 0xcb2   :  { %7105 = vrcp.f32 %v3196_v2  ;;  %v3588_v2 = vld [vmem:[#allocation7 + $0x120] sm:$0xff] }
 0xcba   :  { %v7102_v37 = vpop.eup %7101 }
 0xcbb   :  { %v7104_v24 = vpop.eup %7103  ;;  %v3200_v43 = vmul.f32 %v7102_v37, %v7100_v6  ;;  %v3587_v6 = vld [vmem:[#allocation7 + $0x118] sm:$0xff]  ;;  %v8990_v37 = vpack.c.bf16 %v3589_v57, %v3585_v25  ;;  %v3612_v25 = vld [vmem:[#allocation7 + $0x1e0] sm:$0xff]  ;;  %v9028_v57 = vpack.c.bf16 %v3615_v63, %v3611_v19  ;;  %v9054_v19 = vpack.c.bf16 %v3628_v53, %v3624_v3  ;;  %v3626_v63 = vld [vmem:[#allocation7 + $0x250] sm:$0xff] }
 0xcbc   :  { %v3199_v44 = vmul.f32 %v7104_v24, %v8863_v47  ;;  %v7106_v11 = vpop.eup %7105  ;;  %v3560_v47 = vld [vmem:[#allocation7 + $0x40] sm:$0xff]  ;;  %v3591_v24 = vld [vmem:[#allocation7 + $0x138] sm:$0xff] }
 0xcbd   :  { %v8958_v22 = vpack.c.bf16 %v3564_v54, %v3560_v47  ;;  %v9004_v47 = vpack.c.bf16 %v3599_v48, %v3595_v62  ;;  %v3623_v62 = vld [vmem:[#allocation7 + $0x238] sm:$0xff]  ;;  %v3616_v48 = vld [vmem:[#allocation7 + $0x200] sm:$0xff] }
 0xcbe   :  { %v8942_v50 = vadd.f32 %v3200_v43, %v3199_v44  ;;  %v3584_v43 = vld [vmem:[#allocation7 + $0x100] sm:$0xff]  ;;  %v8992_v44 = vpack.c.bf16 %v3591_v24, %v3587_v6  ;;  %v9030_v6 = vpack.c.bf16 %v3612_v25, %v3608_v30  ;;  %v3610_v24 = vld [vmem:[#allocation7 + $0x1d0] sm:$0xff]  ;;  %v3643_v3 = vld [vmem:[#allocation7 + $0x2d8] sm:$0xff] }
 0xcbf   :  { %v8994_v18 = vpack.c.bf16 %v3588_v2, %v3584_v43  ;;  %v3614_v43 = vld [vmem:[#allocation7 + $0x1f0] sm:$0xff] }
 0xcc0   :  { %7107 = vtanh.f32 %v8942_v50  ;;  %v9033_v2 = vpack.c.bf16 %v3614_v43, %v3610_v24  ;;  %v3630_v30 = vld [vmem:[#allocation7 + $0x270] sm:$0xff]  ;;  %v3633_v24 = vld [vmem:[#allocation7 + $0x288] sm:$0xff] }
 0xcc1   :  { %v9057_v25 = vpack.c.bf16 %v3630_v30, %v3626_v63  ;;  %v3637_v43 = vld [vmem:[#allocation7 + $0x2a8] sm:$0xff]  ;;  %v3647_v63 = vld [vmem:[#allocation7 + $0x2f8] sm:$0xff]  ;;  %v3640_v30 = vld [vmem:[#allocation7 + $0x2c0] sm:$0xff] }
 0xcc3   :  { %9776 = vst [vmem:[#allocation30_spill] sm:$0xff] %v9057_v25 }
 0xcca   :  { %v7108_v52 = vpop.eup %7107 }
 0xccb   :  { %v3203_v39 = vmul.f32 %v7108_v52, %v7106_v11  ;;  %v3597_v11 = vld [vmem:[#allocation7 + $0x168] sm:$0xff]  ;;  %v3592_v52 = vld [vmem:[#allocation7 + $0x140] sm:$0xff] }
 0xccc   :  { %v9002_v23 = vpack.c.bf16 %v3597_v11, %v3593_v31  ;;  %v3619_v31 = vld [vmem:[#allocation7 + $0x218] sm:$0xff]  ;;  %v9038_v11 = vpack.c.bf16 %v3621_v41, %v3617_v16  ;;  %v9062_v41 = vpack.c.bf16 %v3637_v43, %v3633_v24  ;;  %v3644_v24 = vld [vmem:[#allocation7 + $0x2e0] sm:$0xff]  ;;  %v9076_v43 = vpack.c.bf16 %v3647_v63, %v3643_v3 }
 0xccd   :  { %v3211_v46 = vrot.slane %v3203_v39, %v8387_v21  ;;  %3423 = vmatprep.mubr.f32.mxu0 %v3203_v39  ;;  %3494 = vmatprep.mubr.f32.mxu1 %v3203_v39  ;;  %v3596_v39 = vld [vmem:[#allocation7 + $0x160] sm:$0xff]  ;;  %v3635_v16 = vld [vmem:[#allocation7 + $0x298] sm:$0xff] }
 0xcce   :  { %3424 = vmatmul.mubr.f32.vlgmr.msra.gmra.mrb[26].mxu0 %v9775_v38  ;;  %3495 = vmatmul.mubr.f32.vlgmr.msra.gmra.mrb[26].mxu1 %v9775_v38  ;;  %v9006_v54 = vpack.c.bf16 %v3596_v39, %v3592_v52  ;;  %v3607_v38 = vld [vmem:[#allocation7 + $0x1b8] sm:$0xff]  ;;  %v3620_v52 = vld [vmem:[#allocation7 + $0x220] sm:$0xff]  ;;  %v9040_v39 = vpack.c.bf16 %v3623_v62, %v3619_v31  ;;  %9777 = vst [vmem:[#allocation25_spill] sm:$0xff] %v9062_v41  ;;  %9782 = vst [vmem:[#allocation42_spill] sm:$0xff] %v9076_v43 }
 0xccf   :  { %v3212_v7 = vcombine.high %v3211_v46, %v3211_v46  ;;  %4680 = vst.sshfl [vmem:[#allocation2 + $0x4] sm:$0x1 pattern:$0x73625140] %v3211_v46  ;;  %6612 = vmatpush1.bf16.msra.mxu0 %v8945_v17  ;;  %6676 = vmatpush1.bf16.msra.mxu1 %v8947_v15  ;;  %v3601_v46 = vld [vmem:[#allocation7 + $0x188] sm:$0xff]  ;;  %v9016_v42 = vpack.c.bf16 %v3607_v38, %v3603_v33  ;;  %v3639_v31 = vld [vmem:[#allocation7 + $0x2b8] sm:$0xff] }
 0xcd0   :  { %6614 = vmatprep.subr.bf16.mxu0 %v8949_v0  ;;  %6678 = vmatprep.subr.bf16.mxu1 %v8951_v28  ;;  %v9014_v34 = vpack.c.bf16 %v3605_v49, %v3601_v46  ;;  %v9042_v40 = vpack.c.bf16 %v3620_v52, %v3616_v48  ;;  %v3622_v46 = vld [vmem:[#allocation7 + $0x230] sm:$0xff]  ;;  %v3625_v33 = vld [vmem:[#allocation7 + $0x248] sm:$0xff]  ;;  %v3632_v62 = vld [vmem:[#allocation7 + $0x280] sm:$0xff]  ;;  %v9064_v52 = vpack.c.bf16 %v3639_v31, %v3635_v16 }
 0xcd1   :  { %4681 = vst.sshfl [vmem:[#allocation2 + $0xc] sm:$0x1 pattern:$0x73625140] %v3212_v7  ;;  %v3600_v7 = vld [vmem:[#allocation7 + $0x180] sm:$0xff]  ;;  %v9045_v49 = vpack.c.bf16 %v3622_v46, %v3618_v51  ;;  %v3629_v38 = vld [vmem:[#allocation7 + $0x268] sm:$0xff]  ;;  %v9078_v16 = vpack.c.bf16 %v3644_v24, %v3640_v30 }
 0xcd2   :  { %v9018_v61 = vpack.c.bf16 %v3604_v12, %v3600_v7  ;;  %v3627_v7 = vld [vmem:[#allocation7 + $0x258] sm:$0xff]  ;;  %v9050_v12 = vpack.c.bf16 %v3629_v38, %v3625_v33  ;;  %v3636_v48 = vld [vmem:[#allocation7 + $0x2a0] sm:$0xff]  ;;  %9778 = vst [vmem:[#allocation18_spill] sm:$0xff] %v9064_v52  ;;  %v3634_v46 = vld [vmem:[#allocation7 + $0x290] sm:$0xff] }
 0xcd3   :  { %6616 = vmatpush1.bf16.msra.mxu0 %v8958_v22  ;;  %6680 = vmatpush1.bf16.msra.mxu1 %v8960_v4  ;;  %v9052_v9 = vpack.c.bf16 %v3631_v26, %v3627_v7  ;;  %v9066_v51 = vpack.c.bf16 %v3636_v48, %v3632_v62  ;;  %v3638_v33 = vld [vmem:[#allocation7 + $0x2b0] sm:$0xff]  ;;  %v3641_v7 = vld [vmem:[#allocation7 + $0x2c8] sm:$0xff]  ;;  %9783 = vst [vmem:[#allocation37_spill] sm:$0xff] %v9078_v16  ;;  %v3655_v3 = vld [vmem:[#allocation7 + $0x338] sm:$0xff] }
 0xcd4   :  { %6618 = vmatprep.subr.bf16.mxu0 %v8964_v36  ;;  %6682 = vmatprep.subr.bf16.mxu1 %v8966_v14  ;;  %v9069_v38 = vpack.c.bf16 %v3638_v33, %v3634_v46  ;;  %v3645_v26 = vld [vmem:[#allocation7 + $0x2e8] sm:$0xff]  ;;  %v3642_v31 = vld [vmem:[#allocation7 + $0x2d0] sm:$0xff]  ;;  %v3648_v63 = vld [vmem:[#allocation7 + $0x300] sm:$0xff] }
 0xcd5   :  { %9779 = vst [vmem:[#allocation19_spill] sm:$0xff] %v9066_v51  ;;  %v9074_v53 = vpack.c.bf16 %v3645_v26, %v3641_v7  ;;  %v3646_v62 = vld [vmem:[#allocation7 + $0x2f0] sm:$0xff]  ;;  %v3649_v46 = vld [vmem:[#allocation7 + $0x308] sm:$0xff]  ;;  %v3651_v7 = vld [vmem:[#allocation7 + $0x318] sm:$0xff] }
 0xcd6   :  { %9780 = vst [vmem:[#allocation36_spill] sm:$0xff] %v9069_v38  ;;  %v9081_v48 = vpack.c.bf16 %v3646_v62, %v3642_v31  ;;  %v3653_v33 = vld [vmem:[#allocation7 + $0x328] sm:$0xff]  ;;  %v3652_v30 = vld [vmem:[#allocation7 + $0x320] sm:$0xff]  ;;  %v9088_v24 = vpack.c.bf16 %v3655_v3, %v3651_v7  ;;  %v3650_v31 = vld [vmem:[#allocation7 + $0x310] sm:$0xff] }
 0xcd7   :  { %6620 = vmatpush1.bf16.msra.mxu0 %v8970_v56  ;;  %6684 = vmatpush1.bf16.msra.mxu1 %v8972_v20  ;;  %9781 = vst [vmem:[#allocation41_spill] sm:$0xff] %v9074_v53  ;;  %v9086_v26 = vpack.c.bf16 %v3653_v33, %v3649_v46  ;;  %v3654_v62 = vld [vmem:[#allocation7 + $0x330] sm:$0xff]  ;;  %v3656_v7 = vld [vmem:[#allocation7 + $0x340] sm:$0xff] }
 0xcd8   :  { %6622 = vmatprep.subr.bf16.mxu0 %v8976_v32  ;;  %6686 = vmatprep.subr.bf16.mxu1 %v8978_v8  ;;  %9784 = vst [vmem:[#allocation14_spill] sm:$0xff] %v9081_v48  ;;  %9786 = vst [vmem:[#allocation39_spill] sm:$0xff] %v9088_v24  ;;  %v3660_v3 = vld [vmem:[#allocation7 + $0x360] sm:$0xff] }
 0xcd9   :  { %9785 = vst [vmem:[#allocation15_spill] sm:$0xff] %v9086_v26 }
 0xcdb   :  { %6624 = vmatpush1.bf16.msra.mxu0 %v8982_v1  ;;  %6688 = vmatpush1.bf16.msra.mxu1 %v8984_v29 }
 0xcdc   :  { %6626 = vmatprep.subr.bf16.mxu0 %v8990_v37  ;;  %6690 = vmatprep.subr.bf16.mxu1 %v8992_v44 }
 0xcdf   :  { %6628 = vmatpush1.bf16.msra.mxu0 %v8994_v18  ;;  %6692 = vmatpush1.bf16.msra.mxu1 %v8997_v5 }
 0xce0   :  { %6630 = vmatprep.subr.bf16.mxu0 %v9002_v23  ;;  %6694 = vmatprep.subr.bf16.mxu1 %v9004_v47 }
 0xce3   :  { %6632 = vmatpush1.bf16.msra.mxu0 %v9006_v54  ;;  %6696 = vmatpush1.bf16.msra.mxu1 %v9009_v60 }
 0xce4   :  { %6634 = vmatprep.subr.bf16.mxu0 %v9014_v34  ;;  %6698 = vmatprep.subr.bf16.mxu1 %v9016_v42 }
 0xce7   :  { %6636 = vmatpush1.bf16.msra.mxu0 %v9018_v61  ;;  %6700 = vmatpush1.bf16.msra.mxu1 %v9021_v55 }
 0xce8   :  { %6638 = vmatprep.subr.bf16.mxu0 %v9026_v45  ;;  %6702 = vmatprep.subr.bf16.mxu1 %v9028_v57 }
 0xceb   :  { %6640 = vmatpush1.bf16.msra.mxu0 %v9030_v6  ;;  %6704 = vmatpush1.bf16.msra.mxu1 %v9033_v2 }
 0xcec   :  { %6642 = vmatprep.subr.bf16.mxu0 %v9038_v11  ;;  %6706 = vmatprep.subr.bf16.mxu1 %v9040_v39 }
 0xcef   :  { %6644 = vmatpush1.bf16.msra.mxu0 %v9042_v40  ;;  %6708 = vmatpush1.bf16.msra.mxu1 %v9045_v49 }
 0xcf0   :  { %6646 = vmatprep.subr.bf16.mxu0 %v9050_v12  ;;  %6710 = vmatprep.subr.bf16.mxu1 %v9052_v9 }
 0xcf3   :  { %6648 = vmatpush1.bf16.msra.mxu0 %v9054_v19  ;;  %6712 = vmatpush1.bf16.msra.mxu1 %v9057_v25  ;;  %v3675_v25 = vld [vmem:[#allocation7 + $0x3d8] sm:$0xff] }
 0xcf4   :  { %6650 = vmatprep.subr.bf16.mxu0 %v9062_v41  ;;  %6714 = vmatprep.subr.bf16.mxu1 %v9064_v52  ;;  %v3663_v52 = vld [vmem:[#allocation7 + $0x378] sm:$0xff]  ;;  %v3673_v41 = vld [vmem:[#allocation7 + $0x3c8] sm:$0xff] }
 0xcf7   :  { %6652 = vmatpush1.bf16.msra.mxu0 %v9066_v51  ;;  %6716 = vmatpush1.bf16.msra.mxu1 %v9069_v38  ;;  %v9090_v38 = vpack.c.bf16 %v3652_v30, %v3648_v63  ;;  %v3659_v51 = vld [vmem:[#allocation7 + $0x358] sm:$0xff]  ;;  %v3658_v63 = vld [vmem:[#allocation7 + $0x350] sm:$0xff]  ;;  %v9102_v30 = vpack.c.bf16 %v3660_v3, %v3656_v7 }
 0xcf8   :  { %6654 = vmatprep.subr.bf16.mxu0 %v9074_v53  ;;  %6718 = vmatprep.subr.bf16.mxu1 %v9076_v43  ;;  %v3657_v53 = vld [vmem:[#allocation7 + $0x348] sm:$0xff]  ;;  %v9099_v33 = vpack.c.bf16 %v3663_v52, %v3659_v51  ;;  %v3667_v52 = vld [vmem:[#allocation7 + $0x398] sm:$0xff]  ;;  %v3670_v7 = vld [vmem:[#allocation7 + $0x3b0] sm:$0xff] }
 0xcf9   :  { %9787 = vst [vmem:[#allocation40_spill] sm:$0xff] %v9090_v38  ;;  %v3661_v43 = vld [vmem:[#allocation7 + $0x368] sm:$0xff]  ;;  %9790 = vst [vmem:[#allocation34_spill] sm:$0xff] %v9102_v30  ;;  %v3671_v51 = vld [vmem:[#allocation7 + $0x3b8] sm:$0xff] }
 0xcfa   :  { %v9097_v46 = vpack.c.bf16 %v3661_v43, %v3657_v53  ;;  %v3664_v43 = vld [vmem:[#allocation7 + $0x380] sm:$0xff] }
 0xcfb   :  { %6656 = vmatpush1.bf16.msra.mxu0 %v9078_v16  ;;  %6720 = vmatpush1.bf16.msra.mxu1 %v9081_v48  ;;  %v9093_v16 = vpack.c.bf16 %v3654_v62, %v3650_v31  ;;  %v3662_v31 = vld [vmem:[#allocation7 + $0x370] sm:$0xff]  ;;  %v3665_v62 = vld [vmem:[#allocation7 + $0x388] sm:$0xff]  ;;  %v3668_v48 = vld [vmem:[#allocation7 + $0x3a0] sm:$0xff] }
 0xcfc   :  { %6658 = vmatprep.subr.bf16.mxu0 %v9086_v26  ;;  %6722 = vmatprep.subr.bf16.mxu1 %v9088_v24  ;;  %9789 = vst [vmem:[#allocation29_spill] sm:$0xff] %v9097_v46  ;;  %v3669_v26 = vld [vmem:[#allocation7 + $0x3a8] sm:$0xff]  ;;  %v9106_v24 = vpack.c.bf16 %v3662_v31, %v3658_v63  ;;  %v9113_v3 = vpack.c.bf16 %v3668_v48, %v3664_v43  ;;  %v3679_v31 = vld [vmem:[#allocation7 + $0x3f8] sm:$0xff]  ;;  %v3674_v48 = vld [vmem:[#allocation7 + $0x3d0] sm:$0xff] }
 0xcfd   :  { %9788 = vst [vmem:[#allocation33_spill] sm:$0xff] %v9093_v16  ;;  %v9108_v53 = vpack.c.bf16 %v3669_v26, %v3665_v62  ;;  %v3672_v62 = vld [vmem:[#allocation7 + $0x3c0] sm:$0xff]  ;;  %v3678_v43 = vld [vmem:[#allocation7 + $0x3f0] sm:$0xff] }
 0xcff   :  { %6660 = vmatpush1.bf16.msra.mxu0 %v9090_v38  ;;  %6724 = vmatpush1.bf16.msra.mxu1 %v9093_v16  ;;  %v9110_v38 = vpack.c.bf16 %v3671_v51, %v3667_v52  ;;  %v3666_v16 = vld [vmem:[#allocation7 + $0x390] sm:$0xff]  ;;  %v3676_v52 = vld [vmem:[#allocation7 + $0x3e0] sm:$0xff]  ;;  %v9122_v51 = vpack.c.bf16 %v3679_v31, %v3675_v25 }
 0xd00   :  { %6662 = vmatprep.subr.bf16.mxu0 %v9097_v46  ;;  %6726 = vmatprep.subr.bf16.mxu1 %v9099_v33  ;;  %v3677_v46 = vld [vmem:[#allocation7 + $0x3e8] sm:$0xff]  ;;  %v9117_v26 = vpack.c.bf16 %v3670_v7, %v3666_v16  ;;  %v9129_v16 = vpack.c.bf16 %v3678_v43, %v3674_v48 }
 0xd01   :  { %v9119_v63 = vpack.c.bf16 %v3677_v46, %v3673_v41  ;;  %9792 = vst [vmem:[#allocation35_spill] sm:$0xff] %v9122_v51 }
 0xd02   :  { %9794 = vst [vmem:[#allocation22_spill] sm:$0xff] %v9129_v16 }
 0xd03   :  { %6664 = vmatpush1.bf16.msra.mxu0 %v9102_v30  ;;  %6728 = vmatpush1.bf16.msra.mxu1 %v9106_v24  ;;  %9791 = vst [vmem:[#allocation32_spill] sm:$0xff] %v9119_v63  ;;  %v9125_v30 = vpack.c.bf16 %v3676_v52, %v3672_v62 }
 0xd04   :  { %6666 = vmatprep.subr.bf16.mxu0 %v9108_v53  ;;  %6730 = vmatprep.subr.bf16.mxu1 %v9110_v38 }
 0xd05   :  { %9793 = vst [vmem:[#allocation38_spill] sm:$0xff] %v9125_v30 }
 0xd07   :  { %6668 = vmatpush1.bf16.msra.mxu0 %v9113_v3  ;;  %6732 = vmatpush1.bf16.msra.mxu1 %v9117_v26 }
 0xd08   :  { %6670 = vmatprep.subr.bf16.mxu0 %v9119_v63  ;;  %6734 = vmatprep.subr.bf16.mxu1 %v9122_v51 }
 0xd0b   :  { %6672 = vmatpush1.bf16.msra.mxu0 %v9125_v30  ;;  %6736 = vmatpush1.bf16.msra.mxu1 %v9129_v16 }
 0xd0c   :  { %6738 = vmatprep.subr.bf16.mxu0 %v8931_v59  ;;  %6802 = vmatprep.subr.bf16.mxu1 %v8933_v10 }
 0xda1   :  { %v3425_v25 = vpop.f32.mrb[26].mxu0  ;;  %v3496_v41 = vpop.f32.mrb[26].mxu1 }
 0xda2   :  { %v3426_v46 = vadd.f32 %v3425_v25, %v9774_v13  ;;  %v3427_v7 = vpop.f32.mrb[27].mxu0  ;;  %v3498_v31 = vpop.f32.mrb[27].mxu1  ;;  %v3497_v16 = vadd.f32 %v3496_v41, %v8380_v27 }
 0xda3   :  { %v3428_v62 = vadd.f32 %v3427_v7, %v8369_v35  ;;  %v3499_v43 = vadd.f32 %v3498_v31, %v8375_v58 }
 0xda4   :  { %v4682_v52 = vmul.f32 -1.442695, %v3426_v46 }
 0xda5   :  { %v4683_v48 = vmul.f32 -1.442695, %v3428_v62  ;;  %v4684_v30 = vmul.f32 -1.442695, %v3499_v43 }
 0xda6   :  { %7109 = vpow2.f32 %v4682_v52 }
 0xda7   :  { %7111 = vpow2.f32 %v4683_v48 }
 0xda8   :  { %7113 = vpow2.f32 %v4684_v30 }
 0xda9   :  { %7115 = vtanh.f32 %v3497_v16 }
 0xdb0   :  { %v7110_v59 = vpop.eup %7109 }
 0xdb1   :  { %v7112_v51 = vpop.eup %7111  ;;  %v3504_v10 = vadd.f32 1.0, %v7110_v59 }
 0xdb2   :  { %v3510_v63 = vadd.f32 1.0, %v7112_v51  ;;  %v7114_v25 = vpop.eup %7113 }
 0xdb3   :  { %7117 = vrcp.f32 %v3504_v10  ;;  %v7116_v13 = vpop.eup %7115  ;;  %v3517_v52 = vadd.f32 1.0, %v7114_v25  ;;  %v9816_v25 = vld [vmem:[#allocation31_spill] sm:$0xff] }
 0xdb4   :  { %7119 = vrcp.f32 %v3510_v63  ;;  %v9795_v63 = vld [vmem:[#allocation16_spill] sm:$0xff] }
 0xdb5   :  { %7121 = vrcp.f32 %v3517_v52  ;;  %v108_v52 = vld [vmem:[%s9332_s6 + $0x10] sm:$0xff] }
 0xdbd   :  { %v7118_v7 = vpop.eup %7117 }
 0xdbe   :  { %v7120_v46 = vpop.eup %7119  ;;  %v3521_v62 = vmul.f32 %v7118_v7, %v7116_v13 }
 0xdbf   :  { %v3520_v48 = vmul.f32 %v7120_v46, %v8942_v50  ;;  %v7122_v41 = vpop.eup %7121  ;;  %v9796_v50 = vld [vmem:[#allocation30_spill] sm:$0xff] }
 0xdc0   :  { %v9223_v46 = vld [vmem:[%s9331_s5] sm:$0xff] }
 0xdc1   :  { %v9141_v31 = vadd.f32 %v3521_v62, %v3520_v48  ;;  %v106_v62 = vld [vmem:[%s9332_s6] sm:$0xff]  ;;  %v7235_v48 = vmov 0  }
 0xdc2   :  { %6899 = vset.pattern.permute.xlu0 %v7235_v48  ;;  %6900 = vset.pattern.permute.xlu1 %v7235_v48 }
 0xdc3   :  { %7123 = vtanh.f32 %v9141_v31  ;;  %116 = vperm.xlu0 %6899, %v106_v62   ;;  %126 = vperm.xlu1 %6900, %v108_v52  }
 0xdcd   :  { %v7124_v43 = vpop.eup %7123 }
 0xdce   :  { %v3524_v30 = vmul.f32 %v7124_v43, %v7122_v41  ;;  %v109_v41 = vld [vmem:[%s9332_s6 + $0x18] sm:$0xff]  ;;  %v110_v43 = vld [vmem:[%s9332_s6 + $0x20] sm:$0xff] }
 0xdcf   :  { %131 = vperm.xlu1 %6900, %v109_v41  }
 0xdd0   :  { %v3532_v51 = vrot.slane %v3524_v30, %v8387_v21  ;;  %3744 = vmatprep.mubr.f32.mxu0 %v3524_v30  ;;  %3815 = vmatprep.mubr.f32.mxu1 %v3524_v30  ;;  %v111_v30 = vld [vmem:[%s9332_s6 + $0x28] sm:$0xff] }
 0xdd1   :  { %3745 = vmatmul.mubr.f32.vlgmr.msra.gmra.mrb[28].mxu0 %v9795_v63  ;;  %3816 = vmatmul.mubr.f32.vlgmr.msra.gmra.mrb[28].mxu1 %v9795_v63  ;;  %v113_v63 = vld [vmem:[%s9332_s6 + $0x38] sm:$0xff] }
 0xdd2   :  { %v3533_v13 = vcombine.high %v3532_v51, %v3532_v51  ;;  %4685 = vst.sshfl [vmem:[#allocation2 + $0x5] sm:$0x1 pattern:$0x73625140] %v3532_v51  ;;  %6740 = vmatpush1.bf16.msra.mxu0 %v8945_v17  ;;  %6804 = vmatpush1.bf16.msra.mxu1 %v8947_v15  ;;  %v9797_v17 = vld [vmem:[#allocation25_spill] sm:$0xff]  ;;  %v9798_v15 = vld [vmem:[#allocation18_spill] sm:$0xff] }
 0xdd3   :  { %6742 = vmatprep.subr.bf16.mxu0 %v8949_v0  ;;  %6806 = vmatprep.subr.bf16.mxu1 %v8951_v28  ;;  %v9799_v0 = vld [vmem:[#allocation19_spill] sm:$0xff]  ;;  %v9800_v28 = vld [vmem:[#allocation36_spill] sm:$0xff] }
 0xdd4   :  { %4686 = vst.sshfl [vmem:[#allocation2 + $0xd] sm:$0x1 pattern:$0x73625140] %v3533_v13  ;;  %141 = vperm.xlu1 %6900, %v111_v30   ;;  %v112_v51 = vld [vmem:[%s9332_s6 + $0x30] sm:$0xff] }
 0xdd6   :  { %6744 = vmatpush1.bf16.msra.mxu0 %v8958_v22  ;;  %6808 = vmatpush1.bf16.msra.mxu1 %v8960_v4  ;;  %v9801_v22 = vld [vmem:[#allocation41_spill] sm:$0xff]  ;;  %v9802_v4 = vld [vmem:[#allocation42_spill] sm:$0xff] }
 0xdd7   :  { %6746 = vmatprep.subr.bf16.mxu0 %v8964_v36  ;;  %6810 = vmatprep.subr.bf16.mxu1 %v8966_v14  ;;  %v9803_v36 = vld [vmem:[#allocation37_spill] sm:$0xff]  ;;  %v9804_v14 = vld [vmem:[#allocation14_spill] sm:$0xff] }
 0xdd8   :  { %151 = vperm.xlu1 %6900, %v113_v63  }
 0xdda   :  { %6748 = vmatpush1.bf16.msra.mxu0 %v8970_v56  ;;  %6812 = vmatpush1.bf16.msra.mxu1 %v8972_v20  ;;  %v9805_v56 = vld [vmem:[#allocation15_spill] sm:$0xff] }
 0xddb   :  { %6750 = vmatprep.subr.bf16.mxu0 %v8976_v32  ;;  %6814 = vmatprep.subr.bf16.mxu1 %v8978_v8  ;;  %v9806_v20 = vld [vmem:[#allocation39_spill] sm:$0xff]  ;;  %v9807_v32 = vld [vmem:[#allocation40_spill] sm:$0xff]  ;;  %v9808_v8 = vld [vmem:[#allocation33_spill] sm:$0xff] }
 0xdde   :  { %6752 = vmatpush1.bf16.msra.mxu0 %v8982_v1  ;;  %6816 = vmatpush1.bf16.msra.mxu1 %v8984_v29  ;;  %v9809_v1 = vld [vmem:[#allocation29_spill] sm:$0xff]  ;;  %v9810_v29 = vld [vmem:[#allocation34_spill] sm:$0xff] }
 0xddf   :  { %6754 = vmatprep.subr.bf16.mxu0 %v8990_v37  ;;  %6818 = vmatprep.subr.bf16.mxu1 %v8992_v44  ;;  %v9811_v37 = vld [vmem:[#allocation32_spill] sm:$0xff]  ;;  %v9812_v44 = vld [vmem:[#allocation35_spill] sm:$0xff] }
 0xde2   :  { %6756 = vmatpush1.bf16.msra.mxu0 %v8994_v18  ;;  %6820 = vmatpush1.bf16.msra.mxu1 %v8997_v5  ;;  %v9813_v18 = vld [vmem:[#allocation38_spill] sm:$0xff] }
 0xde3   :  { %6758 = vmatprep.subr.bf16.mxu0 %v9002_v23  ;;  %6822 = vmatprep.subr.bf16.mxu1 %v9004_v47  ;;  %v9814_v5 = vld [vmem:[#allocation22_spill] sm:$0xff] }
 0xde6   :  { %6760 = vmatpush1.bf16.msra.mxu0 %v9006_v54  ;;  %6824 = vmatpush1.bf16.msra.mxu1 %v9009_v60  ;;  %v9815_v54 = vld [vmem:[#allocation28_spill] sm:$0xff] }
 0xde7   :  { %6762 = vmatprep.subr.bf16.mxu0 %v9014_v34  ;;  %6826 = vmatprep.subr.bf16.mxu1 %v9016_v42 }
 0xdea   :  { %6764 = vmatpush1.bf16.msra.mxu0 %v9018_v61  ;;  %6828 = vmatpush1.bf16.msra.mxu1 %v9021_v55 }
 0xdeb   :  { %6766 = vmatprep.subr.bf16.mxu0 %v9026_v45  ;;  %6830 = vmatprep.subr.bf16.mxu1 %v9028_v57 }
 0xdee   :  { %6768 = vmatpush1.bf16.msra.mxu0 %v9030_v6  ;;  %6832 = vmatpush1.bf16.msra.mxu1 %v9033_v2 }
 0xdef   :  { %6770 = vmatprep.subr.bf16.mxu0 %v9038_v11  ;;  %6834 = vmatprep.subr.bf16.mxu1 %v9040_v39 }
 0xdf2   :  { %6772 = vmatpush1.bf16.msra.mxu0 %v9042_v40  ;;  %6836 = vmatpush1.bf16.msra.mxu1 %v9045_v49 }
 0xdf3   :  { %6774 = vmatprep.subr.bf16.mxu0 %v9050_v12  ;;  %6838 = vmatprep.subr.bf16.mxu1 %v9052_v9 }
 0xdf6   :  { %6776 = vmatpush1.bf16.msra.mxu0 %v9054_v19  ;;  %6840 = vmatpush1.bf16.msra.mxu1 %v9796_v50 }
 0xdf7   :  { %6778 = vmatprep.subr.bf16.mxu0 %v9797_v17  ;;  %6842 = vmatprep.subr.bf16.mxu1 %v9798_v15 }
 0xdfa   :  { %6780 = vmatpush1.bf16.msra.mxu0 %v9799_v0  ;;  %6844 = vmatpush1.bf16.msra.mxu1 %v9800_v28 }
 0xdfb   :  { %6782 = vmatprep.subr.bf16.mxu0 %v9801_v22  ;;  %6846 = vmatprep.subr.bf16.mxu1 %v9802_v4 }
 0xdfe   :  { %6784 = vmatpush1.bf16.msra.mxu0 %v9803_v36  ;;  %6848 = vmatpush1.bf16.msra.mxu1 %v9804_v14 }
 0xdff   :  { %6786 = vmatprep.subr.bf16.mxu0 %v9805_v56  ;;  %6850 = vmatprep.subr.bf16.mxu1 %v9806_v20 }
 0xe02   :  { %6788 = vmatpush1.bf16.msra.mxu0 %v9807_v32  ;;  %6852 = vmatpush1.bf16.msra.mxu1 %v9808_v8 }
 0xe03   :  { %6790 = vmatprep.subr.bf16.mxu0 %v9809_v1  ;;  %6854 = vmatprep.subr.bf16.mxu1 %v9099_v33 }
 0xe06   :  { %6792 = vmatpush1.bf16.msra.mxu0 %v9810_v29  ;;  %6856 = vmatpush1.bf16.msra.mxu1 %v9106_v24 }
 0xe07   :  { %6794 = vmatprep.subr.bf16.mxu0 %v9108_v53  ;;  %6858 = vmatprep.subr.bf16.mxu1 %v9110_v38 }
 0xe0a   :  { %6796 = vmatpush1.bf16.msra.mxu0 %v9113_v3  ;;  %6860 = vmatpush1.bf16.msra.mxu1 %v9117_v26 }
 0xe0b   :  { %6798 = vmatprep.subr.bf16.mxu0 %v9811_v37  ;;  %6862 = vmatprep.subr.bf16.mxu1 %v9812_v44 }
 0xe0e   :  { %6800 = vmatpush1.bf16.msra.mxu0 %v9813_v18  ;;  %6864 = vmatpush1.bf16.msra.mxu1 %v9814_v5 }
 0xea4   :  { %v3746_v23 = vpop.f32.mrb[28].mxu0  ;;  %v3817_v47 = vpop.f32.mrb[28].mxu1 }
 0xea5   :  { %v3747_v60 = vadd.f32 %v3746_v23, %v9815_v54  ;;  %v3748_v34 = vpop.f32.mrb[29].mxu0  ;;  %v3819_v42 = vpop.f32.mrb[29].mxu1  ;;  %v3818_v2 = vadd.f32 %v3817_v47, %v8380_v27 }
 0xea6   :  { %v3749_v61 = vadd.f32 %v3748_v34, %v8369_v35  ;;  %v3820_v57 = vadd.f32 %v3819_v42, %v8375_v58 }
 0xea7   :  { %v4687_v55 = vmul.f32 -1.442695, %v3747_v60 }
 0xea8   :  { %v4688_v45 = vmul.f32 -1.442695, %v3749_v61  ;;  %v4689_v6 = vmul.f32 -1.442695, %v3820_v57  ;;  %v4196_v61 = vld [vmem:[%s9331_s5 + $0x8] sm:$0xff]  ;;  %v4199_v57 = vld [vmem:[%s9331_s5 + $0x20] sm:$0xff] }
 0xea9   :  { %7125 = vpow2.f32 %v4687_v55  ;;  %v4197_v55 = vld [vmem:[%s9331_s5 + $0x10] sm:$0xff] }
 0xeaa   :  { %7127 = vpow2.f32 %v4688_v45 }
 0xeab   :  { %7129 = vpow2.f32 %v4689_v6  ;;  %v4200_v6 = vld [vmem:[%s9331_s5 + $0x28] sm:$0xff] }
 0xeac   :  { %7131 = vtanh.f32 %v3818_v2  ;;  %v4201_v2 = vld [vmem:[%s9331_s5 + $0x30] sm:$0xff] }
 0xeb3   :  { %v7126_v11 = vpop.eup %7125 }
 0xeb4   :  { %v7128_v39 = vpop.eup %7127  ;;  %v3825_v40 = vadd.f32 1.0, %v7126_v11  ;;  %v4202_v11 = vld [vmem:[%s9331_s5 + $0x38] sm:$0xff] }
 0xeb5   :  { %v3831_v49 = vadd.f32 1.0, %v7128_v39  ;;  %v7130_v12 = vpop.eup %7129  ;;  %v7236_v39 = vmov 0.0|0.0  }
 0xeb6   :  { %7133 = vrcp.f32 %v3825_v40  ;;  %v7132_v9 = vpop.eup %7131  ;;  %v3838_v33 = vadd.f32 1.0, %v7130_v12  ;;  %6865 = vmatprep.subr.bf16.mxu1 %v7236_v39  ;;  %v9817_v40 = vmov 0.0   ;;  %v127_v12 = vpop.permute.xlu1 %126 }
 0xeb7   :  { %7135 = vrcp.f32 %v3831_v49  ;;  %v117_v49 = vpop.permute.xlu0 %116 }
 0xeb8   :  { %7137 = vrcp.f32 %v3838_v33 }
 0xec0   :  { %v7134_v19 = vpop.eup %7133 }
 0xec1   :  { %v7136_v38 = vpop.eup %7135  ;;  %v3842_v24 = vmul.f32 %v7134_v19, %v7132_v9  ;;  %v132_v19 = vpop.permute.xlu1 %131 }
 0xec2   :  { %v3841_v53 = vmul.f32 %v7136_v38, %v9141_v31  ;;  %v7138_v26 = vpop.eup %7137  ;;  %v107_v31 = vld [vmem:[%s9332_s6 + $0x8] sm:$0xff] }
 0xec3   :  { %121 = vperm.xlu0 %6899, %v107_v31  }
 0xec4   :  { %v9214_v3 = vadd.f32 %v3842_v24, %v3841_v53 }
 0xec6   :  { %7139 = vtanh.f32 %v9214_v3 }
 0xec7   :  { %136 = vperm.xlu0 %6899, %v110_v43  }
 0xecb   :  { %146 = vperm.xlu0 %6899, %v112_v51  }
 0xed0   :  { %v7140_v16 = vpop.eup %7139 }
 0xed1   :  { %v3845_v59 = vmul.f32 %v7140_v16, %v7138_v26 }
 0xed3   :  { %v3853_v10 = vrot.slane %v3845_v59, %v8387_v21  ;;  %4065 = vmatprep.mubr.f32.mxu0 %v3845_v59  ;;  %4136 = vmatprep.mubr.f32.mxu1 %v3845_v59 }
 0xed4   :  { %4066 = vmatmul.mubr.f32.vlgmr.msra.gmra.mrb[30].mxu0 %v9816_v25  ;;  %4137 = vmatmul.mubr.f32.vlgmr.msra.gmra.mrb[30].mxu1 %v9816_v25  ;;  %v142_v25 = vpop.permute.xlu1 %141 }
 0xed5   :  { %v3854_v7 = vcombine.high %v3853_v10, %v3853_v10  ;;  %4690 = vst.sshfl [vmem:[#allocation2 + $0x6] sm:$0x1 pattern:$0x73625140] %v3853_v10  ;;  %4753 = vmatprep.mubr.msk.f32.mxu0 %vm4203_vm0, %v9223_v46  ;;  %4781 = vmatprep.mubr.msk.f32.mxu1 %vm7237_vm1, %v9817_v40 }
 0xed7   :  { %4691 = vst.sshfl [vmem:[#allocation2 + $0xe] sm:$0x1 pattern:$0x73625140] %v3854_v7 }
 0xf42   :  { %v122_v9 = vpop.permute.xlu0 %121 }
 0xf46   :  { %v137_v62 = vpop.permute.xlu0 %136 }
 0xfa7   :  { %v4067_v13 = vpop.f32.mrb[30].mxu0  ;;  %v4138_v50 = vpop.f32.mrb[30].mxu1 }
 0xfa8   :  { %v4068_v17 = vadd.f32 %v4067_v13, %v9815_v54  ;;  %v4069_v15 = vpop.f32.mrb[31].mxu0  ;;  %v4140_v0 = vpop.f32.mrb[31].mxu1  ;;  %v4139_v56 = vadd.f32 %v4138_v50, %v8380_v27 }
 0xfa9   :  { %v4070_v28 = vadd.f32 %v4069_v15, %v8369_v35  ;;  %v4141_v36 = vadd.f32 %v4140_v0, %v8375_v58  ;;  %v152_v13 = vpop.permute.xlu1 %151  ;;  %v147_v15 = vpop.permute.xlu0 %146 }
 0xfaa   :  { %v4692_v22 = vmul.f32 -1.442695, %v4068_v17 }
 0xfab   :  { %v4693_v4 = vmul.f32 -1.442695, %v4070_v28  ;;  %v4694_v14 = vmul.f32 -1.442695, %v4141_v36 }
 0xfac   :  { %7141 = vpow2.f32 %v4692_v22 }
 0xfad   :  { %7143 = vpow2.f32 %v4693_v4 }
 0xfae   :  { %7145 = vpow2.f32 %v4694_v14 }
 0xfaf   :  { %7147 = vtanh.f32 %v4139_v56 }
 0xfb6   :  { %v7142_v20 = vpop.eup %7141 }
 0xfb7   :  { %v7144_v32 = vpop.eup %7143  ;;  %v4146_v8 = vadd.f32 1.0, %v7142_v20 }
 0xfb8   :  { %v4152_v1 = vadd.f32 1.0, %v7144_v32  ;;  %v7146_v29 = vpop.eup %7145 }
 0xfb9   :  { %7149 = vrcp.f32 %v4146_v8  ;;  %v7148_v37 = vpop.eup %7147  ;;  %v4159_v5 = vadd.f32 1.0, %v7146_v29 }
 0xfba   :  { %7151 = vrcp.f32 %v4152_v1 }
 0xfbb   :  { %7153 = vrcp.f32 %v4159_v5 }
 0xfc3   :  { %v7150_v35 = vpop.eup %7149 }
 0xfc4   :  { %v7152_v44 = vpop.eup %7151  ;;  %v4163_v18 = vmul.f32 %v7150_v35, %v7148_v37 }
 0xfc5   :  { %v4162_v23 = vmul.f32 %v7152_v44, %v9214_v3  ;;  %v7154_v27 = vpop.eup %7153  ;;  %v4341_v44 = vld [vmem:[%s9333_s7] sm:$0x1] }
 0xfc7   :  { %v4164_v58 = vadd.f32 %v4163_v18, %v4162_v23 }
 0xfc9   :  { %7155 = vtanh.f32 %v4164_v58 }
 0xfd3   :  { %v7156_v47 = vpop.eup %7155 }
 0xfd4   :  { %v4166_v54 = vmul.f32 %v7156_v47, %v7154_v27 }
 0xfd6   :  { %v4174_v60 = vrot.slane %v4166_v54, %v8387_v21  ;;  %v4198_v21 = vld [vmem:[%s9331_s5 + $0x18] sm:$0xff] }
 0xfd8   :  { %v4175_v34 = vcombine.high %v4174_v60, %v4174_v60  ;;  %4695 = vst.sshfl [vmem:[#allocation2 + $0x7] sm:$0x1 pattern:$0x73625140] %v4174_v60 }
 0xfda   :  { %4696 = vst.sshfl [vmem:[#allocation2 + $0xf] sm:$0x1 pattern:$0x73625140] %v4175_v34 }
 0xfdf   :  { %v4194_v42 = vld [vmem:[#allocation2] sm:$0xff] }
 0xfe0   :  { %4751 = vmatprep.subr.mxu0 %v4194_v42 }
 0xfe1   :  { %4752 = vmatpush3.msra.mxu0 %v4194_v42  ;;  %v4419_v45 = vld [vmem:[#allocation2 + $0x8] sm:$0xff] }
 0xfe2   :  { %4754 = vmatmul.mubr.msk.f32.vlgmr.msra.gmra.mrb[32].mxu0 %vm4203_vm0, %v4196_v61  ;;  %4784 = vmatprep.subr.mxu0 %v4419_v45 }
 0xfe3   :  { %4785 = vmatpush3.msra.mxu0 %v4419_v45  ;;  %4756 = vmatprep.mubr.msk.f32.mxu0 %vm4203_vm0, %v4197_v55 }
 0xfe6   :  { %4757 = vmatmul.mubr.msk.f32.gmra.mrb[34].mxu0 %vm4203_vm0, %v4198_v21 }
 0xfe7   :  { %4759 = vmatprep.mubr.msk.f32.mxu0 %vm4203_vm0, %v4199_v57 }
 0xfea   :  { %4760 = vmatmul.mubr.msk.f32.gmra.mrb[36].mxu0 %vm4203_vm0, %v4200_v6 }
 0xfeb   :  { %4762 = vmatprep.mubr.msk.f32.mxu0 %vm4203_vm0, %v4201_v2 }
 0xfee   :  { %4763 = vmatmul.mubr.msk.f32.gmra.mrb[38].mxu0 %vm4203_vm0, %v4202_v11 }
 0xfef   :  { %4786 = vmatprep.mubr.msk.f32.mxu0 %vm4203_vm0, %v9223_v46 }
 0xff2   :  { %4787 = vmatmul.mubr.msk.f32.vlgmr.msra.gmra.mrb[40].mxu0 %vm4203_vm0, %v4196_v61 }
 0xff3   :  { %4789 = vmatprep.mubr.msk.f32.mxu0 %vm4203_vm0, %v4197_v55 }
 0xff6   :  { %4790 = vmatmul.mubr.msk.f32.gmra.mrb[42].mxu0 %vm4203_vm0, %v4198_v21 }
 0xff7   :  { %4792 = vmatprep.mubr.msk.f32.mxu0 %vm4203_vm0, %v4199_v57 }
 0xffa   :  { %4793 = vmatmul.mubr.msk.f32.gmra.mrb[44].mxu0 %vm4203_vm0, %v4200_v6 }
 0xffb   :  { %4795 = vmatprep.mubr.msk.f32.mxu0 %vm4203_vm0, %v4201_v2 }
 0xffe   :  { %4796 = vmatmul.mubr.msk.f32.gmra.mrb[46].mxu0 %vm4203_vm0, %v4202_v11 }
0x10b5   :  { %v4755_v38 = vpop.f32.mrb[32].mxu0 }
0x10b6   :  { %v4300_v24 = vadd.f32 %v4755_v38, %v122_v9  ;;  %v4294_v33 = vpop.f32.mrb[33].mxu0  ;;  %v4342_v38 = vstv %s9334_s8 }
0x10b7   :  { %v4295_v53 = vadd.f32 %v4294_v33, %v117_v49 }
0x10b8   :  { %v4334_v3 = vmax.f32 %v4300_v24, 0.0 }
0x10b9   :  { %v4333_v26 = vmax.f32 %v4295_v53, 0.0  ;;  %v4758_v16 = vpop.f32.mrb[34].mxu0 }
0x10ba   :  { %v4310_v59 = vadd.f32 %v4758_v16, %v132_v19  ;;  %v4304_v10 = vpop.f32.mrb[35].mxu0 }
0x10bb   :  { %v6866_v7 = vpack.c.bf16 %v4334_v3, %v4333_v26  ;;  %v4305_v46 = vadd.f32 %v4304_v10, %v127_v12 }
0x10bc   :  { %v4336_v52 = vmax.f32 %v4310_v59, 0.0 }
0x10bd   :  { %v4335_v48 = vmax.f32 %v4305_v46, 0.0  ;;  %v4761_v31 = vpop.f32.mrb[36].mxu0  ;;  %6867 = vmatpush3.bf16.msra.mxu1 %v6866_v7 }
0x10be   :  { %v4320_v41 = vadd.f32 %v4761_v31, %v142_v25  ;;  %v4314_v43 = vpop.f32.mrb[37].mxu0  ;;  %6868 = vmatprep.subr.bf16.mxu1 %v7236_v39 }
0x10bf   :  { %v6869_v30 = vpack.c.bf16 %v4336_v52, %v4335_v48  ;;  %v4315_v51 = vadd.f32 %v4314_v43, %v137_v62 }
0x10c0   :  { %v4338_v63 = vmax.f32 %v4320_v41, 0.0 }
0x10c1   :  { %v4337_v50 = vmax.f32 %v4315_v51, 0.0  ;;  %v4764_v17 = vpop.f32.mrb[38].mxu0  ;;  %6870 = vmatpush3.bf16.msra.mxu1 %v6869_v30 }
0x10c2   :  { %v4330_v0 = vadd.f32 %v4764_v17, %v152_v13  ;;  %v4324_v28 = vpop.f32.mrb[39].mxu0  ;;  %6871 = vmatprep.subr.bf16.mxu1 %v7236_v39 }
0x10c3   :  { %v6872_v22 = vpack.c.bf16 %v4338_v63, %v4337_v50  ;;  %v4325_v4 = vadd.f32 %v4324_v28, %v147_v15 }
0x10c4   :  { %v4340_v36 = vmax.f32 %v4330_v0, 0.0 }
0x10c5   :  { %v4339_v14 = vmax.f32 %v4325_v4, 0.0  ;;  %6873 = vmatpush3.bf16.msra.mxu1 %v6872_v22  ;;  %v4788_v56 = vpop.f32.mrb[40].mxu0 }
0x10c6   :  { %v4492_v20 = vadd.f32 %v4788_v56, %v122_v9  ;;  %v4486_v32 = vpop.f32.mrb[41].mxu0  ;;  %6874 = vmatprep.subr.bf16.mxu1 %v7236_v39 }
0x10c7   :  { %v6875_v8 = vpack.c.bf16 %v4340_v36, %v4339_v14  ;;  %v4487_v1 = vadd.f32 %v4486_v32, %v117_v49 }
0x10c8   :  { %v4526_v29 = vmax.f32 %v4492_v20, 0.0 }
0x10c9   :  { %v4525_v37 = vmax.f32 %v4487_v1, 0.0  ;;  %6876 = vmatpush3.bf16.msra.mxu1 %v6875_v8  ;;  %v4791_v35 = vpop.f32.mrb[42].mxu0 }
0x10ca   :  { %v4502_v18 = vadd.f32 %v4791_v35, %v132_v19  ;;  %v4496_v5 = vpop.f32.mrb[43].mxu0  ;;  %6877 = vmatprep.subr.bf16.mxu1 %v7236_v39 }
0x10cb   :  { %v6878_v23 = vpack.c.bf16 %v4526_v29, %v4525_v37  ;;  %v4497_v58 = vadd.f32 %v4496_v5, %v127_v12 }
0x10cc   :  { %v4528_v27 = vmax.f32 %v4502_v18, 0.0  ;;  %4782 = vmatmul.mubr.msk.f32.vlgmr.msra.gmra.mrb[32].mxu1 %vm4343_vm2, %v4341_v44 }
0x10cd   :  { %v4527_v47 = vmax.f32 %v4497_v58, 0.0  ;;  %v4794_v54 = vpop.f32.mrb[44].mxu0  ;;  %6879 = vmatpush3.bf16.msra.mxu1 %v6878_v23  ;;  %4814 = vmatprep.mubr.msk.f32.mxu1 %vm7237_vm1, %v9817_v40 }
0x10ce   :  { %v4512_v60 = vadd.f32 %v4794_v54, %v142_v25  ;;  %v4506_v34 = vpop.f32.mrb[45].mxu0  ;;  %6880 = vmatprep.subr.bf16.mxu1 %v7236_v39 }
0x10cf   :  { %v6881_v42 = vpack.c.bf16 %v4528_v27, %v4527_v47  ;;  %v4507_v61 = vadd.f32 %v4506_v34, %v137_v62 }
0x10d0   :  { %v4530_v55 = vmax.f32 %v4512_v60, 0.0 }
0x10d1   :  { %v4529_v45 = vmax.f32 %v4507_v61, 0.0  ;;  %v4797_v21 = vpop.f32.mrb[46].mxu0  ;;  %6882 = vmatpush3.bf16.msra.mxu1 %v6881_v42 }
0x10d2   :  { %v4522_v57 = vadd.f32 %v4797_v21, %v152_v13  ;;  %v4516_v6 = vpop.f32.mrb[47].mxu0  ;;  %6883 = vmatprep.subr.bf16.mxu1 %v7236_v39 }
0x10d3   :  { %v6884_v2 = vpack.c.bf16 %v4530_v55, %v4529_v45  ;;  %v4517_v11 = vadd.f32 %v4516_v6, %v147_v15 }
0x10d4   :  { %v4532_v49 = vmax.f32 %v4522_v57, 0.0 }
0x10d5   :  { %v4531_v12 = vmax.f32 %v4517_v11, 0.0  ;;  %6885 = vmatpush3.bf16.msra.mxu1 %v6884_v2 }
0x10d6   :  { %6886 = vmatprep.subr.bf16.mxu1 %v7236_v39 }
0x10d7   :  { %v6887_v40 = vpack.c.bf16 %v4532_v49, %v4531_v12 }
0x10d9   :  { %6888 = vmatpush3.bf16.msra.mxu1 %v6887_v40 }
0x10dc   :  { %4815 = vmatmul.mubr.msk.f32.vlgmr.msra.gmra.mrb[34].mxu1 %vm4343_vm2, %v4341_v44 }
0x119f   :  { %v4413_v9 = vpop.f32.mrb[32].mxu1 }
0x11a0   :  { %v4783_v19 = vpop.f32.mrb[33].mxu1  ;;  %v4414_v33 = vadd.f32 %v4413_v9, %v4342_v38 }
0x11a2   :  { %v4417_v16 = vmax.f32 %v4414_v33, 0.0 }
0x11af   :  { %v4599_v24 = vpop.f32.mrb[34].mxu1 }
0x11b0   :  { %v4600_v53 = vadd.f32 %v4599_v24, %v4342_v38  ;;  %v4816_v3 = vpop.f32.mrb[35].mxu1 }
0x11b2   :  { %v4603_v26 = vmax.f32 %v4600_v53, 0.0 }
0x11b4   :  { %v4605_v39 = vrot.slane %v4603_v26, 7 }
0x11b6   :  { %v4608_v59 = vsel %vm4607_vm3, %v4417_v16, %v4605_v39 }
0x11b7   :  { %4609 = vst [vmem:[#allocation9] sm:$0x3] %v4608_v59 }
0x11b8   :  { %7212 = shalt.err (!%p7209_p6)
}
0x11b9   :  { %s7213_s16 = scalar_lea.hbm %s9335_s9, 32 }
0x11ba   :  { %p7214_p7 = scmp.ne.s32.totalorder %s9335_s9, %s7213_s16  ;;  %p7217_p8 = scmp.lt.u32.totalorder %s7213_s16, %s9335_s9 }
0x11bc   :  { %p7219_p9 = pnand %p7217_p8, %p7214_p7 }
0x11be   :  { %7222 = shalt.err (!%p7219_p9)
}
0x11bf   :  { %4619 = dma.vmem_to_hbm [thread:$0]  %s4617_s14, 32, %s9335_s9, [#allocation6]  }
0x11c0   :  { %7227 = dma.done.wait [#allocation6], 32  }
0x11c1   :  { %7228 = vsyncadd [#allocation6], 4294967264 }
0x11c2   :  { %4623 = vsyncpa [#allocation5], 1 }
0x11c3   :  { %4624 = vsyncpa [#allocation8], 1 }
0x11c4   :  { %4625 = vsyncpa [#allocation6], 1 }

</bundles_post_ra>
